<compile_context>
chip_gen: v5e
topology: v5e:2x2
jax: 0.10.0
libtpu: 0.0.40
codegen_flags: <defaults>
</compile_context>

<pallas_src>
import jax
import jax.numpy as jnp
from jax import lax
from jax.experimental import pallas as pl
from jax.experimental.pallas import tpu as pltpu

SOS_TOKEN = 0
EOS_TOKEN = 1

HIDDEN = 32
IN_VOCAB = 128
OUT_VOCAB = 128
MAX_LENGTH = 8
GATE_BLOCK = 128          # all three GRU gates (3*H = 96 lanes) packed into one 128-lane block


def seq2seq_kernel(src_ref,
                   enc_emb_ref, enc_wih_ref, enc_whh_ref, enc_bih_ref, enc_bhh_ref,
                   dec_emb_ref, dec_wih_ref, dec_whh_ref, dec_bih_ref, dec_bhh_ref,
                   dec_wout_ref, dec_bout_ref,
                   out_ref,
                   xsrc_ref, enc_ig_ref, dec_ig_ref):
    H = enc_emb_ref.shape[1]
    vocab = dec_wout_ref.shape[1]
    input_length = src_ref.shape[0]
    target_length = out_ref.shape[0]

    # Rows after EOS must be zero (reference initializes outputs with torch.zeros and breaks).
    out_ref[...] = jnp.zeros_like(out_ref)

    # ---------------- Precompute the decoder input-to-hidden gates for the WHOLE vocab ----------
    # dec_ig[v] = relu(emb_v) @ W_ih + b_ih  (one (V,H)@(H,128) matmul; per decode step this
    # becomes a single sublane row read instead of an embedding gather + ReLU + matmul).
    dec_ig_ref[...] = (
        jnp.dot(jnp.maximum(dec_emb_ref[...], 0.0).astype(jnp.bfloat16), dec_wih_ref[...],
                preferred_element_type=jnp.float32)
        + dec_bih_ref[...])

    # ---------------- Precompute the encoder input-to-hidden gates for the source sentence ------
    # Gather the source embeddings once (static trip count), then one (L,H)@(H,128) matmul.
    for i in range(input_length):
        xsrc_ref[pl.ds(i, 1), :] = enc_emb_ref[pl.ds(src_ref[i], 1), :]
    enc_ig_ref[...] = (
        jnp.dot(xsrc_ref[...].astype(jnp.bfloat16), enc_wih_ref[...],
                preferred_element_type=jnp.float32)
        + enc_bih_ref[...])

    def gru_from_ig(ig, h, whh, bhh):
        """GRU cell given precomputed input gates.
        ig: (1, 128) f32 = W_ih x + b_ih, gates r|z|n at lane offsets 0/32/64.
        h:  (1, H) f32.  whh: (H, 128) bf16 (same gate layout).  bhh: (1, 128) f32."""
        hg = jnp.dot(h.astype(jnp.bfloat16), whh,
                     preferred_element_type=jnp.float32) + bhh          # (1, 128)
        rz = jax.nn.sigmoid(ig + hg)                                    # lanes [0, 2H) meaningful
        r = rz[:, 0:H]
        z = rz[:, H:2 * H]
        n = jnp.tanh(ig[:, 2 * H:3 * H] + r * hg[:, 2 * H:3 * H])       # PyTorch n-gate
        return (1.0 - z) * n + z * h

    # ---------------- Encoder: GRU over all source tokens, keep final hidden --------------------
    enc_whh = enc_whh_ref[...]
    enc_bhh = enc_bhh_ref[...]

    def enc_body(i, h):
        ig = enc_ig_ref[pl.ds(i, 1), :]                                 # (1, 128)
        return gru_from_ig(ig, h, enc_whh, enc_bhh)

    enc_h = lax.fori_loop(0, input_length, enc_body,
                          jnp.zeros((1, H), jnp.float32), unroll=True)

    # ---------------- Decoder: greedy decode; post-EOS steps are skipped entirely ---------------
    # Decoder-only constants are loaded here (not at kernel entry) so they are not live across
    # the encoder loop; the argmax iota is hoisted out of the loop (JAX does not CSE it).
    dec_whh = dec_whh_ref[...]
    dec_bhh = dec_bhh_ref[...]
    dec_wout = dec_wout_ref[...]
    dec_bout = dec_bout_ref[...]
    lane = lax.broadcasted_iota(jnp.int32, (1, vocab), 1)

    def dec_body(t, carry):
        h, tok, done = carry

        def active_step(operands):
            h_in, tok_in = operands
            ig = dec_ig_ref[pl.ds(tok_in, 1), :]                        # relu(emb)@W_ih + b_ih
            h_new = gru_from_ig(ig, h_in, dec_whh, dec_bhh)
            logits = jnp.dot(h_new.astype(jnp.bfloat16), dec_wout,
                             preferred_element_type=jnp.float32) + dec_bout   # (1, V)
            maxv = jnp.max(logits, axis=-1, keepdims=True)
            # argmax(logits) == argmax(log_softmax(logits)): reuse maxv, no second reduce; the
            # scalar next-token is ready before the softmax tail finishes.
            next_tok = jnp.min(jnp.where(logits == maxv, lane, vocab)).astype(jnp.int32)
            logp = logits - (jnp.log(jnp.sum(jnp.exp(logits - maxv),
                                             axis=-1, keepdims=True)) + maxv)  # LogSoftmax
            out_ref[pl.ds(t, 1), :] = logp
            new_done = jnp.where(next_tok == EOS_TOKEN, jnp.int32(1), jnp.int32(0))
            return h_new, next_tok, new_done

        def skip_step(operands):
            h_in, tok_in = operands
            return h_in, tok_in, jnp.int32(1)

        return lax.cond(done == 0, active_step, skip_step, (h, tok))

    # TODO(synk): random.random() teacher forcing has no in-kernel equivalent; the outer
    # reference code fixes teacher_forcing_ratio = 0, so deterministic greedy decoding with the
    # done flag reproduces its outputs exactly.
    lax.fori_loop(0, target_length, dec_body,
                  (enc_h, jnp.int32(SOS_TOKEN), jnp.int32(0)), unroll=True)


def make_params(key):
    def init(k, shape, scale=0.1):
        return scale * jax.random.normal(k, shape, dtype=jnp.float32)

    keys = jax.random.split(key, 12)
    H, G = HIDDEN, 3 * HIDDEN
    return dict(
        enc_emb=init(keys[0], (IN_VOCAB, H)),
        enc_wih=init(keys[1], (H, G)),        # pre-transposed PyTorch weight_ih (gate order r,z,n)
        enc_whh=init(keys[2], (H, G)),
        enc_bih=init(keys[3], (1, G)),
        enc_bhh=init(keys[4], (1, G)),
        dec_emb=init(keys[5], (OUT_VOCAB, H)),
        dec_wih=init(keys[6], (H, G)),
        dec_whh=init(keys[7], (H, G)),
        dec_bih=init(keys[8], (1, G)),
        dec_bhh=init(keys[9], (1, G)),
        dec_wout=init(keys[10], (H, OUT_VOCAB)),
        dec_bout=init(keys[11], (1, OUT_VOCAB)),
    )


def _pack_gru_half(w, b):
    """Pad one GRU weight half (H, 3H) / bias (1, 3H) to a single 128-lane gate block.

    Gate order r|z|n is preserved at lane offsets 0/H/2H; lanes [3H, 128) are zero.
    Weights are stored bf16 (MXU-native); biases stay f32.  Done once in the wrapper.
    """
    wp = jnp.zeros((HIDDEN, GATE_BLOCK), jnp.float32).at[:, :3 * HIDDEN].set(w)
    bp = jnp.zeros((1, GATE_BLOCK), jnp.float32).at[:, :3 * HIDDEN].set(b)
    return wp.astype(jnp.bfloat16), bp


def pack_params(p):
    enc_wih, enc_bih = _pack_gru_half(p["enc_wih"], p["enc_bih"])
    enc_whh, enc_bhh = _pack_gru_half(p["enc_whh"], p["enc_bhh"])
    dec_wih, dec_bih = _pack_gru_half(p["dec_wih"], p["dec_bih"])
    dec_whh, dec_bhh = _pack_gru_half(p["dec_whh"], p["dec_bhh"])
    return dict(
        enc_emb=p["enc_emb"],
        enc_wih=enc_wih, enc_whh=enc_whh, enc_bih=enc_bih, enc_bhh=enc_bhh,
        dec_emb=p["dec_emb"],
        dec_wih=dec_wih, dec_whh=dec_whh, dec_bih=dec_bih, dec_bhh=dec_bhh,
        dec_wout=p["dec_wout"].astype(jnp.bfloat16), dec_bout=p["dec_bout"],
    )


@jax.jit
def seq2seq_forward(packed, input_lang, output_lang):
    """input_lang: (input_length,) int32 source tokens.
    output_lang: (target_length, batch=1) int32 target tokens (shape only; teacher forcing off).
    Returns `outputs` of shape (target_length, batch_size, vocab_size), matching PyTorch."""
    target_length, batch_size = output_lang.shape
    input_length = input_lang.shape[0]
    assert batch_size == 1, "tutorial-style decoder runs with batch=1"

    vmem = pl.BlockSpec(memory_space=pltpu.MemorySpace.VMEM)
    smem = pl.BlockSpec(memory_space=pltpu.MemorySpace.SMEM)
    out = pl.pallas_call(
        seq2seq_kernel,
        out_shape=jax.ShapeDtypeStruct((target_length, OUT_VOCAB), jnp.float32),
        in_specs=[smem] + [vmem] * 12,
        out_specs=vmem,
        scratch_shapes=[
            pltpu.VMEM((input_length, HIDDEN), jnp.float32),      # gathered source embeddings
            pltpu.VMEM((input_length, GATE_BLOCK), jnp.float32),  # encoder i-gates per src token
            pltpu.VMEM((OUT_VOCAB, GATE_BLOCK), jnp.float32),     # decoder i-gate table per token
        ],
    )(input_lang,
      packed["enc_emb"], packed["enc_wih"], packed["enc_whh"], packed["enc_bih"], packed["enc_bhh"],
      packed["dec_emb"], packed["dec_wih"], packed["dec_whh"], packed["dec_bih"], packed["dec_bhh"],
      packed["dec_wout"], packed["dec_bout"])
    return out.reshape(target_length, batch_size, OUT_VOCAB)


if __name__ == "__main__":
    key = jax.random.PRNGKey(0)
    pkey, skey, tkey = jax.random.split(key, 3)
    raw_params = make_params(pkey)
    packed = pack_params(raw_params)          # fused/padded bf16 layout built once, outside kernel

    input_length = 8
    target_length = MAX_LENGTH
    input_lang = jax.random.randint(skey, (input_length,), 2, IN_VOCAB, dtype=jnp.int32)
    output_lang = jax.random.randint(tkey, (target_length, 1), 2, OUT_VOCAB, dtype=jnp.int32)

    outputs = seq2seq_forward(packed, input_lang, output_lang)
    jax.block_until_ready(outputs)

    assert outputs.shape == (target_length, 1, OUT_VOCAB)
    assert bool(jnp.all(jnp.isfinite(outputs)))
    print("KERNEL_OK")
</pallas_src>

<mosaic_0001>
module attributes {stable_mosaic.version = 11 : i64} {
  func.func @seq2seq_kernel(%arg0: memref<8xi32, #tpu.memory_space<smem>>, %arg1: memref<128x32xf32, #tpu.memory_space<vmem>>, %arg2: memref<32x128xbf16, #tpu.memory_space<vmem>>, %arg3: memref<32x128xbf16, #tpu.memory_space<vmem>>, %arg4: memref<1x128xf32, #tpu.memory_space<vmem>>, %arg5: memref<1x128xf32, #tpu.memory_space<vmem>>, %arg6: memref<128x32xf32, #tpu.memory_space<vmem>>, %arg7: memref<32x128xbf16, #tpu.memory_space<vmem>>, %arg8: memref<32x128xbf16, #tpu.memory_space<vmem>>, %arg9: memref<1x128xf32, #tpu.memory_space<vmem>>, %arg10: memref<1x128xf32, #tpu.memory_space<vmem>>, %arg11: memref<32x128xbf16, #tpu.memory_space<vmem>>, %arg12: memref<1x128xf32, #tpu.memory_space<vmem>>, %arg13: memref<8x128xf32, #tpu.memory_space<vmem>>, %arg14: memref<8x32xf32, #tpu.memory_space<vmem>>, %arg15: memref<8x128xf32, #tpu.memory_space<vmem>>, %arg16: memref<128x128xf32, #tpu.memory_space<vmem>>) attributes {dimension_semantics = [], scalar_prefetch = 0 : i64, scratch_operands = 3 : i64, tpu.core_type = #tpu.core_type<tc>} {
    %cst = arith.constant 0.000000e+00 : f32
    %0 = vector.broadcast %cst : f32 to vector<8x128xf32>
    %c0 = arith.constant 0 : index
    %c0_0 = arith.constant 0 : index
    %1 = vector.load %arg13[%c0, %c0_0] : memref<8x128xf32, #tpu.memory_space<vmem>>, vector<8x128xf32>
    tpu.vector_store %arg13[%c0, %c0_0], %0 {strides = array<i32>} : memref<8x128xf32, #tpu.memory_space<vmem>>, vector<8x128xf32>,
    %c0_1 = arith.constant 0 : index
    %c0_2 = arith.constant 0 : index
    %2 = vector.load %arg6[%c0_1, %c0_2] : memref<128x32xf32, #tpu.memory_space<vmem>>, vector<128x32xf32>
    %cst_3 = arith.constant 0.000000e+00 : f32
    %3 = vector.broadcast %cst_3 : f32 to vector<128x32xf32>
    %4 = arith.maximumf %2, %3 : vector<128x32xf32>
    %5 = arith.truncf %4 : vector<128x32xf32> to vector<128x32xbf16>
    %c0_4 = arith.constant 0 : index
    %c0_5 = arith.constant 0 : index
    %6 = vector.load %arg7[%c0_4, %c0_5] : memref<32x128xbf16, #tpu.memory_space<vmem>>, vector<32x128xbf16>
    %cst_6 = arith.constant dense<0.000000e+00> : vector<128x128xf32>
    %7 = tpu.matmul %5, %6, %cst_6 {dimension_numbers = #tpu.dot_dimension_numbers<[1], [0], [0], [1], [0, 0, 1, 1], [], []>} : vector<128x32xbf16>, vector<32x128xbf16>, vector<128x128xf32> -> vector<128x128xf32>
    %c0_7 = arith.constant 0 : index
    %c0_8 = arith.constant 0 : index
    %8 = vector.load %arg9[%c0_7, %c0_8] : memref<1x128xf32, #tpu.memory_space<vmem>>, vector<1x128xf32>
    %9 = vector.broadcast %8 : vector<1x128xf32> to vector<128x128xf32>
    %10 = arith.addf %7, %9 : vector<128x128xf32>
    %c0_9 = arith.constant 0 : index
    %c0_10 = arith.constant 0 : index
    %11 = vector.load %arg16[%c0_9, %c0_10] : memref<128x128xf32, #tpu.memory_space<vmem>>, vector<128x128xf32>
    tpu.vector_store %arg16[%c0_9, %c0_10], %10 {strides = array<i32>} : memref<128x128xf32, #tpu.memory_space<vmem>>, vector<128x128xf32>,
    %c0_11 = arith.constant 0 : index
    %12 = memref.load %arg0[%c0_11] : memref<8xi32, #tpu.memory_space<smem>>
    %13 = arith.index_cast %12 : i32 to index
    %c0_12 = arith.constant 0 : index
    %14 = vector.load %arg1[%13, %c0_12] : memref<128x32xf32, #tpu.memory_space<vmem>>, vector<1x32xf32>
    %c0_13 = arith.constant 0 : index
    %c0_14 = arith.constant 0 : index
    %15 = vector.load %arg14[%c0_13, %c0_14] : memref<8x32xf32, #tpu.memory_space<vmem>>, vector<1x32xf32>
    tpu.vector_store %arg14[%c0_13, %c0_14], %14 {strides = array<i32>} : memref<8x32xf32, #tpu.memory_space<vmem>>, vector<1x32xf32>,
    %c1 = arith.constant 1 : index
    %16 = memref.load %arg0[%c1] : memref<8xi32, #tpu.memory_space<smem>>
    %17 = arith.index_cast %16 : i32 to index
    %c0_15 = arith.constant 0 : index
    %18 = vector.load %arg1[%17, %c0_15] : memref<128x32xf32, #tpu.memory_space<vmem>>, vector<1x32xf32>
    %c1_16 = arith.constant 1 : index
    %c0_17 = arith.constant 0 : index
    %19 = vector.load %arg14[%c1_16, %c0_17] : memref<8x32xf32, #tpu.memory_space<vmem>>, vector<1x32xf32>
    tpu.vector_store %arg14[%c1_16, %c0_17], %18 {strides = array<i32>} : memref<8x32xf32, #tpu.memory_space<vmem>>, vector<1x32xf32>,
    %c2 = arith.constant 2 : index
    %20 = memref.load %arg0[%c2] : memref<8xi32, #tpu.memory_space<smem>>
    %21 = arith.index_cast %20 : i32 to index
    %c0_18 = arith.constant 0 : index
    %22 = vector.load %arg1[%21, %c0_18] : memref<128x32xf32, #tpu.memory_space<vmem>>, vector<1x32xf32>
    %c2_19 = arith.constant 2 : index
    %c0_20 = arith.constant 0 : index
    %23 = vector.load %arg14[%c2_19, %c0_20] : memref<8x32xf32, #tpu.memory_space<vmem>>, vector<1x32xf32>
    tpu.vector_store %arg14[%c2_19, %c0_20], %22 {strides = array<i32>} : memref<8x32xf32, #tpu.memory_space<vmem>>, vector<1x32xf32>,
    %c3 = arith.constant 3 : index
    %24 = memref.load %arg0[%c3] : memref<8xi32, #tpu.memory_space<smem>>
    %25 = arith.index_cast %24 : i32 to index
    %c0_21 = arith.constant 0 : index
    %26 = vector.load %arg1[%25, %c0_21] : memref<128x32xf32, #tpu.memory_space<vmem>>, vector<1x32xf32>
    %c3_22 = arith.constant 3 : index
    %c0_23 = arith.constant 0 : index
    %27 = vector.load %arg14[%c3_22, %c0_23] : memref<8x32xf32, #tpu.memory_space<vmem>>, vector<1x32xf32>
    tpu.vector_store %arg14[%c3_22, %c0_23], %26 {strides = array<i32>} : memref<8x32xf32, #tpu.memory_space<vmem>>, vector<1x32xf32>,
    %c4 = arith.constant 4 : index
    %28 = memref.load %arg0[%c4] : memref<8xi32, #tpu.memory_space<smem>>
    %29 = arith.index_cast %28 : i32 to index
    %c0_24 = arith.constant 0 : index
    %30 = vector.load %arg1[%29, %c0_24] : memref<128x32xf32, #tpu.memory_space<vmem>>, vector<1x32xf32>
    %c4_25 = arith.constant 4 : index
    %c0_26 = arith.constant 0 : index
    %31 = vector.load %arg14[%c4_25, %c0_26] : memref<8x32xf32, #tpu.memory_space<vmem>>, vector<1x32xf32>
    tpu.vector_store %arg14[%c4_25, %c0_26], %30 {strides = array<i32>} : memref<8x32xf32, #tpu.memory_space<vmem>>, vector<1x32xf32>,
    %c5 = arith.constant 5 : index
    %32 = memref.load %arg0[%c5] : memref<8xi32, #tpu.memory_space<smem>>
    %33 = arith.index_cast %32 : i32 to index
    %c0_27 = arith.constant 0 : index
    %34 = vector.load %arg1[%33, %c0_27] : memref<128x32xf32, #tpu.memory_space<vmem>>, vector<1x32xf32>
    %c5_28 = arith.constant 5 : index
    %c0_29 = arith.constant 0 : index
    %35 = vector.load %arg14[%c5_28, %c0_29] : memref<8x32xf32, #tpu.memory_space<vmem>>, vector<1x32xf32>
    tpu.vector_store %arg14[%c5_28, %c0_29], %34 {strides = array<i32>} : memref<8x32xf32, #tpu.memory_space<vmem>>, vector<1x32xf32>,
    %c6 = arith.constant 6 : index
    %36 = memref.load %arg0[%c6] : memref<8xi32, #tpu.memory_space<smem>>
    %37 = arith.index_cast %36 : i32 to index
    %c0_30 = arith.constant 0 : index
    %38 = vector.load %arg1[%37, %c0_30] : memref<128x32xf32, #tpu.memory_space<vmem>>, vector<1x32xf32>
    %c6_31 = arith.constant 6 : index
    %c0_32 = arith.constant 0 : index
    %39 = vector.load %arg14[%c6_31, %c0_32] : memref<8x32xf32, #tpu.memory_space<vmem>>, vector<1x32xf32>
    tpu.vector_store %arg14[%c6_31, %c0_32], %38 {strides = array<i32>} : memref<8x32xf32, #tpu.memory_space<vmem>>, vector<1x32xf32>,
    %c7 = arith.constant 7 : index
    %40 = memref.load %arg0[%c7] : memref<8xi32, #tpu.memory_space<smem>>
    %41 = arith.index_cast %40 : i32 to index
    %c0_33 = arith.constant 0 : index
    %42 = vector.load %arg1[%41, %c0_33] : memref<128x32xf32, #tpu.memory_space<vmem>>, vector<1x32xf32>
    %c7_34 = arith.constant 7 : index
    %c0_35 = arith.constant 0 : index
    %43 = vector.load %arg14[%c7_34, %c0_35] : memref<8x32xf32, #tpu.memory_space<vmem>>, vector<1x32xf32>
    tpu.vector_store %arg14[%c7_34, %c0_35], %42 {strides = array<i32>} : memref<8x32xf32, #tpu.memory_space<vmem>>, vector<1x32xf32>,
    %c0_36 = arith.constant 0 : index
    %c0_37 = arith.constant 0 : index
    %44 = vector.load %arg14[%c0_36, %c0_37] : memref<8x32xf32, #tpu.memory_space<vmem>>, vector<8x32xf32>
    %45 = arith.truncf %44 : vector<8x32xf32> to vector<8x32xbf16>
    %c0_38 = arith.constant 0 : index
    %c0_39 = arith.constant 0 : index
    %46 = vector.load %arg2[%c0_38, %c0_39] : memref<32x128xbf16, #tpu.memory_space<vmem>>, vector<32x128xbf16>
    %cst_40 = arith.constant dense<0.000000e+00> : vector<8x128xf32>
    %47 = tpu.matmul %45, %46, %cst_40 {dimension_numbers = #tpu.dot_dimension_numbers<[1], [0], [0], [1], [0, 0, 1, 1], [], []>} : vector<8x32xbf16>, vector<32x128xbf16>, vector<8x128xf32> -> vector<8x128xf32>
    %c0_41 = arith.constant 0 : index
    %c0_42 = arith.constant 0 : index
    %48 = vector.load %arg4[%c0_41, %c0_42] : memref<1x128xf32, #tpu.memory_space<vmem>>, vector<1x128xf32>
    %49 = vector.broadcast %48 : vector<1x128xf32> to vector<8x128xf32>
    %50 = arith.addf %47, %49 : vector<8x128xf32>
    %c0_43 = arith.constant 0 : index
    %c0_44 = arith.constant 0 : index
    %51 = vector.load %arg15[%c0_43, %c0_44] : memref<8x128xf32, #tpu.memory_space<vmem>>, vector<8x128xf32>
    tpu.vector_store %arg15[%c0_43, %c0_44], %50 {strides = array<i32>} : memref<8x128xf32, #tpu.memory_space<vmem>>, vector<8x128xf32>,
    %c0_45 = arith.constant 0 : index
    %c0_46 = arith.constant 0 : index
    %52 = vector.load %arg3[%c0_45, %c0_46] : memref<32x128xbf16, #tpu.memory_space<vmem>>, vector<32x128xbf16>
    %c0_47 = arith.constant 0 : index
    %c0_48 = arith.constant 0 : index
    %53 = vector.load %arg5[%c0_47, %c0_48] : memref<1x128xf32, #tpu.memory_space<vmem>>, vector<1x128xf32>
    %cst_49 = arith.constant 0.000000e+00 : f32
    %54 = vector.broadcast %cst_49 : f32 to vector<1x32xf32>
    %c0_i32 = arith.constant 0 : i32
    %55 = arith.index_cast %c0_i32 : i32 to index
    %c0_50 = arith.constant 0 : index
    %56 = vector.load %arg15[%55, %c0_50] : memref<8x128xf32, #tpu.memory_space<vmem>>, vector<1x128xf32>
    %57 = arith.truncf %54 : vector<1x32xf32> to vector<1x32xbf16>
    %cst_51 = arith.constant dense<0.000000e+00> : vector<1x128xf32>
    %58 = tpu.matmul %57, %52, %cst_51 {dimension_numbers = #tpu.dot_dimension_numbers<[1], [0], [0], [1], [0, 0, 1, 1], [], []>} : vector<1x32xbf16>, vector<32x128xbf16>, vector<1x128xf32> -> vector<1x128xf32>
    %59 = arith.addf %58, %53 : vector<1x128xf32>
    %60 = arith.addf %56, %59 : vector<1x128xf32>
    %61 = arith.negf %60 : vector<1x128xf32>
    %62 = math.exp %61 : vector<1x128xf32>
    %cst_52 = arith.constant 1.000000e+00 : f32
    %63 = vector.broadcast %cst_52 : f32 to vector<1x128xf32>
    %64 = arith.addf %63, %62 : vector<1x128xf32>
    %65 = arith.divf %63, %64 : vector<1x128xf32>
    %66 = vector.extract_strided_slice %65 {offsets = [0, 0], sizes = [1, 32], strides = [1, 1]} : vector<1x128xf32> to vector<1x32xf32>
    %67 = vector.extract_strided_slice %65 {offsets = [0, 32], sizes = [1, 32], strides = [1, 1]} : vector<1x128xf32> to vector<1x32xf32>
    %68 = vector.extract_strided_slice %56 {offsets = [0, 64], sizes = [1, 32], strides = [1, 1]} : vector<1x128xf32> to vector<1x32xf32>
    %69 = vector.extract_strided_slice %59 {offsets = [0, 64], sizes = [1, 32], strides = [1, 1]} : vector<1x128xf32> to vector<1x32xf32>
    %70 = arith.mulf %66, %69 : vector<1x32xf32>
    %71 = arith.addf %68, %70 : vector<1x32xf32>
    %72 = math.tanh %71 : vector<1x32xf32>
    %cst_53 = arith.constant 1.000000e+00 : f32
    %73 = vector.broadcast %cst_53 : f32 to vector<1x32xf32>
    %74 = arith.subf %73, %67 : vector<1x32xf32>
    %75 = arith.mulf %74, %72 : vector<1x32xf32>
    %76 = arith.mulf %67, %54 : vector<1x32xf32>
    %77 = arith.addf %75, %76 : vector<1x32xf32>
    %c1_i32 = arith.constant 1 : i32
    %78 = arith.index_cast %c1_i32 : i32 to index
    %c0_54 = arith.constant 0 : index
    %79 = vector.load %arg15[%78, %c0_54] : memref<8x128xf32, #tpu.memory_space<vmem>>, vector<1x128xf32>
    %80 = arith.truncf %77 : vector<1x32xf32> to vector<1x32xbf16>
    %cst_55 = arith.constant dense<0.000000e+00> : vector<1x128xf32>
    %81 = tpu.matmul %80, %52, %cst_55 {dimension_numbers = #tpu.dot_dimension_numbers<[1], [0], [0], [1], [0, 0, 1, 1], [], []>} : vector<1x32xbf16>, vector<32x128xbf16>, vector<1x128xf32> -> vector<1x128xf32>
    %82 = arith.addf %81, %53 : vector<1x128xf32>
    %83 = arith.addf %79, %82 : vector<1x128xf32>
    %84 = arith.negf %83 : vector<1x128xf32>
    %85 = math.exp %84 : vector<1x128xf32>
    %cst_56 = arith.constant 1.000000e+00 : f32
    %86 = vector.broadcast %cst_56 : f32 to vector<1x128xf32>
    %87 = arith.addf %86, %85 : vector<1x128xf32>
    %88 = arith.divf %86, %87 : vector<1x128xf32>
    %89 = vector.extract_strided_slice %88 {offsets = [0, 0], sizes = [1, 32], strides = [1, 1]} : vector<1x128xf32> to vector<1x32xf32>
    %90 = vector.extract_strided_slice %88 {offsets = [0, 32], sizes = [1, 32], strides = [1, 1]} : vector<1x128xf32> to vector<1x32xf32>
    %91 = vector.extract_strided_slice %79 {offsets = [0, 64], sizes = [1, 32], strides = [1, 1]} : vector<1x128xf32> to vector<1x32xf32>
    %92 = vector.extract_strided_slice %82 {offsets = [0, 64], sizes = [1, 32], strides = [1, 1]} : vector<1x128xf32> to vector<1x32xf32>
    %93 = arith.mulf %89, %92 : vector<1x32xf32>
    %94 = arith.addf %91, %93 : vector<1x32xf32>
    %95 = math.tanh %94 : vector<1x32xf32>
    %cst_57 = arith.constant 1.000000e+00 : f32
    %96 = vector.broadcast %cst_57 : f32 to vector<1x32xf32>
    %97 = arith.subf %96, %90 : vector<1x32xf32>
    %98 = arith.mulf %97, %95 : vector<1x32xf32>
    %99 = arith.mulf %90, %77 : vector<1x32xf32>
    %100 = arith.addf %98, %99 : vector<1x32xf32>
    %c2_i32 = arith.constant 2 : i32
    %101 = arith.index_cast %c2_i32 : i32 to index
    %c0_58 = arith.constant 0 : index
    %102 = vector.load %arg15[%101, %c0_58] : memref<8x128xf32, #tpu.memory_space<vmem>>, vector<1x128xf32>
    %103 = arith.truncf %100 : vector<1x32xf32> to vector<1x32xbf16>
    %cst_59 = arith.constant dense<0.000000e+00> : vector<1x128xf32>
    %104 = tpu.matmul %103, %52, %cst_59 {dimension_numbers = #tpu.dot_dimension_numbers<[1], [0], [0], [1], [0, 0, 1, 1], [], []>} : vector<1x32xbf16>, vector<32x128xbf16>, vector<1x128xf32> -> vector<1x128xf32>
    %105 = arith.addf %104, %53 : vector<1x128xf32>
    %106 = arith.addf %102, %105 : vector<1x128xf32>
    %107 = arith.negf %106 : vector<1x128xf32>
    %108 = math.exp %107 : vector<1x128xf32>
    %cst_60 = arith.constant 1.000000e+00 : f32
    %109 = vector.broadcast %cst_60 : f32 to vector<1x128xf32>
    %110 = arith.addf %109, %108 : vector<1x128xf32>
    %111 = arith.divf %109, %110 : vector<1x128xf32>
    %112 = vector.extract_strided_slice %111 {offsets = [0, 0], sizes = [1, 32], strides = [1, 1]} : vector<1x128xf32> to vector<1x32xf32>
    %113 = vector.extract_strided_slice %111 {offsets = [0, 32], sizes = [1, 32], strides = [1, 1]} : vector<1x128xf32> to vector<1x32xf32>
    %114 = vector.extract_strided_slice %102 {offsets = [0, 64], sizes = [1, 32], strides = [1, 1]} : vector<1x128xf32> to vector<1x32xf32>
    %115 = vector.extract_strided_slice %105 {offsets = [0, 64], sizes = [1, 32], strides = [1, 1]} : vector<1x128xf32> to vector<1x32xf32>
    %116 = arith.mulf %112, %115 : vector<1x32xf32>
    %117 = arith.addf %114, %116 : vector<1x32xf32>
    %118 = math.tanh %117 : vector<1x32xf32>
    %cst_61 = arith.constant 1.000000e+00 : f32
    %119 = vector.broadcast %cst_61 : f32 to vector<1x32xf32>
    %120 = arith.subf %119, %113 : vector<1x32xf32>
    %121 = arith.mulf %120, %118 : vector<1x32xf32>
    %122 = arith.mulf %113, %100 : vector<1x32xf32>
    %123 = arith.addf %121, %122 : vector<1x32xf32>
    %c3_i32 = arith.constant 3 : i32
    %124 = arith.index_cast %c3_i32 : i32 to index
    %c0_62 = arith.constant 0 : index
    %125 = vector.load %arg15[%124, %c0_62] : memref<8x128xf32, #tpu.memory_space<vmem>>, vector<1x128xf32>
    %126 = arith.truncf %123 : vector<1x32xf32> to vector<1x32xbf16>
    %cst_63 = arith.constant dense<0.000000e+00> : vector<1x128xf32>
    %127 = tpu.matmul %126, %52, %cst_63 {dimension_numbers = #tpu.dot_dimension_numbers<[1], [0], [0], [1], [0, 0, 1, 1], [], []>} : vector<1x32xbf16>, vector<32x128xbf16>, vector<1x128xf32> -> vector<1x128xf32>
    %128 = arith.addf %127, %53 : vector<1x128xf32>
    %129 = arith.addf %125, %128 : vector<1x128xf32>
    %130 = arith.negf %129 : vector<1x128xf32>
    %131 = math.exp %130 : vector<1x128xf32>
    %cst_64 = arith.constant 1.000000e+00 : f32
    %132 = vector.broadcast %cst_64 : f32 to vector<1x128xf32>
    %133 = arith.addf %132, %131 : vector<1x128xf32>
    %134 = arith.divf %132, %133 : vector<1x128xf32>
    %135 = vector.extract_strided_slice %134 {offsets = [0, 0], sizes = [1, 32], strides = [1, 1]} : vector<1x128xf32> to vector<1x32xf32>
    %136 = vector.extract_strided_slice %134 {offsets = [0, 32], sizes = [1, 32], strides = [1, 1]} : vector<1x128xf32> to vector<1x32xf32>
    %137 = vector.extract_strided_slice %125 {offsets = [0, 64], sizes = [1, 32], strides = [1, 1]} : vector<1x128xf32> to vector<1x32xf32>
    %138 = vector.extract_strided_slice %128 {offsets = [0, 64], sizes = [1, 32], strides = [1, 1]} : vector<1x128xf32> to vector<1x32xf32>
    %139 = arith.mulf %135, %138 : vector<1x32xf32>
    %140 = arith.addf %137, %139 : vector<1x32xf32>
    %141 = math.tanh %140 : vector<1x32xf32>
    %cst_65 = arith.constant 1.000000e+00 : f32
    %142 = vector.broadcast %cst_65 : f32 to vector<1x32xf32>
    %143 = arith.subf %142, %136 : vector<1x32xf32>
    %144 = arith.mulf %143, %141 : vector<1x32xf32>
    %145 = arith.mulf %136, %123 : vector<1x32xf32>
    %146 = arith.addf %144, %145 : vector<1x32xf32>
    %c4_i32 = arith.constant 4 : i32
    %147 = arith.index_cast %c4_i32 : i32 to index
    %c0_66 = arith.constant 0 : index
    %148 = vector.load %arg15[%147, %c0_66] : memref<8x128xf32, #tpu.memory_space<vmem>>, vector<1x128xf32>
    %149 = arith.truncf %146 : vector<1x32xf32> to vector<1x32xbf16>
    %cst_67 = arith.constant dense<0.000000e+00> : vector<1x128xf32>
    %150 = tpu.matmul %149, %52, %cst_67 {dimension_numbers = #tpu.dot_dimension_numbers<[1], [0], [0], [1], [0, 0, 1, 1], [], []>} : vector<1x32xbf16>, vector<32x128xbf16>, vector<1x128xf32> -> vector<1x128xf32>
    %151 = arith.addf %150, %53 : vector<1x128xf32>
    %152 = arith.addf %148, %151 : vector<1x128xf32>
    %153 = arith.negf %152 : vector<1x128xf32>
    %154 = math.exp %153 : vector<1x128xf32>
    %cst_68 = arith.constant 1.000000e+00 : f32
    %155 = vector.broadcast %cst_68 : f32 to vector<1x128xf32>
    %156 = arith.addf %155, %154 : vector<1x128xf32>
    %157 = arith.divf %155, %156 : vector<1x128xf32>
    %158 = vector.extract_strided_slice %157 {offsets = [0, 0], sizes = [1, 32], strides = [1, 1]} : vector<1x128xf32> to vector<1x32xf32>
    %159 = vector.extract_strided_slice %157 {offsets = [0, 32], sizes = [1, 32], strides = [1, 1]} : vector<1x128xf32> to vector<1x32xf32>
    %160 = vector.extract_strided_slice %148 {offsets = [0, 64], sizes = [1, 32], strides = [1, 1]} : vector<1x128xf32> to vector<1x32xf32>
    %161 = vector.extract_strided_slice %151 {offsets = [0, 64], sizes = [1, 32], strides = [1, 1]} : vector<1x128xf32> to vector<1x32xf32>
    %162 = arith.mulf %158, %161 : vector<1x32xf32>
    %163 = arith.addf %160, %162 : vector<1x32xf32>
    %164 = math.tanh %163 : vector<1x32xf32>
    %cst_69 = arith.constant 1.000000e+00 : f32
    %165 = vector.broadcast %cst_69 : f32 to vector<1x32xf32>
    %166 = arith.subf %165, %159 : vector<1x32xf32>
    %167 = arith.mulf %166, %164 : vector<1x32xf32>
    %168 = arith.mulf %159, %146 : vector<1x32xf32>
    %169 = arith.addf %167, %168 : vector<1x32xf32>
    %c5_i32 = arith.constant 5 : i32
    %170 = arith.index_cast %c5_i32 : i32 to index
    %c0_70 = arith.constant 0 : index
    %171 = vector.load %arg15[%170, %c0_70] : memref<8x128xf32, #tpu.memory_space<vmem>>, vector<1x128xf32>
    %172 = arith.truncf %169 : vector<1x32xf32> to vector<1x32xbf16>
    %cst_71 = arith.constant dense<0.000000e+00> : vector<1x128xf32>
    %173 = tpu.matmul %172, %52, %cst_71 {dimension_numbers = #tpu.dot_dimension_numbers<[1], [0], [0], [1], [0, 0, 1, 1], [], []>} : vector<1x32xbf16>, vector<32x128xbf16>, vector<1x128xf32> -> vector<1x128xf32>
    %174 = arith.addf %173, %53 : vector<1x128xf32>
    %175 = arith.addf %171, %174 : vector<1x128xf32>
    %176 = arith.negf %175 : vector<1x128xf32>
    %177 = math.exp %176 : vector<1x128xf32>
    %cst_72 = arith.constant 1.000000e+00 : f32
    %178 = vector.broadcast %cst_72 : f32 to vector<1x128xf32>
    %179 = arith.addf %178, %177 : vector<1x128xf32>
    %180 = arith.divf %178, %179 : vector<1x128xf32>
    %181 = vector.extract_strided_slice %180 {offsets = [0, 0], sizes = [1, 32], strides = [1, 1]} : vector<1x128xf32> to vector<1x32xf32>
    %182 = vector.extract_strided_slice %180 {offsets = [0, 32], sizes = [1, 32], strides = [1, 1]} : vector<1x128xf32> to vector<1x32xf32>
    %183 = vector.extract_strided_slice %171 {offsets = [0, 64], sizes = [1, 32], strides = [1, 1]} : vector<1x128xf32> to vector<1x32xf32>
    %184 = vector.extract_strided_slice %174 {offsets = [0, 64], sizes = [1, 32], strides = [1, 1]} : vector<1x128xf32> to vector<1x32xf32>
    %185 = arith.mulf %181, %184 : vector<1x32xf32>
    %186 = arith.addf %183, %185 : vector<1x32xf32>
    %187 = math.tanh %186 : vector<1x32xf32>
    %cst_73 = arith.constant 1.000000e+00 : f32
    %188 = vector.broadcast %cst_73 : f32 to vector<1x32xf32>
    %189 = arith.subf %188, %182 : vector<1x32xf32>
    %190 = arith.mulf %189, %187 : vector<1x32xf32>
    %191 = arith.mulf %182, %169 : vector<1x32xf32>
    %192 = arith.addf %190, %191 : vector<1x32xf32>
    %c6_i32 = arith.constant 6 : i32
    %193 = arith.index_cast %c6_i32 : i32 to index
    %c0_74 = arith.constant 0 : index
    %194 = vector.load %arg15[%193, %c0_74] : memref<8x128xf32, #tpu.memory_space<vmem>>, vector<1x128xf32>
    %195 = arith.truncf %192 : vector<1x32xf32> to vector<1x32xbf16>
    %cst_75 = arith.constant dense<0.000000e+00> : vector<1x128xf32>
    %196 = tpu.matmul %195, %52, %cst_75 {dimension_numbers = #tpu.dot_dimension_numbers<[1], [0], [0], [1], [0, 0, 1, 1], [], []>} : vector<1x32xbf16>, vector<32x128xbf16>, vector<1x128xf32> -> vector<1x128xf32>
    %197 = arith.addf %196, %53 : vector<1x128xf32>
    %198 = arith.addf %194, %197 : vector<1x128xf32>
    %199 = arith.negf %198 : vector<1x128xf32>
    %200 = math.exp %199 : vector<1x128xf32>
    %cst_76 = arith.constant 1.000000e+00 : f32
    %201 = vector.broadcast %cst_76 : f32 to vector<1x128xf32>
    %202 = arith.addf %201, %200 : vector<1x128xf32>
    %203 = arith.divf %201, %202 : vector<1x128xf32>
    %204 = vector.extract_strided_slice %203 {offsets = [0, 0], sizes = [1, 32], strides = [1, 1]} : vector<1x128xf32> to vector<1x32xf32>
    %205 = vector.extract_strided_slice %203 {offsets = [0, 32], sizes = [1, 32], strides = [1, 1]} : vector<1x128xf32> to vector<1x32xf32>
    %206 = vector.extract_strided_slice %194 {offsets = [0, 64], sizes = [1, 32], strides = [1, 1]} : vector<1x128xf32> to vector<1x32xf32>
    %207 = vector.extract_strided_slice %197 {offsets = [0, 64], sizes = [1, 32], strides = [1, 1]} : vector<1x128xf32> to vector<1x32xf32>
    %208 = arith.mulf %204, %207 : vector<1x32xf32>
    %209 = arith.addf %206, %208 : vector<1x32xf32>
    %210 = math.tanh %209 : vector<1x32xf32>
    %cst_77 = arith.constant 1.000000e+00 : f32
    %211 = vector.broadcast %cst_77 : f32 to vector<1x32xf32>
    %212 = arith.subf %211, %205 : vector<1x32xf32>
    %213 = arith.mulf %212, %210 : vector<1x32xf32>
    %214 = arith.mulf %205, %192 : vector<1x32xf32>
    %215 = arith.addf %213, %214 : vector<1x32xf32>
    %c7_i32 = arith.constant 7 : i32
    %216 = arith.index_cast %c7_i32 : i32 to index
    %c0_78 = arith.constant 0 : index
    %217 = vector.load %arg15[%216, %c0_78] : memref<8x128xf32, #tpu.memory_space<vmem>>, vector<1x128xf32>
    %218 = arith.truncf %215 : vector<1x32xf32> to vector<1x32xbf16>
    %cst_79 = arith.constant dense<0.000000e+00> : vector<1x128xf32>
    %219 = tpu.matmul %218, %52, %cst_79 {dimension_numbers = #tpu.dot_dimension_numbers<[1], [0], [0], [1], [0, 0, 1, 1], [], []>} : vector<1x32xbf16>, vector<32x128xbf16>, vector<1x128xf32> -> vector<1x128xf32>
    %220 = arith.addf %219, %53 : vector<1x128xf32>
    %221 = arith.addf %217, %220 : vector<1x128xf32>
    %222 = arith.negf %221 : vector<1x128xf32>
    %223 = math.exp %222 : vector<1x128xf32>
    %cst_80 = arith.constant 1.000000e+00 : f32
    %224 = vector.broadcast %cst_80 : f32 to vector<1x128xf32>
    %225 = arith.addf %224, %223 : vector<1x128xf32>
    %226 = arith.divf %224, %225 : vector<1x128xf32>
    %227 = vector.extract_strided_slice %226 {offsets = [0, 0], sizes = [1, 32], strides = [1, 1]} : vector<1x128xf32> to vector<1x32xf32>
    %228 = vector.extract_strided_slice %226 {offsets = [0, 32], sizes = [1, 32], strides = [1, 1]} : vector<1x128xf32> to vector<1x32xf32>
    %229 = vector.extract_strided_slice %217 {offsets = [0, 64], sizes = [1, 32], strides = [1, 1]} : vector<1x128xf32> to vector<1x32xf32>
    %230 = vector.extract_strided_slice %220 {offsets = [0, 64], sizes = [1, 32], strides = [1, 1]} : vector<1x128xf32> to vector<1x32xf32>
    %231 = arith.mulf %227, %230 : vector<1x32xf32>
    %232 = arith.addf %229, %231 : vector<1x32xf32>
    %233 = math.tanh %232 : vector<1x32xf32>
    %cst_81 = arith.constant 1.000000e+00 : f32
    %234 = vector.broadcast %cst_81 : f32 to vector<1x32xf32>
    %235 = arith.subf %234, %228 : vector<1x32xf32>
    %236 = arith.mulf %235, %233 : vector<1x32xf32>
    %237 = arith.mulf %228, %215 : vector<1x32xf32>
    %238 = arith.addf %236, %237 : vector<1x32xf32>
    %c8_i32 = arith.constant 8 : i32
    %c0_82 = arith.constant 0 : index
    %c0_83 = arith.constant 0 : index
    %239 = vector.load %arg8[%c0_82, %c0_83] : memref<32x128xbf16, #tpu.memory_space<vmem>>, vector<32x128xbf16>
    %c0_84 = arith.constant 0 : index
    %c0_85 = arith.constant 0 : index
    %240 = vector.load %arg10[%c0_84, %c0_85] : memref<1x128xf32, #tpu.memory_space<vmem>>, vector<1x128xf32>
    %c0_86 = arith.constant 0 : index
    %c0_87 = arith.constant 0 : index
    %241 = vector.load %arg11[%c0_86, %c0_87] : memref<32x128xbf16, #tpu.memory_space<vmem>>, vector<32x128xbf16>
    %c0_88 = arith.constant 0 : index
    %c0_89 = arith.constant 0 : index
    %242 = vector.load %arg12[%c0_88, %c0_89] : memref<1x128xf32, #tpu.memory_space<vmem>>, vector<1x128xf32>
    %243 = tpu.iota {dimensions = array<i32: 1>} : vector<1x128xi32>
    %c0_i32_90 = arith.constant 0 : i32
    %c0_i32_91 = arith.constant 0 : i32
    %c0_i32_92 = arith.constant 0 : i32
    %c0_i32_93 = arith.constant 0 : i32
    %244 = arith.cmpi eq, %c0_i32_91, %c0_i32_93 : i32
    %245 = arith.extui %244 : i1 to i32
    %c0_i32_94 = arith.constant 0 : i32
    %246 = arith.cmpi ne, %245, %c0_i32_94 : i32
    %247:3 = scf.if %246 -> (vector<1x32xf32>, i32, i32) {
      %276 = arith.index_cast %c0_i32_90 : i32 to index
      %c0_117 = arith.constant 0 : index
      %277 = vector.load %arg16[%276, %c0_117] : memref<128x128xf32, #tpu.memory_space<vmem>>, vector<1x128xf32>
      %278 = arith.truncf %238 : vector<1x32xf32> to vector<1x32xbf16>
      %cst_118 = arith.constant dense<0.000000e+00> : vector<1x128xf32>
      %279 = tpu.matmul %278, %239, %cst_118 {dimension_numbers = #tpu.dot_dimension_numbers<[1], [0], [0], [1], [0, 0, 1, 1], [], []>} : vector<1x32xbf16>, vector<32x128xbf16>, vector<1x128xf32> -> vector<1x128xf32>
      %280 = arith.addf %279, %240 : vector<1x128xf32>
      %281 = arith.addf %277, %280 : vector<1x128xf32>
      %282 = arith.negf %281 : vector<1x128xf32>
      %283 = math.exp %282 : vector<1x128xf32>
      %cst_119 = arith.constant 1.000000e+00 : f32
      %284 = vector.broadcast %cst_119 : f32 to vector<1x128xf32>
      %285 = arith.addf %284, %283 : vector<1x128xf32>
      %286 = arith.divf %284, %285 : vector<1x128xf32>
      %287 = vector.extract_strided_slice %286 {offsets = [0, 0], sizes = [1, 32], strides = [1, 1]} : vector<1x128xf32> to vector<1x32xf32>
      %288 = vector.extract_strided_slice %286 {offsets = [0, 32], sizes = [1, 32], strides = [1, 1]} : vector<1x128xf32> to vector<1x32xf32>
      %289 = vector.extract_strided_slice %277 {offsets = [0, 64], sizes = [1, 32], strides = [1, 1]} : vector<1x128xf32> to vector<1x32xf32>
      %290 = vector.extract_strided_slice %280 {offsets = [0, 64], sizes = [1, 32], strides = [1, 1]} : vector<1x128xf32> to vector<1x32xf32>
      %291 = arith.mulf %287, %290 : vector<1x32xf32>
      %292 = arith.addf %289, %291 : vector<1x32xf32>
      %293 = math.tanh %292 : vector<1x32xf32>
      %cst_120 = arith.constant 1.000000e+00 : f32
      %294 = vector.broadcast %cst_120 : f32 to vector<1x32xf32>
      %295 = arith.subf %294, %288 : vector<1x32xf32>
      %296 = arith.mulf %295, %293 : vector<1x32xf32>
      %297 = arith.mulf %288, %238 : vector<1x32xf32>
      %298 = arith.addf %296, %297 : vector<1x32xf32>
      %299 = arith.truncf %298 : vector<1x32xf32> to vector<1x32xbf16>
      %cst_121 = arith.constant dense<0.000000e+00> : vector<1x128xf32>
      %300 = tpu.matmul %299, %241, %cst_121 {dimension_numbers = #tpu.dot_dimension_numbers<[1], [0], [0], [1], [0, 0, 1, 1], [], []>} : vector<1x32xbf16>, vector<32x128xbf16>, vector<1x128xf32> -> vector<1x128xf32>
      %301 = arith.addf %300, %242 : vector<1x128xf32>
      %cst_122 = arith.constant dense<0xFF800000> : vector<1xf32>
      %302 = vector.multi_reduction <maximumf>, %301, %cst_122 [1] : vector<1x128xf32> to vector<1xf32>
      %303 = vector.shape_cast %302 : vector<1xf32> to vector<1x1xf32>
      %304 = vector.broadcast %303 : vector<1x1xf32> to vector<1x128xf32>
      %305 = arith.cmpf oeq, %301, %304 : vector<1x128xf32>
      %c128_i32 = arith.constant 128 : i32
      %306 = vector.broadcast %c128_i32 : i32 to vector<1x128xi32>
      %307 = arith.select %305, %243, %306 : vector<1x128xi1>, vector<1x128xi32>
      %308 = vector.shape_cast %307 : vector<1x128xi32> to vector<1x1x128xi32>
      %cst_123 = arith.constant dense<2147483647> : vector<1xi32>
      %309 = vector.multi_reduction <minsi>, %308, %cst_123 [1, 2] : vector<1x1x128xi32> to vector<1xi32>
      %310 = vector.shape_cast %309 : vector<1xi32> to vector<1x1x1xi32>
      %311 = vector.extract %310[0, 0, 0] : i32 from vector<1x1x1xi32>
      %312 = vector.broadcast %303 : vector<1x1xf32> to vector<1x128xf32>
      %313 = arith.subf %301, %312 : vector<1x128xf32>
      %314 = math.exp %313 : vector<1x128xf32>
      %cst_124 = arith.constant dense<0.000000e+00> : vector<1xf32>
      %315 = vector.multi_reduction <add>, %314, %cst_124 [1] : vector<1x128xf32> to vector<1xf32>
      %316 = vector.shape_cast %315 : vector<1xf32> to vector<1x1xf32>
      %317 = math.log %316 : vector<1x1xf32>
      %318 = arith.addf %317, %303 : vector<1x1xf32>
      %319 = vector.broadcast %318 : vector<1x1xf32> to vector<1x128xf32>
      %320 = arith.subf %301, %319 : vector<1x128xf32>
      %321 = arith.index_cast %c0_i32_92 : i32 to index
      %c0_125 = arith.constant 0 : index
      %322 = vector.load %arg13[%321, %c0_125] : memref<8x128xf32, #tpu.memory_space<vmem>>, vector<1x128xf32>
      tpu.vector_store %arg13[%321, %c0_125], %320 {strides = array<i32>} : memref<8x128xf32, #tpu.memory_space<vmem>>, vector<1x128xf32>,
      %c1_i32_126 = arith.constant 1 : i32
      %323 = arith.cmpi eq, %311, %c1_i32_126 : i32
      %c1_i32_127 = arith.constant 1 : i32
      %c0_i32_128 = arith.constant 0 : i32
      %324 = arith.select %323, %c1_i32_127, %c0_i32_128 : i32
      scf.yield %298, %311, %324 : vector<1x32xf32>, i32, i32
    } else {
      %c1_i32_117 = arith.constant 1 : i32
      scf.yield %238, %c0_i32_90, %c1_i32_117 : vector<1x32xf32>, i32, i32
    }
    %c1_i32_95 = arith.constant 1 : i32
    %c0_i32_96 = arith.constant 0 : i32
    %248 = arith.cmpi eq, %247#2, %c0_i32_96 : i32
    %249 = arith.extui %248 : i1 to i32
    %c0_i32_97 = arith.constant 0 : i32
    %250 = arith.cmpi ne, %249, %c0_i32_97 : i32
    %251:3 = scf.if %250 -> (vector<1x32xf32>, i32, i32) {
      %276 = arith.index_cast %247#1 : i32 to index
      %c0_117 = arith.constant 0 : index
      %277 = vector.load %arg16[%276, %c0_117] : memref<128x128xf32, #tpu.memory_space<vmem>>, vector<1x128xf32>
      %278 = arith.truncf %247#0 : vector<1x32xf32> to vector<1x32xbf16>
      %cst_118 = arith.constant dense<0.000000e+00> : vector<1x128xf32>
      %279 = tpu.matmul %278, %239, %cst_118 {dimension_numbers = #tpu.dot_dimension_numbers<[1], [0], [0], [1], [0, 0, 1, 1], [], []>} : vector<1x32xbf16>, vector<32x128xbf16>, vector<1x128xf32> -> vector<1x128xf32>
      %280 = arith.addf %279, %240 : vector<1x128xf32>
      %281 = arith.addf %277, %280 : vector<1x128xf32>
      %282 = arith.negf %281 : vector<1x128xf32>
      %283 = math.exp %282 : vector<1x128xf32>
      %cst_119 = arith.constant 1.000000e+00 : f32
      %284 = vector.broadcast %cst_119 : f32 to vector<1x128xf32>
      %285 = arith.addf %284, %283 : vector<1x128xf32>
      %286 = arith.divf %284, %285 : vector<1x128xf32>
      %287 = vector.extract_strided_slice %286 {offsets = [0, 0], sizes = [1, 32], strides = [1, 1]} : vector<1x128xf32> to vector<1x32xf32>
      %288 = vector.extract_strided_slice %286 {offsets = [0, 32], sizes = [1, 32], strides = [1, 1]} : vector<1x128xf32> to vector<1x32xf32>
      %289 = vector.extract_strided_slice %277 {offsets = [0, 64], sizes = [1, 32], strides = [1, 1]} : vector<1x128xf32> to vector<1x32xf32>
      %290 = vector.extract_strided_slice %280 {offsets = [0, 64], sizes = [1, 32], strides = [1, 1]} : vector<1x128xf32> to vector<1x32xf32>
      %291 = arith.mulf %287, %290 : vector<1x32xf32>
      %292 = arith.addf %289, %291 : vector<1x32xf32>
      %293 = math.tanh %292 : vector<1x32xf32>
      %cst_120 = arith.constant 1.000000e+00 : f32
      %294 = vector.broadcast %cst_120 : f32 to vector<1x32xf32>
      %295 = arith.subf %294, %288 : vector<1x32xf32>
      %296 = arith.mulf %295, %293 : vector<1x32xf32>
      %297 = arith.mulf %288, %247#0 : vector<1x32xf32>
      %298 = arith.addf %296, %297 : vector<1x32xf32>
      %299 = arith.truncf %298 : vector<1x32xf32> to vector<1x32xbf16>
      %cst_121 = arith.constant dense<0.000000e+00> : vector<1x128xf32>
      %300 = tpu.matmul %299, %241, %cst_121 {dimension_numbers = #tpu.dot_dimension_numbers<[1], [0], [0], [1], [0, 0, 1, 1], [], []>} : vector<1x32xbf16>, vector<32x128xbf16>, vector<1x128xf32> -> vector<1x128xf32>
      %301 = arith.addf %300, %242 : vector<1x128xf32>
      %cst_122 = arith.constant dense<0xFF800000> : vector<1xf32>
      %302 = vector.multi_reduction <maximumf>, %301, %cst_122 [1] : vector<1x128xf32> to vector<1xf32>
      %303 = vector.shape_cast %302 : vector<1xf32> to vector<1x1xf32>
      %304 = vector.broadcast %303 : vector<1x1xf32> to vector<1x128xf32>
      %305 = arith.cmpf oeq, %301, %304 : vector<1x128xf32>
      %c128_i32 = arith.constant 128 : i32
      %306 = vector.broadcast %c128_i32 : i32 to vector<1x128xi32>
      %307 = arith.select %305, %243, %306 : vector<1x128xi1>, vector<1x128xi32>
      %308 = vector.shape_cast %307 : vector<1x128xi32> to vector<1x1x128xi32>
      %cst_123 = arith.constant dense<2147483647> : vector<1xi32>
      %309 = vector.multi_reduction <minsi>, %308, %cst_123 [1, 2] : vector<1x1x128xi32> to vector<1xi32>
      %310 = vector.shape_cast %309 : vector<1xi32> to vector<1x1x1xi32>
      %311 = vector.extract %310[0, 0, 0] : i32 from vector<1x1x1xi32>
      %312 = vector.broadcast %303 : vector<1x1xf32> to vector<1x128xf32>
      %313 = arith.subf %301, %312 : vector<1x128xf32>
      %314 = math.exp %313 : vector<1x128xf32>
      %cst_124 = arith.constant dense<0.000000e+00> : vector<1xf32>
      %315 = vector.multi_reduction <add>, %314, %cst_124 [1] : vector<1x128xf32> to vector<1xf32>
      %316 = vector.shape_cast %315 : vector<1xf32> to vector<1x1xf32>
      %317 = math.log %316 : vector<1x1xf32>
      %318 = arith.addf %317, %303 : vector<1x1xf32>
      %319 = vector.broadcast %318 : vector<1x1xf32> to vector<1x128xf32>
      %320 = arith.subf %301, %319 : vector<1x128xf32>
      %321 = arith.index_cast %c1_i32_95 : i32 to index
      %c0_125 = arith.constant 0 : index
      %322 = vector.load %arg13[%321, %c0_125] : memref<8x128xf32, #tpu.memory_space<vmem>>, vector<1x128xf32>
      tpu.vector_store %arg13[%321, %c0_125], %320 {strides = array<i32>} : memref<8x128xf32, #tpu.memory_space<vmem>>, vector<1x128xf32>,
      %c1_i32_126 = arith.constant 1 : i32
      %323 = arith.cmpi eq, %311, %c1_i32_126 : i32
      %c1_i32_127 = arith.constant 1 : i32
      %c0_i32_128 = arith.constant 0 : i32
      %324 = arith.select %323, %c1_i32_127, %c0_i32_128 : i32
      scf.yield %298, %311, %324 : vector<1x32xf32>, i32, i32
    } else {
      %c1_i32_117 = arith.constant 1 : i32
      scf.yield %247#0, %247#1, %c1_i32_117 : vector<1x32xf32>, i32, i32
    }
    %c2_i32_98 = arith.constant 2 : i32
    %c0_i32_99 = arith.constant 0 : i32
    %252 = arith.cmpi eq, %251#2, %c0_i32_99 : i32
    %253 = arith.extui %252 : i1 to i32
    %c0_i32_100 = arith.constant 0 : i32
    %254 = arith.cmpi ne, %253, %c0_i32_100 : i32
    %255:3 = scf.if %254 -> (vector<1x32xf32>, i32, i32) {
      %276 = arith.index_cast %251#1 : i32 to index
      %c0_117 = arith.constant 0 : index
      %277 = vector.load %arg16[%276, %c0_117] : memref<128x128xf32, #tpu.memory_space<vmem>>, vector<1x128xf32>
      %278 = arith.truncf %251#0 : vector<1x32xf32> to vector<1x32xbf16>
      %cst_118 = arith.constant dense<0.000000e+00> : vector<1x128xf32>
      %279 = tpu.matmul %278, %239, %cst_118 {dimension_numbers = #tpu.dot_dimension_numbers<[1], [0], [0], [1], [0, 0, 1, 1], [], []>} : vector<1x32xbf16>, vector<32x128xbf16>, vector<1x128xf32> -> vector<1x128xf32>
      %280 = arith.addf %279, %240 : vector<1x128xf32>
      %281 = arith.addf %277, %280 : vector<1x128xf32>
      %282 = arith.negf %281 : vector<1x128xf32>
      %283 = math.exp %282 : vector<1x128xf32>
      %cst_119 = arith.constant 1.000000e+00 : f32
      %284 = vector.broadcast %cst_119 : f32 to vector<1x128xf32>
      %285 = arith.addf %284, %283 : vector<1x128xf32>
      %286 = arith.divf %284, %285 : vector<1x128xf32>
      %287 = vector.extract_strided_slice %286 {offsets = [0, 0], sizes = [1, 32], strides = [1, 1]} : vector<1x128xf32> to vector<1x32xf32>
      %288 = vector.extract_strided_slice %286 {offsets = [0, 32], sizes = [1, 32], strides = [1, 1]} : vector<1x128xf32> to vector<1x32xf32>
      %289 = vector.extract_strided_slice %277 {offsets = [0, 64], sizes = [1, 32], strides = [1, 1]} : vector<1x128xf32> to vector<1x32xf32>
      %290 = vector.extract_strided_slice %280 {offsets = [0, 64], sizes = [1, 32], strides = [1, 1]} : vector<1x128xf32> to vector<1x32xf32>
      %291 = arith.mulf %287, %290 : vector<1x32xf32>
      %292 = arith.addf %289, %291 : vector<1x32xf32>
      %293 = math.tanh %292 : vector<1x32xf32>
      %cst_120 = arith.constant 1.000000e+00 : f32
      %294 = vector.broadcast %cst_120 : f32 to vector<1x32xf32>
      %295 = arith.subf %294, %288 : vector<1x32xf32>
      %296 = arith.mulf %295, %293 : vector<1x32xf32>
      %297 = arith.mulf %288, %251#0 : vector<1x32xf32>
      %298 = arith.addf %296, %297 : vector<1x32xf32>
      %299 = arith.truncf %298 : vector<1x32xf32> to vector<1x32xbf16>
      %cst_121 = arith.constant dense<0.000000e+00> : vector<1x128xf32>
      %300 = tpu.matmul %299, %241, %cst_121 {dimension_numbers = #tpu.dot_dimension_numbers<[1], [0], [0], [1], [0, 0, 1, 1], [], []>} : vector<1x32xbf16>, vector<32x128xbf16>, vector<1x128xf32> -> vector<1x128xf32>
      %301 = arith.addf %300, %242 : vector<1x128xf32>
      %cst_122 = arith.constant dense<0xFF800000> : vector<1xf32>
      %302 = vector.multi_reduction <maximumf>, %301, %cst_122 [1] : vector<1x128xf32> to vector<1xf32>
      %303 = vector.shape_cast %302 : vector<1xf32> to vector<1x1xf32>
      %304 = vector.broadcast %303 : vector<1x1xf32> to vector<1x128xf32>
      %305 = arith.cmpf oeq, %301, %304 : vector<1x128xf32>
      %c128_i32 = arith.constant 128 : i32
      %306 = vector.broadcast %c128_i32 : i32 to vector<1x128xi32>
      %307 = arith.select %305, %243, %306 : vector<1x128xi1>, vector<1x128xi32>
      %308 = vector.shape_cast %307 : vector<1x128xi32> to vector<1x1x128xi32>
      %cst_123 = arith.constant dense<2147483647> : vector<1xi32>
      %309 = vector.multi_reduction <minsi>, %308, %cst_123 [1, 2] : vector<1x1x128xi32> to vector<1xi32>
      %310 = vector.shape_cast %309 : vector<1xi32> to vector<1x1x1xi32>
      %311 = vector.extract %310[0, 0, 0] : i32 from vector<1x1x1xi32>
      %312 = vector.broadcast %303 : vector<1x1xf32> to vector<1x128xf32>
      %313 = arith.subf %301, %312 : vector<1x128xf32>
      %314 = math.exp %313 : vector<1x128xf32>
      %cst_124 = arith.constant dense<0.000000e+00> : vector<1xf32>
      %315 = vector.multi_reduction <add>, %314, %cst_124 [1] : vector<1x128xf32> to vector<1xf32>
      %316 = vector.shape_cast %315 : vector<1xf32> to vector<1x1xf32>
      %317 = math.log %316 : vector<1x1xf32>
      %318 = arith.addf %317, %303 : vector<1x1xf32>
      %319 = vector.broadcast %318 : vector<1x1xf32> to vector<1x128xf32>
      %320 = arith.subf %301, %319 : vector<1x128xf32>
      %321 = arith.index_cast %c2_i32_98 : i32 to index
      %c0_125 = arith.constant 0 : index
      %322 = vector.load %arg13[%321, %c0_125] : memref<8x128xf32, #tpu.memory_space<vmem>>, vector<1x128xf32>
      tpu.vector_store %arg13[%321, %c0_125], %320 {strides = array<i32>} : memref<8x128xf32, #tpu.memory_space<vmem>>, vector<1x128xf32>,
      %c1_i32_126 = arith.constant 1 : i32
      %323 = arith.cmpi eq, %311, %c1_i32_126 : i32
      %c1_i32_127 = arith.constant 1 : i32
      %c0_i32_128 = arith.constant 0 : i32
      %324 = arith.select %323, %c1_i32_127, %c0_i32_128 : i32
      scf.yield %298, %311, %324 : vector<1x32xf32>, i32, i32
    } else {
      %c1_i32_117 = arith.constant 1 : i32
      scf.yield %251#0, %251#1, %c1_i32_117 : vector<1x32xf32>, i32, i32
    }
    %c3_i32_101 = arith.constant 3 : i32
    %c0_i32_102 = arith.constant 0 : i32
    %256 = arith.cmpi eq, %255#2, %c0_i32_102 : i32
    %257 = arith.extui %256 : i1 to i32
    %c0_i32_103 = arith.constant 0 : i32
    %258 = arith.cmpi ne, %257, %c0_i32_103 : i32
    %259:3 = scf.if %258 -> (vector<1x32xf32>, i32, i32) {
      %276 = arith.index_cast %255#1 : i32 to index
      %c0_117 = arith.constant 0 : index
      %277 = vector.load %arg16[%276, %c0_117] : memref<128x128xf32, #tpu.memory_space<vmem>>, vector<1x128xf32>
      %278 = arith.truncf %255#0 : vector<1x32xf32> to vector<1x32xbf16>
      %cst_118 = arith.constant dense<0.000000e+00> : vector<1x128xf32>
      %279 = tpu.matmul %278, %239, %cst_118 {dimension_numbers = #tpu.dot_dimension_numbers<[1], [0], [0], [1], [0, 0, 1, 1], [], []>} : vector<1x32xbf16>, vector<32x128xbf16>, vector<1x128xf32> -> vector<1x128xf32>
      %280 = arith.addf %279, %240 : vector<1x128xf32>
      %281 = arith.addf %277, %280 : vector<1x128xf32>
      %282 = arith.negf %281 : vector<1x128xf32>
      %283 = math.exp %282 : vector<1x128xf32>
      %cst_119 = arith.constant 1.000000e+00 : f32
      %284 = vector.broadcast %cst_119 : f32 to vector<1x128xf32>
      %285 = arith.addf %284, %283 : vector<1x128xf32>
      %286 = arith.divf %284, %285 : vector<1x128xf32>
      %287 = vector.extract_strided_slice %286 {offsets = [0, 0], sizes = [1, 32], strides = [1, 1]} : vector<1x128xf32> to vector<1x32xf32>
      %288 = vector.extract_strided_slice %286 {offsets = [0, 32], sizes = [1, 32], strides = [1, 1]} : vector<1x128xf32> to vector<1x32xf32>
      %289 = vector.extract_strided_slice %277 {offsets = [0, 64], sizes = [1, 32], strides = [1, 1]} : vector<1x128xf32> to vector<1x32xf32>
      %290 = vector.extract_strided_slice %280 {offsets = [0, 64], sizes = [1, 32], strides = [1, 1]} : vector<1x128xf32> to vector<1x32xf32>
      %291 = arith.mulf %287, %290 : vector<1x32xf32>
      %292 = arith.addf %289, %291 : vector<1x32xf32>
      %293 = math.tanh %292 : vector<1x32xf32>
      %cst_120 = arith.constant 1.000000e+00 : f32
      %294 = vector.broadcast %cst_120 : f32 to vector<1x32xf32>
      %295 = arith.subf %294, %288 : vector<1x32xf32>
      %296 = arith.mulf %295, %293 : vector<1x32xf32>
      %297 = arith.mulf %288, %255#0 : vector<1x32xf32>
      %298 = arith.addf %296, %297 : vector<1x32xf32>
      %299 = arith.truncf %298 : vector<1x32xf32> to vector<1x32xbf16>
      %cst_121 = arith.constant dense<0.000000e+00> : vector<1x128xf32>
      %300 = tpu.matmul %299, %241, %cst_121 {dimension_numbers = #tpu.dot_dimension_numbers<[1], [0], [0], [1], [0, 0, 1, 1], [], []>} : vector<1x32xbf16>, vector<32x128xbf16>, vector<1x128xf32> -> vector<1x128xf32>
      %301 = arith.addf %300, %242 : vector<1x128xf32>
      %cst_122 = arith.constant dense<0xFF800000> : vector<1xf32>
      %302 = vector.multi_reduction <maximumf>, %301, %cst_122 [1] : vector<1x128xf32> to vector<1xf32>
      %303 = vector.shape_cast %302 : vector<1xf32> to vector<1x1xf32>
      %304 = vector.broadcast %303 : vector<1x1xf32> to vector<1x128xf32>
      %305 = arith.cmpf oeq, %301, %304 : vector<1x128xf32>
      %c128_i32 = arith.constant 128 : i32
      %306 = vector.broadcast %c128_i32 : i32 to vector<1x128xi32>
      %307 = arith.select %305, %243, %306 : vector<1x128xi1>, vector<1x128xi32>
      %308 = vector.shape_cast %307 : vector<1x128xi32> to vector<1x1x128xi32>
      %cst_123 = arith.constant dense<2147483647> : vector<1xi32>
      %309 = vector.multi_reduction <minsi>, %308, %cst_123 [1, 2] : vector<1x1x128xi32> to vector<1xi32>
      %310 = vector.shape_cast %309 : vector<1xi32> to vector<1x1x1xi32>
      %311 = vector.extract %310[0, 0, 0] : i32 from vector<1x1x1xi32>
      %312 = vector.broadcast %303 : vector<1x1xf32> to vector<1x128xf32>
      %313 = arith.subf %301, %312 : vector<1x128xf32>
      %314 = math.exp %313 : vector<1x128xf32>
      %cst_124 = arith.constant dense<0.000000e+00> : vector<1xf32>
      %315 = vector.multi_reduction <add>, %314, %cst_124 [1] : vector<1x128xf32> to vector<1xf32>
      %316 = vector.shape_cast %315 : vector<1xf32> to vector<1x1xf32>
      %317 = math.log %316 : vector<1x1xf32>
      %318 = arith.addf %317, %303 : vector<1x1xf32>
      %319 = vector.broadcast %318 : vector<1x1xf32> to vector<1x128xf32>
      %320 = arith.subf %301, %319 : vector<1x128xf32>
      %321 = arith.index_cast %c3_i32_101 : i32 to index
      %c0_125 = arith.constant 0 : index
      %322 = vector.load %arg13[%321, %c0_125] : memref<8x128xf32, #tpu.memory_space<vmem>>, vector<1x128xf32>
      tpu.vector_store %arg13[%321, %c0_125], %320 {strides = array<i32>} : memref<8x128xf32, #tpu.memory_space<vmem>>, vector<1x128xf32>,
      %c1_i32_126 = arith.constant 1 : i32
      %323 = arith.cmpi eq, %311, %c1_i32_126 : i32
      %c1_i32_127 = arith.constant 1 : i32
      %c0_i32_128 = arith.constant 0 : i32
      %324 = arith.select %323, %c1_i32_127, %c0_i32_128 : i32
      scf.yield %298, %311, %324 : vector<1x32xf32>, i32, i32
    } else {
      %c1_i32_117 = arith.constant 1 : i32
      scf.yield %255#0, %255#1, %c1_i32_117 : vector<1x32xf32>, i32, i32
    }
    %c4_i32_104 = arith.constant 4 : i32
    %c0_i32_105 = arith.constant 0 : i32
    %260 = arith.cmpi eq, %259#2, %c0_i32_105 : i32
    %261 = arith.extui %260 : i1 to i32
    %c0_i32_106 = arith.constant 0 : i32
    %262 = arith.cmpi ne, %261, %c0_i32_106 : i32
    %263:3 = scf.if %262 -> (vector<1x32xf32>, i32, i32) {
      %276 = arith.index_cast %259#1 : i32 to index
      %c0_117 = arith.constant 0 : index
      %277 = vector.load %arg16[%276, %c0_117] : memref<128x128xf32, #tpu.memory_space<vmem>>, vector<1x128xf32>
      %278 = arith.truncf %259#0 : vector<1x32xf32> to vector<1x32xbf16>
      %cst_118 = arith.constant dense<0.000000e+00> : vector<1x128xf32>
      %279 = tpu.matmul %278, %239, %cst_118 {dimension_numbers = #tpu.dot_dimension_numbers<[1], [0], [0], [1], [0, 0, 1, 1], [], []>} : vector<1x32xbf16>, vector<32x128xbf16>, vector<1x128xf32> -> vector<1x128xf32>
      %280 = arith.addf %279, %240 : vector<1x128xf32>
      %281 = arith.addf %277, %280 : vector<1x128xf32>
      %282 = arith.negf %281 : vector<1x128xf32>
      %283 = math.exp %282 : vector<1x128xf32>
      %cst_119 = arith.constant 1.000000e+00 : f32
      %284 = vector.broadcast %cst_119 : f32 to vector<1x128xf32>
      %285 = arith.addf %284, %283 : vector<1x128xf32>
      %286 = arith.divf %284, %285 : vector<1x128xf32>
      %287 = vector.extract_strided_slice %286 {offsets = [0, 0], sizes = [1, 32], strides = [1, 1]} : vector<1x128xf32> to vector<1x32xf32>
      %288 = vector.extract_strided_slice %286 {offsets = [0, 32], sizes = [1, 32], strides = [1, 1]} : vector<1x128xf32> to vector<1x32xf32>
      %289 = vector.extract_strided_slice %277 {offsets = [0, 64], sizes = [1, 32], strides = [1, 1]} : vector<1x128xf32> to vector<1x32xf32>
      %290 = vector.extract_strided_slice %280 {offsets = [0, 64], sizes = [1, 32], strides = [1, 1]} : vector<1x128xf32> to vector<1x32xf32>
      %291 = arith.mulf %287, %290 : vector<1x32xf32>
      %292 = arith.addf %289, %291 : vector<1x32xf32>
      %293 = math.tanh %292 : vector<1x32xf32>
      %cst_120 = arith.constant 1.000000e+00 : f32
      %294 = vector.broadcast %cst_120 : f32 to vector<1x32xf32>
      %295 = arith.subf %294, %288 : vector<1x32xf32>
      %296 = arith.mulf %295, %293 : vector<1x32xf32>
      %297 = arith.mulf %288, %259#0 : vector<1x32xf32>
      %298 = arith.addf %296, %297 : vector<1x32xf32>
      %299 = arith.truncf %298 : vector<1x32xf32> to vector<1x32xbf16>
      %cst_121 = arith.constant dense<0.000000e+00> : vector<1x128xf32>
      %300 = tpu.matmul %299, %241, %cst_121 {dimension_numbers = #tpu.dot_dimension_numbers<[1], [0], [0], [1], [0, 0, 1, 1], [], []>} : vector<1x32xbf16>, vector<32x128xbf16>, vector<1x128xf32> -> vector<1x128xf32>
      %301 = arith.addf %300, %242 : vector<1x128xf32>
      %cst_122 = arith.constant dense<0xFF800000> : vector<1xf32>
      %302 = vector.multi_reduction <maximumf>, %301, %cst_122 [1] : vector<1x128xf32> to vector<1xf32>
      %303 = vector.shape_cast %302 : vector<1xf32> to vector<1x1xf32>
      %304 = vector.broadcast %303 : vector<1x1xf32> to vector<1x128xf32>
      %305 = arith.cmpf oeq, %301, %304 : vector<1x128xf32>
      %c128_i32 = arith.constant 128 : i32
      %306 = vector.broadcast %c128_i32 : i32 to vector<1x128xi32>
      %307 = arith.select %305, %243, %306 : vector<1x128xi1>, vector<1x128xi32>
      %308 = vector.shape_cast %307 : vector<1x128xi32> to vector<1x1x128xi32>
      %cst_123 = arith.constant dense<2147483647> : vector<1xi32>
      %309 = vector.multi_reduction <minsi>, %308, %cst_123 [1, 2] : vector<1x1x128xi32> to vector<1xi32>
      %310 = vector.shape_cast %309 : vector<1xi32> to vector<1x1x1xi32>
      %311 = vector.extract %310[0, 0, 0] : i32 from vector<1x1x1xi32>
      %312 = vector.broadcast %303 : vector<1x1xf32> to vector<1x128xf32>
      %313 = arith.subf %301, %312 : vector<1x128xf32>
      %314 = math.exp %313 : vector<1x128xf32>
      %cst_124 = arith.constant dense<0.000000e+00> : vector<1xf32>
      %315 = vector.multi_reduction <add>, %314, %cst_124 [1] : vector<1x128xf32> to vector<1xf32>
      %316 = vector.shape_cast %315 : vector<1xf32> to vector<1x1xf32>
      %317 = math.log %316 : vector<1x1xf32>
      %318 = arith.addf %317, %303 : vector<1x1xf32>
      %319 = vector.broadcast %318 : vector<1x1xf32> to vector<1x128xf32>
      %320 = arith.subf %301, %319 : vector<1x128xf32>
      %321 = arith.index_cast %c4_i32_104 : i32 to index
      %c0_125 = arith.constant 0 : index
      %322 = vector.load %arg13[%321, %c0_125] : memref<8x128xf32, #tpu.memory_space<vmem>>, vector<1x128xf32>
      tpu.vector_store %arg13[%321, %c0_125], %320 {strides = array<i32>} : memref<8x128xf32, #tpu.memory_space<vmem>>, vector<1x128xf32>,
      %c1_i32_126 = arith.constant 1 : i32
      %323 = arith.cmpi eq, %311, %c1_i32_126 : i32
      %c1_i32_127 = arith.constant 1 : i32
      %c0_i32_128 = arith.constant 0 : i32
      %324 = arith.select %323, %c1_i32_127, %c0_i32_128 : i32
      scf.yield %298, %311, %324 : vector<1x32xf32>, i32, i32
    } else {
      %c1_i32_117 = arith.constant 1 : i32
      scf.yield %259#0, %259#1, %c1_i32_117 : vector<1x32xf32>, i32, i32
    }
    %c5_i32_107 = arith.constant 5 : i32
    %c0_i32_108 = arith.constant 0 : i32
    %264 = arith.cmpi eq, %263#2, %c0_i32_108 : i32
    %265 = arith.extui %264 : i1 to i32
    %c0_i32_109 = arith.constant 0 : i32
    %266 = arith.cmpi ne, %265, %c0_i32_109 : i32
    %267:3 = scf.if %266 -> (vector<1x32xf32>, i32, i32) {
      %276 = arith.index_cast %263#1 : i32 to index
      %c0_117 = arith.constant 0 : index
      %277 = vector.load %arg16[%276, %c0_117] : memref<128x128xf32, #tpu.memory_space<vmem>>, vector<1x128xf32>
      %278 = arith.truncf %263#0 : vector<1x32xf32> to vector<1x32xbf16>
      %cst_118 = arith.constant dense<0.000000e+00> : vector<1x128xf32>
      %279 = tpu.matmul %278, %239, %cst_118 {dimension_numbers = #tpu.dot_dimension_numbers<[1], [0], [0], [1], [0, 0, 1, 1], [], []>} : vector<1x32xbf16>, vector<32x128xbf16>, vector<1x128xf32> -> vector<1x128xf32>
      %280 = arith.addf %279, %240 : vector<1x128xf32>
      %281 = arith.addf %277, %280 : vector<1x128xf32>
      %282 = arith.negf %281 : vector<1x128xf32>
      %283 = math.exp %282 : vector<1x128xf32>
      %cst_119 = arith.constant 1.000000e+00 : f32
      %284 = vector.broadcast %cst_119 : f32 to vector<1x128xf32>
      %285 = arith.addf %284, %283 : vector<1x128xf32>
      %286 = arith.divf %284, %285 : vector<1x128xf32>
      %287 = vector.extract_strided_slice %286 {offsets = [0, 0], sizes = [1, 32], strides = [1, 1]} : vector<1x128xf32> to vector<1x32xf32>
      %288 = vector.extract_strided_slice %286 {offsets = [0, 32], sizes = [1, 32], strides = [1, 1]} : vector<1x128xf32> to vector<1x32xf32>
      %289 = vector.extract_strided_slice %277 {offsets = [0, 64], sizes = [1, 32], strides = [1, 1]} : vector<1x128xf32> to vector<1x32xf32>
      %290 = vector.extract_strided_slice %280 {offsets = [0, 64], sizes = [1, 32], strides = [1, 1]} : vector<1x128xf32> to vector<1x32xf32>
      %291 = arith.mulf %287, %290 : vector<1x32xf32>
      %292 = arith.addf %289, %291 : vector<1x32xf32>
      %293 = math.tanh %292 : vector<1x32xf32>
      %cst_120 = arith.constant 1.000000e+00 : f32
      %294 = vector.broadcast %cst_120 : f32 to vector<1x32xf32>
      %295 = arith.subf %294, %288 : vector<1x32xf32>
      %296 = arith.mulf %295, %293 : vector<1x32xf32>
      %297 = arith.mulf %288, %263#0 : vector<1x32xf32>
      %298 = arith.addf %296, %297 : vector<1x32xf32>
      %299 = arith.truncf %298 : vector<1x32xf32> to vector<1x32xbf16>
      %cst_121 = arith.constant dense<0.000000e+00> : vector<1x128xf32>
      %300 = tpu.matmul %299, %241, %cst_121 {dimension_numbers = #tpu.dot_dimension_numbers<[1], [0], [0], [1], [0, 0, 1, 1], [], []>} : vector<1x32xbf16>, vector<32x128xbf16>, vector<1x128xf32> -> vector<1x128xf32>
      %301 = arith.addf %300, %242 : vector<1x128xf32>
      %cst_122 = arith.constant dense<0xFF800000> : vector<1xf32>
      %302 = vector.multi_reduction <maximumf>, %301, %cst_122 [1] : vector<1x128xf32> to vector<1xf32>
      %303 = vector.shape_cast %302 : vector<1xf32> to vector<1x1xf32>
      %304 = vector.broadcast %303 : vector<1x1xf32> to vector<1x128xf32>
      %305 = arith.cmpf oeq, %301, %304 : vector<1x128xf32>
      %c128_i32 = arith.constant 128 : i32
      %306 = vector.broadcast %c128_i32 : i32 to vector<1x128xi32>
      %307 = arith.select %305, %243, %306 : vector<1x128xi1>, vector<1x128xi32>
      %308 = vector.shape_cast %307 : vector<1x128xi32> to vector<1x1x128xi32>
      %cst_123 = arith.constant dense<2147483647> : vector<1xi32>
      %309 = vector.multi_reduction <minsi>, %308, %cst_123 [1, 2] : vector<1x1x128xi32> to vector<1xi32>
      %310 = vector.shape_cast %309 : vector<1xi32> to vector<1x1x1xi32>
      %311 = vector.extract %310[0, 0, 0] : i32 from vector<1x1x1xi32>
      %312 = vector.broadcast %303 : vector<1x1xf32> to vector<1x128xf32>
      %313 = arith.subf %301, %312 : vector<1x128xf32>
      %314 = math.exp %313 : vector<1x128xf32>
      %cst_124 = arith.constant dense<0.000000e+00> : vector<1xf32>
      %315 = vector.multi_reduction <add>, %314, %cst_124 [1] : vector<1x128xf32> to vector<1xf32>
      %316 = vector.shape_cast %315 : vector<1xf32> to vector<1x1xf32>
      %317 = math.log %316 : vector<1x1xf32>
      %318 = arith.addf %317, %303 : vector<1x1xf32>
      %319 = vector.broadcast %318 : vector<1x1xf32> to vector<1x128xf32>
      %320 = arith.subf %301, %319 : vector<1x128xf32>
      %321 = arith.index_cast %c5_i32_107 : i32 to index
      %c0_125 = arith.constant 0 : index
      %322 = vector.load %arg13[%321, %c0_125] : memref<8x128xf32, #tpu.memory_space<vmem>>, vector<1x128xf32>
      tpu.vector_store %arg13[%321, %c0_125], %320 {strides = array<i32>} : memref<8x128xf32, #tpu.memory_space<vmem>>, vector<1x128xf32>,
      %c1_i32_126 = arith.constant 1 : i32
      %323 = arith.cmpi eq, %311, %c1_i32_126 : i32
      %c1_i32_127 = arith.constant 1 : i32
      %c0_i32_128 = arith.constant 0 : i32
      %324 = arith.select %323, %c1_i32_127, %c0_i32_128 : i32
      scf.yield %298, %311, %324 : vector<1x32xf32>, i32, i32
    } else {
      %c1_i32_117 = arith.constant 1 : i32
      scf.yield %263#0, %263#1, %c1_i32_117 : vector<1x32xf32>, i32, i32
    }
    %c6_i32_110 = arith.constant 6 : i32
    %c0_i32_111 = arith.constant 0 : i32
    %268 = arith.cmpi eq, %267#2, %c0_i32_111 : i32
    %269 = arith.extui %268 : i1 to i32
    %c0_i32_112 = arith.constant 0 : i32
    %270 = arith.cmpi ne, %269, %c0_i32_112 : i32
    %271:3 = scf.if %270 -> (vector<1x32xf32>, i32, i32) {
      %276 = arith.index_cast %267#1 : i32 to index
      %c0_117 = arith.constant 0 : index
      %277 = vector.load %arg16[%276, %c0_117] : memref<128x128xf32, #tpu.memory_space<vmem>>, vector<1x128xf32>
      %278 = arith.truncf %267#0 : vector<1x32xf32> to vector<1x32xbf16>
      %cst_118 = arith.constant dense<0.000000e+00> : vector<1x128xf32>
      %279 = tpu.matmul %278, %239, %cst_118 {dimension_numbers = #tpu.dot_dimension_numbers<[1], [0], [0], [1], [0, 0, 1, 1], [], []>} : vector<1x32xbf16>, vector<32x128xbf16>, vector<1x128xf32> -> vector<1x128xf32>
      %280 = arith.addf %279, %240 : vector<1x128xf32>
      %281 = arith.addf %277, %280 : vector<1x128xf32>
      %282 = arith.negf %281 : vector<1x128xf32>
      %283 = math.exp %282 : vector<1x128xf32>
      %cst_119 = arith.constant 1.000000e+00 : f32
      %284 = vector.broadcast %cst_119 : f32 to vector<1x128xf32>
      %285 = arith.addf %284, %283 : vector<1x128xf32>
      %286 = arith.divf %284, %285 : vector<1x128xf32>
      %287 = vector.extract_strided_slice %286 {offsets = [0, 0], sizes = [1, 32], strides = [1, 1]} : vector<1x128xf32> to vector<1x32xf32>
      %288 = vector.extract_strided_slice %286 {offsets = [0, 32], sizes = [1, 32], strides = [1, 1]} : vector<1x128xf32> to vector<1x32xf32>
      %289 = vector.extract_strided_slice %277 {offsets = [0, 64], sizes = [1, 32], strides = [1, 1]} : vector<1x128xf32> to vector<1x32xf32>
      %290 = vector.extract_strided_slice %280 {offsets = [0, 64], sizes = [1, 32], strides = [1, 1]} : vector<1x128xf32> to vector<1x32xf32>
      %291 = arith.mulf %287, %290 : vector<1x32xf32>
      %292 = arith.addf %289, %291 : vector<1x32xf32>
      %293 = math.tanh %292 : vector<1x32xf32>
      %cst_120 = arith.constant 1.000000e+00 : f32
      %294 = vector.broadcast %cst_120 : f32 to vector<1x32xf32>
      %295 = arith.subf %294, %288 : vector<1x32xf32>
      %296 = arith.mulf %295, %293 : vector<1x32xf32>
      %297 = arith.mulf %288, %267#0 : vector<1x32xf32>
      %298 = arith.addf %296, %297 : vector<1x32xf32>
      %299 = arith.truncf %298 : vector<1x32xf32> to vector<1x32xbf16>
      %cst_121 = arith.constant dense<0.000000e+00> : vector<1x128xf32>
      %300 = tpu.matmul %299, %241, %cst_121 {dimension_numbers = #tpu.dot_dimension_numbers<[1], [0], [0], [1], [0, 0, 1, 1], [], []>} : vector<1x32xbf16>, vector<32x128xbf16>, vector<1x128xf32> -> vector<1x128xf32>
      %301 = arith.addf %300, %242 : vector<1x128xf32>
      %cst_122 = arith.constant dense<0xFF800000> : vector<1xf32>
      %302 = vector.multi_reduction <maximumf>, %301, %cst_122 [1] : vector<1x128xf32> to vector<1xf32>
      %303 = vector.shape_cast %302 : vector<1xf32> to vector<1x1xf32>
      %304 = vector.broadcast %303 : vector<1x1xf32> to vector<1x128xf32>
      %305 = arith.cmpf oeq, %301, %304 : vector<1x128xf32>
      %c128_i32 = arith.constant 128 : i32
      %306 = vector.broadcast %c128_i32 : i32 to vector<1x128xi32>
      %307 = arith.select %305, %243, %306 : vector<1x128xi1>, vector<1x128xi32>
      %308 = vector.shape_cast %307 : vector<1x128xi32> to vector<1x1x128xi32>
      %cst_123 = arith.constant dense<2147483647> : vector<1xi32>
      %309 = vector.multi_reduction <minsi>, %308, %cst_123 [1, 2] : vector<1x1x128xi32> to vector<1xi32>
      %310 = vector.shape_cast %309 : vector<1xi32> to vector<1x1x1xi32>
      %311 = vector.extract %310[0, 0, 0] : i32 from vector<1x1x1xi32>
      %312 = vector.broadcast %303 : vector<1x1xf32> to vector<1x128xf32>
      %313 = arith.subf %301, %312 : vector<1x128xf32>
      %314 = math.exp %313 : vector<1x128xf32>
      %cst_124 = arith.constant dense<0.000000e+00> : vector<1xf32>
      %315 = vector.multi_reduction <add>, %314, %cst_124 [1] : vector<1x128xf32> to vector<1xf32>
      %316 = vector.shape_cast %315 : vector<1xf32> to vector<1x1xf32>
      %317 = math.log %316 : vector<1x1xf32>
      %318 = arith.addf %317, %303 : vector<1x1xf32>
      %319 = vector.broadcast %318 : vector<1x1xf32> to vector<1x128xf32>
      %320 = arith.subf %301, %319 : vector<1x128xf32>
      %321 = arith.index_cast %c6_i32_110 : i32 to index
      %c0_125 = arith.constant 0 : index
      %322 = vector.load %arg13[%321, %c0_125] : memref<8x128xf32, #tpu.memory_space<vmem>>, vector<1x128xf32>
      tpu.vector_store %arg13[%321, %c0_125], %320 {strides = array<i32>} : memref<8x128xf32, #tpu.memory_space<vmem>>, vector<1x128xf32>,
      %c1_i32_126 = arith.constant 1 : i32
      %323 = arith.cmpi eq, %311, %c1_i32_126 : i32
      %c1_i32_127 = arith.constant 1 : i32
      %c0_i32_128 = arith.constant 0 : i32
      %324 = arith.select %323, %c1_i32_127, %c0_i32_128 : i32
      scf.yield %298, %311, %324 : vector<1x32xf32>, i32, i32
    } else {
      %c1_i32_117 = arith.constant 1 : i32
      scf.yield %267#0, %267#1, %c1_i32_117 : vector<1x32xf32>, i32, i32
    }
    %c7_i32_113 = arith.constant 7 : i32
    %c0_i32_114 = arith.constant 0 : i32
    %272 = arith.cmpi eq, %271#2, %c0_i32_114 : i32
    %273 = arith.extui %272 : i1 to i32
    %c0_i32_115 = arith.constant 0 : i32
    %274 = arith.cmpi ne, %273, %c0_i32_115 : i32
    %275:3 = scf.if %274 -> (vector<1x32xf32>, i32, i32) {
      %276 = arith.index_cast %271#1 : i32 to index
      %c0_117 = arith.constant 0 : index
      %277 = vector.load %arg16[%276, %c0_117] : memref<128x128xf32, #tpu.memory_space<vmem>>, vector<1x128xf32>
      %278 = arith.truncf %271#0 : vector<1x32xf32> to vector<1x32xbf16>
      %cst_118 = arith.constant dense<0.000000e+00> : vector<1x128xf32>
      %279 = tpu.matmul %278, %239, %cst_118 {dimension_numbers = #tpu.dot_dimension_numbers<[1], [0], [0], [1], [0, 0, 1, 1], [], []>} : vector<1x32xbf16>, vector<32x128xbf16>, vector<1x128xf32> -> vector<1x128xf32>
      %280 = arith.addf %279, %240 : vector<1x128xf32>
      %281 = arith.addf %277, %280 : vector<1x128xf32>
      %282 = arith.negf %281 : vector<1x128xf32>
      %283 = math.exp %282 : vector<1x128xf32>
      %cst_119 = arith.constant 1.000000e+00 : f32
      %284 = vector.broadcast %cst_119 : f32 to vector<1x128xf32>
      %285 = arith.addf %284, %283 : vector<1x128xf32>
      %286 = arith.divf %284, %285 : vector<1x128xf32>
      %287 = vector.extract_strided_slice %286 {offsets = [0, 0], sizes = [1, 32], strides = [1, 1]} : vector<1x128xf32> to vector<1x32xf32>
      %288 = vector.extract_strided_slice %286 {offsets = [0, 32], sizes = [1, 32], strides = [1, 1]} : vector<1x128xf32> to vector<1x32xf32>
      %289 = vector.extract_strided_slice %277 {offsets = [0, 64], sizes = [1, 32], strides = [1, 1]} : vector<1x128xf32> to vector<1x32xf32>
      %290 = vector.extract_strided_slice %280 {offsets = [0, 64], sizes = [1, 32], strides = [1, 1]} : vector<1x128xf32> to vector<1x32xf32>
      %291 = arith.mulf %287, %290 : vector<1x32xf32>
      %292 = arith.addf %289, %291 : vector<1x32xf32>
      %293 = math.tanh %292 : vector<1x32xf32>
      %cst_120 = arith.constant 1.000000e+00 : f32
      %294 = vector.broadcast %cst_120 : f32 to vector<1x32xf32>
      %295 = arith.subf %294, %288 : vector<1x32xf32>
      %296 = arith.mulf %295, %293 : vector<1x32xf32>
      %297 = arith.mulf %288, %271#0 : vector<1x32xf32>
      %298 = arith.addf %296, %297 : vector<1x32xf32>
      %299 = arith.truncf %298 : vector<1x32xf32> to vector<1x32xbf16>
      %cst_121 = arith.constant dense<0.000000e+00> : vector<1x128xf32>
      %300 = tpu.matmul %299, %241, %cst_121 {dimension_numbers = #tpu.dot_dimension_numbers<[1], [0], [0], [1], [0, 0, 1, 1], [], []>} : vector<1x32xbf16>, vector<32x128xbf16>, vector<1x128xf32> -> vector<1x128xf32>
      %301 = arith.addf %300, %242 : vector<1x128xf32>
      %cst_122 = arith.constant dense<0xFF800000> : vector<1xf32>
      %302 = vector.multi_reduction <maximumf>, %301, %cst_122 [1] : vector<1x128xf32> to vector<1xf32>
      %303 = vector.shape_cast %302 : vector<1xf32> to vector<1x1xf32>
      %304 = vector.broadcast %303 : vector<1x1xf32> to vector<1x128xf32>
      %305 = arith.cmpf oeq, %301, %304 : vector<1x128xf32>
      %c128_i32 = arith.constant 128 : i32
      %306 = vector.broadcast %c128_i32 : i32 to vector<1x128xi32>
      %307 = arith.select %305, %243, %306 : vector<1x128xi1>, vector<1x128xi32>
      %308 = vector.shape_cast %307 : vector<1x128xi32> to vector<1x1x128xi32>
      %cst_123 = arith.constant dense<2147483647> : vector<1xi32>
      %309 = vector.multi_reduction <minsi>, %308, %cst_123 [1, 2] : vector<1x1x128xi32> to vector<1xi32>
      %310 = vector.shape_cast %309 : vector<1xi32> to vector<1x1x1xi32>
      %311 = vector.extract %310[0, 0, 0] : i32 from vector<1x1x1xi32>
      %312 = vector.broadcast %303 : vector<1x1xf32> to vector<1x128xf32>
      %313 = arith.subf %301, %312 : vector<1x128xf32>
      %314 = math.exp %313 : vector<1x128xf32>
      %cst_124 = arith.constant dense<0.000000e+00> : vector<1xf32>
      %315 = vector.multi_reduction <add>, %314, %cst_124 [1] : vector<1x128xf32> to vector<1xf32>
      %316 = vector.shape_cast %315 : vector<1xf32> to vector<1x1xf32>
      %317 = math.log %316 : vector<1x1xf32>
      %318 = arith.addf %317, %303 : vector<1x1xf32>
      %319 = vector.broadcast %318 : vector<1x1xf32> to vector<1x128xf32>
      %320 = arith.subf %301, %319 : vector<1x128xf32>
      %321 = arith.index_cast %c7_i32_113 : i32 to index
      %c0_125 = arith.constant 0 : index
      %322 = vector.load %arg13[%321, %c0_125] : memref<8x128xf32, #tpu.memory_space<vmem>>, vector<1x128xf32>
      tpu.vector_store %arg13[%321, %c0_125], %320 {strides = array<i32>} : memref<8x128xf32, #tpu.memory_space<vmem>>, vector<1x128xf32>,
      %c1_i32_126 = arith.constant 1 : i32
      %323 = arith.cmpi eq, %311, %c1_i32_126 : i32
      %c1_i32_127 = arith.constant 1 : i32
      %c0_i32_128 = arith.constant 0 : i32
      %324 = arith.select %323, %c1_i32_127, %c0_i32_128 : i32
      scf.yield %298, %311, %324 : vector<1x32xf32>, i32, i32
    } else {
      %c1_i32_117 = arith.constant 1 : i32
      scf.yield %271#0, %271#1, %c1_i32_117 : vector<1x32xf32>, i32, i32
    }
    %c8_i32_116 = arith.constant 8 : i32
    return
  }
}

</mosaic_0001>

<bundles_post_ra>
// kernel: seq2seq_forward.1
= control target key start
LH: loop header
LB: loop body
LE: loop exit
PB: predicated region body
PF: predicated region fallthrough
CT: control target
= control target key end

     0   :  { %18 = vsyncpa [#allocation7], 0  ;;  %s3228_s0 = inlined_call_operand.vmem [shape: s32[8], index: 0, kind: input, shape index: {}]   ;;  %s3229_s1 = inlined_call_operand.vmem [shape: f32[128,32], index: 1, kind: input, shape index: {}]   ;;  %s3230_s2 = inlined_call_operand.vmem [shape: bf16[32,128], index: 2, kind: input, shape index: {}]   ;;  %s3231_s3 = inlined_call_operand.vmem [shape: bf16[32,128], index: 3, kind: input, shape index: {}]   ;;  %s3232_s4 = inlined_call_operand.vmem [shape: f32[1,128], index: 4, kind: input, shape index: {}]   ;;  %s3233_s5 = inlined_call_operand.vmem [shape: f32[1,128], index: 5, kind: input, shape index: {}]   ;;  %s3234_s6 = inlined_call_operand.vmem [shape: f32[128,32], index: 6, kind: input, shape index: {}]   ;;  %s3235_s7 = inlined_call_operand.vmem [shape: bf16[32,128], index: 7, kind: input, shape index: {}]   ;;  %s3236_s8 = inlined_call_operand.vmem [shape: bf16[32,128], index: 8, kind: input, shape index: {}]   ;;  %s3237_s9 = inlined_call_operand.vmem [shape: f32[1,128], index: 9, kind: input, shape index: {}]   ;;  %s3238_s10 = inlined_call_operand.vmem [shape: f32[1,128], index: 10, kind: input, shape index: {}]   ;;  %s3239_s11 = inlined_call_operand.vmem [shape: bf16[32,128], index: 11, kind: input, shape index: {}]   ;;  %s3240_s12 = inlined_call_operand.vmem [shape: f32[1,128], index: 12, kind: input, shape index: {}]   ;;  %s3241_s13 = inlined_call_operand.hbm [shape: f32[8,128], index: 13, kind: output, shape index: {}]  }
   0x1   :  { %19 = vsyncpa [#allocation6], 0  ;;  %s25_s27 = sshll.u32 %s3228_s0, 4  ;;  %s2538_s28 = smov [#allocation5]   ;;  %s26_s27 = int_to_ptr.vmem [resolvable:$true] %s25_s27 }
   0x2   :  { %28 = dma.vmem_to_smem %s26_s27, 16, %s2538_s28, [#allocation7]  }
   0x3   :  { %2462 = dma.done.wait [#allocation7], 16  }
   0x4   :  { %2463 = vsyncadd [#allocation7], 4294967280 }
   0x5   :  { %57 = sfence }
   0x6   :  { %v1984_v0 = vld [vmem:[%s3235_s7 + $0x8] sm:$0xff]  ;;  %v70_v2 = vld [vmem:[%s3234_s6 + $0x50] sm:$0xff]  ;;  %v71_v3 = vld [vmem:[%s3234_s6 + $0x58] sm:$0xff]  ;;  %s210_s19 = sld [smem:[#allocation5]]  ;;  %vm120_vm0 = vcmask 261120   ;;  %vm213_vm1 = vcmask 253952  }
   0x7   :  { %v2637_v1 = vld [vmem:[%s3231_s3 + $0x8] sm:$0xff]  ;;  %1993 = vmatpush.bf16.msra.mxu1 %v1984_v0  ;;  %v1983_v4 = vld [vmem:[%s3235_s7] sm:$0xff]  ;;  %v86_v6 = vmax.f32 %v70_v2, 0.0  ;;  %v87_v7 = vmax.f32 %v71_v3, 0.0  ;;  %s1897_s24 = sld [smem:[#allocation5 + $0x1]]  ;;  %1994 = vmatpush.bf16.msra.mxu3 %v1984_v0  ;;  %v2539_v12 = vmov 0  }
   0x8   :  { %309 = vmatpush.bf16.msra.mxu2 %v2637_v1  ;;  %v2652_v5 = vld [vmem:[%s3231_s3] sm:$0xff]  ;;  %v1986_v8 = vld [vmem:[%s3230_s2 + $0x8] sm:$0xff]  ;;  %s1898_s27 = sld [smem:[#allocation5 + $0x2]]  ;;  %151 = vmatpush.bf16.msra.mxu0 %v1984_v0  ;;  %v74_v60 = vld [vmem:[%s3234_s6 + $0x70] sm:$0xff]  ;;  %s2919_s18 = smov 0  }
   0x9   :  { %s2657_s28 = sld [smem:[#allocation5 + $0x3]]  ;;  %v97_v9 = vpack.c.bf16 %v87_v7, %v86_v6  ;;  %v1985_v10 = vld [vmem:[%s3230_s2] sm:$0xff]  ;;  %s2540_s2 = smov 64   ;;  %v73_v56 = vld [vmem:[%s3234_s6 + $0x68] sm:$0xff]  ;;  %v75_v61 = vld [vmem:[%s3234_s6 + $0x78] sm:$0xff]  ;;  %v90_v62 = vmax.f32 %v74_v60, 0.0 }
   0xa   :  { %s2659_s29 = sld [smem:[#allocation5 + $0x4]]  ;;  %v2723_v22 = vld [vmem:[%s3237_s9] ss:$0 sm:$0xff]  ;;  %v89_v58 = vmax.f32 %v73_v56, 0.0  ;;  %v91_v63 = vmax.f32 %v75_v61, 0.0 }
   0xb   :  { %1995 = vmatpush.bf16.msra.mxu1 %v1983_v4  ;;  %s2662_s3 = sld [smem:[#allocation5 + $0x5]]  ;;  %1996 = vmatpush.bf16.msra.mxu3 %v1983_v4  ;;  %v2729_v25 = vld [vmem:[%s3233_s5] sm:$0x1] }
   0xc   :  { %310 = vmatpush.bf16.msra.mxu2 %v2652_v5  ;;  %s211_s16 = scalar_lea.vmem %s3229_s1, %s210_s19  ;;  %s2670_s17 = sld [smem:[#allocation5 + $0x6]]  ;;  %152 = vmatpush.bf16.msra.mxu0 %v1983_v4  ;;  %v2224_v31 = vld [vmem:[%s3232_s4] ss:$0 sm:$0xff]  ;;  %v99_v0 = vpack.c.bf16 %v91_v63, %v90_v62 }
   0xd   :  { %v212_v11 = vld [vmem:[%s211_s16] sm:$0x1]  ;;  %s216_s20 = scalar_lea.vmem %s3229_s1, %s1897_s24  ;;  %s2675_s21 = sld [smem:[#allocation5 + $0x7]] }
   0xe   :  { %1894 = vmatmul.msk.bf16.vlgmr.msra.gmra.mxu1 %vm120_vm0, %v97_v9  ;;  %214 = vst.msk [vmem:[#allocation2] sm:$0x1] %vm213_vm1, %v212_v11  ;;  %v217_v13 = vld [vmem:[%s216_s20] sm:$0x1]  ;;  %s220_s22 = scalar_lea.vmem %s3229_s1, %s1898_s27  ;;  %s2541_s4 = smov 96  }
   0xf   :  { %274 = vmatpush.bf16.msrb.mxu1 %v1986_v8  ;;  %369 = vmatpush.bf16.msrb.mxu3 %v2637_v1  ;;  %218 = vst.msk [vmem:[#allocation2 + $0x1] sm:$0x1] %vm213_vm1, %v217_v13  ;;  %v221_v14 = vld [vmem:[%s220_s22] sm:$0x1]  ;;  %s224_s25 = scalar_lea.vmem %s3229_s1, %s2657_s28 }
  0x10   :  { %489 = vmatpush.bf16.msrb.mxu2 %v2637_v1  ;;  %222 = vst.msk [vmem:[#allocation2 + $0x2] sm:$0x1] %vm213_vm1, %v221_v14  ;;  %v225_v15 = vld [vmem:[%s224_s25] sm:$0x1]  ;;  %s228_s30 = scalar_lea.vmem %s3229_s1, %s2659_s29  ;;  %s2917_s29 = smov 0  }
  0x11   :  { %311 = vmatmul.bf16.vlgmr.msra.gmra.mxu2 %v2539_v12  ;;  %226 = vst.msk [vmem:[#allocation2 + $0x3] sm:$0x1] %vm213_vm1, %v225_v15  ;;  %v229_v16 = vld [vmem:[%s228_s30] sm:$0x1]  ;;  %s232_s15 = scalar_lea.vmem %s3229_s1, %s2662_s3 }
  0x12   :  { %230 = vst.msk [vmem:[#allocation2 + $0x4] sm:$0x1] %vm213_vm1, %v229_v16  ;;  %v233_v17 = vld [vmem:[%s232_s15] sm:$0x1]  ;;  %s236_s0 = scalar_lea.vmem %s3229_s1, %s2670_s17 }
  0x13   :  { %275 = vmatpush.bf16.msrb.mxu1 %v1985_v10  ;;  %370 = vmatpush.bf16.msrb.mxu3 %v2652_v5  ;;  %234 = vst.msk [vmem:[#allocation2 + $0x5] sm:$0x1] %vm213_vm1, %v233_v17  ;;  %v237_v18 = vld [vmem:[%s236_s0] sm:$0x1]  ;;  %s240_s3 = scalar_lea.vmem %s3229_s1, %s2675_s21 }
  0x14   :  { %490 = vmatpush.bf16.msrb.mxu2 %v2652_v5  ;;  %238 = vst.msk [vmem:[#allocation2 + $0x6] sm:$0x1] %vm213_vm1, %v237_v18  ;;  %v241_v19 = vld [vmem:[%s240_s3] sm:$0x1] }
  0x15   :  { %242 = vst.msk [vmem:[#allocation2 + $0x7] sm:$0x1] %vm213_vm1, %v241_v19  ;;  %v72_v55 = vld [vmem:[%s3234_s6 + $0x60] sm:$0xff] }
  0x16   :  { %v88_v57 = vmax.f32 %v72_v55, 0.0 }
  0x17   :  { %429 = vmatpush.bf16.msra.mxu1 %v2637_v1 }
  0x18   :  { %669 = vmatpush.bf16.msra.mxu2 %v2637_v1  ;;  %v98_v59 = vpack.c.bf16 %v89_v58, %v88_v57 }
  0x1a   :  { %1895 = vmatmul.msk.bf16.vlgmr.msra.gmra.mxu3 %vm120_vm0, %v98_v59 }
  0x1b   :  { %430 = vmatpush.bf16.msra.mxu1 %v2652_v5  ;;  %549 = vmatpush.bf16.msra.mxu3 %v2637_v1 }
  0x1c   :  { %670 = vmatpush.bf16.msra.mxu2 %v2652_v5  ;;  %v243_v20 = vld [vmem:[#allocation2] sm:$0xff] }
  0x1d   :  { %v244_v21 = vpack.c.bf16 %v243_v20, %v243_v20 }
  0x1f   :  { %1912 = vmatmul.msk.bf16.vlgmr.msrb.gmra.mxu1 %vm120_vm0, %v244_v21  ;;  %550 = vmatpush.bf16.msra.mxu3 %v2652_v5 }
  0x20   :  { %609 = vmatpush.bf16.msrb.mxu1 %v2637_v1 }
  0x24   :  { %610 = vmatpush.bf16.msrb.mxu1 %v2652_v5 }
  0x2a   :  { %1896 = vmatmul.msk.bf16.gmra.mxu3 %vm120_vm0, %v99_v0 }
  0x8b   :  { %v179_v23 = vpop.f32.mrf.mxu1 }
  0x8c   :  { %v180_v24 = vadd.f32 %v2723_v22, %v179_v23 }
  0x8e   :  { %204 = vst [vmem:[#allocation4 + $0x50] sm:$0xff] %v180_v24 }
  0x93   :  { %v181_v28 = vpop.f32.mrf.mxu1 }
  0x94   :  { %v312_v26 = vpop.f32.mrf.mxu2  ;;  %v182_v29 = vadd.f32 %v2723_v22, %v181_v28 }
  0x95   :  { %v313_v27 = vadd.f32 %v312_v26, %v2729_v25 }
  0x96   :  { %205 = vst [vmem:[#allocation4 + $0x58] sm:$0xff] %v182_v29 }
  0x97   :  { %337 = vrot.lane.b32.xlu0 %v313_v27, %s2540_s2 }
  0x9c   :  { %v314_v30 = vpop.f32.mrf.mxu2  ;;  %v277_v32 = vpop.f32.mrf.mxu1 }
  0x9d   :  { %v278_v33 = vadd.f32 %v2224_v31, %v277_v32  ;;  %v184_v9 = vpop.f32.mrf.mxu3 }
  0x9e   :  { %v185_v10 = vadd.f32 %v2723_v22, %v184_v9 }
  0x9f   :  { %281 = vst [vmem:[#allocation3] sm:$0xff] %v278_v33 }
  0xa0   :  { %206 = vst [vmem:[#allocation4 + $0x60] sm:$0xff] %v185_v10 }
  0xa4   :  { %v279_v34 = vpop.f32.mrf.mxu1 }
  0xa5   :  { %v186_v11 = vpop.f32.mrf.mxu3 }
  0xa6   :  { %v287_v35 = vld [vmem:[#allocation3] sm:$0x1]  ;;  %v187_v12 = vadd.f32 %v2723_v22, %v186_v11  ;;  %v355_v21 = vld [vmem:[#allocation3 + $0x1] sm:$0x1] }
  0xa7   :  { %v316_v36 = vadd.f32 %v313_v27, %v287_v35 }
  0xa8   :  { %207 = vst [vmem:[#allocation4 + $0x68] sm:$0xff] %v187_v12 }
  0xa9   :  { %v1921_v37 = vmul.f32 -1.442695, %v316_v36 }
  0xab   :  { %2225 = vpow2.f32 %v1921_v37 }
  0xad   :  { %v189_v14 = vpop.f32.mrf.mxu3 }
  0xae   :  { %v190_v15 = vadd.f32 %v2723_v22, %v189_v14 }
  0xb0   :  { %208 = vst [vmem:[#allocation4 + $0x70] sm:$0xff] %v190_v15 }
  0xb1   :  { %v2226_v38 = vpop.eup %2225 }
  0xb2   :  { %v320_v39 = vadd.f32 1.0, %v2226_v38 }
  0xb4   :  { %2227 = vrcp.f32 %v320_v39  ;;  %v332_v45 = vand.u32 2147483648, %v320_v39  ;;  %vm326_vm3 = vweird.f32 %v320_v39  ;;  %v330_v46 = vand.u32 2147483647, %v320_v39 }
  0xb5   :  { %v191_v16 = vpop.f32.mrf.mxu3 }
  0xb6   :  { %v333_v48 = vor.u32 1.1754944e-38, %v332_v45  ;;  %vm331_vm5 = vcmp.eq.f32.partialorder %v330_v46, 8.507059e+37  ;;  %v192_v17 = vadd.f32 %v2723_v22, %v191_v16 }
  0xb8   :  { %209 = vst [vmem:[#allocation4 + $0x78] sm:$0xff] %v192_v17 }
  0xba   :  { %v2228_v40 = vpop.eup %2227 }
  0xbb   :  { %v322_v41 = vmul.f32 %v2228_v40, %v320_v39  ;;  %vm327_vm2 = vweird.f32 %v2228_v40 }
  0xbc   :  { %vm328_vm4 = vmor %vm326_vm3, %vm327_vm2 }
  0xbd   :  { %v323_v42 = vsub.f32 1.0, %v322_v41 }
  0xbf   :  { %v324_v43 = vmul.f32 %v2228_v40, %v323_v42 }
  0xc1   :  { %v325_v44 = vadd.f32 %v2228_v40, %v324_v43 }
  0xc3   :  { %v329_v47 = vsel %vm328_vm4, %v2228_v40, %v325_v44 }
  0xc4   :  { %v334_v50 = vsel %vm331_vm5, %v333_v48, %v329_v47 }
  0xc5   :  { %v347_v2 = vsub.f32 1.0, %v334_v50  ;;  %v353_v4 = vmul.f32 0.0, %v334_v50 }
 0x109   :  { %v338_v49 = vpop.permute.xlu0 %337 }
 0x10a   :  { %v340_v51 = vmul.f32 %v338_v49, %v334_v50 }
 0x10c   :  { %342 = vrot.lane.b32.xlu0 %v340_v51, %s2540_s2  ;;  %v415_v51 = vld [vmem:[#allocation3 + $0x2] sm:$0x1] }
 0x17e   :  { %v343_v52 = vpop.permute.xlu0 %342 }
 0x17f   :  { %v345_v53 = vadd.f32 %v343_v52, %v287_v35 }
 0x181   :  { %2229 = vtanh.f32 %v345_v53 }
 0x187   :  { %v2230_v54 = vpop.eup %2229 }
 0x188   :  { %349 = vrot.lane.b32.xlu1 %v2230_v54, %s2541_s4 }
 0x1fa   :  { %v350_v3 = vpop.permute.xlu1 %349 }
 0x1fb   :  { %v352_v6 = vmul.f32 %v350_v3, %v347_v2 }
 0x1fd   :  { %v354_v7 = vadd.f32 %v353_v4, %v352_v6 }
 0x1ff   :  { %v356_v8 = vpack.c.bf16 %v354_v7, %v354_v7 }
 0x201   :  { %358 = vrot.lane.b32.xlu1 %v356_v8, %s2541_s4 }
 0x273   :  { %v359_v13 = vpop.permute.xlu1 %358 }
 0x274   :  { %1922 = vmatmul.msk.bf16.vlgmr.msrb.gmra.mxu3 %vm120_vm0, %v359_v13 }
 0x275   :  { %729 = vmatpush.bf16.msrb.mxu3 %v2637_v1 }
 0x279   :  { %730 = vmatpush.bf16.msrb.mxu3 %v2652_v5 }
 0x2f7   :  { %v372_v18 = vpop.f32.mrf.mxu3 }
 0x2f8   :  { %v373_v19 = vadd.f32 %v372_v18, %v2729_v25 }
 0x2fa   :  { %397 = vrot.lane.b32.xlu2 %v373_v19, %s2540_s2  ;;  %v376_v23 = vadd.f32 %v373_v19, %v355_v21  ;;  %v475_v19 = vld [vmem:[#allocation3 + $0x3] sm:$0x1] }
 0x2fc   :  { %v1923_v24 = vmul.f32 -1.442695, %v376_v23 }
 0x2fe   :  { %2231 = vpow2.f32 %v1923_v24 }
 0x2ff   :  { %v374_v20 = vpop.f32.mrf.mxu3 }
 0x304   :  { %v2232_v1 = vpop.eup %2231 }
 0x305   :  { %v380_v26 = vadd.f32 1.0, %v2232_v1 }
 0x307   :  { %2233 = vrcp.f32 %v380_v26  ;;  %v392_v31 = vand.u32 2147483648, %v380_v26  ;;  %vm386_vm7 = vweird.f32 %v380_v26  ;;  %v390_v32 = vand.u32 2147483647, %v380_v26 }
 0x309   :  { %v393_v34 = vor.u32 1.1754944e-38, %v392_v31  ;;  %vm391_vm9 = vcmp.eq.f32.partialorder %v390_v32, 8.507059e+37 }
 0x30d   :  { %v2234_v5 = vpop.eup %2233 }
 0x30e   :  { %v382_v27 = vmul.f32 %v2234_v5, %v380_v26  ;;  %vm387_vm6 = vweird.f32 %v2234_v5 }
 0x30f   :  { %vm388_vm8 = vmor %vm386_vm7, %vm387_vm6 }
 0x310   :  { %v383_v28 = vsub.f32 1.0, %v382_v27 }
 0x312   :  { %v384_v29 = vmul.f32 %v2234_v5, %v383_v28 }
 0x314   :  { %v385_v30 = vadd.f32 %v2234_v5, %v384_v29 }
 0x316   :  { %v389_v33 = vsel %vm388_vm8, %v2234_v5, %v385_v30 }
 0x317   :  { %v394_v36 = vsel %vm391_vm9, %v393_v34, %v389_v33 }
 0x318   :  { %v407_v41 = vsub.f32 1.0, %v394_v36  ;;  %v413_v43 = vmul.f32 %v394_v36, %v354_v7 }
 0x354   :  { %v398_v35 = vpop.permute.xlu2 %397 }
 0x355   :  { %v400_v37 = vmul.f32 %v398_v35, %v394_v36 }
 0x357   :  { %402 = vrot.lane.b32.xlu2 %v400_v37, %s2540_s2 }
 0x3b1   :  { %v403_v38 = vpop.permute.xlu2 %402 }
 0x3b2   :  { %v405_v39 = vadd.f32 %v403_v38, %v355_v21 }
 0x3b4   :  { %2235 = vtanh.f32 %v405_v39 }
 0x3ba   :  { %v2236_v40 = vpop.eup %2235 }
 0x3bb   :  { %409 = vrot.lane.b32.xlu0 %v2236_v40, %s2541_s4 }
 0x42d   :  { %v410_v42 = vpop.permute.xlu0 %409 }
 0x42e   :  { %v412_v44 = vmul.f32 %v410_v42, %v407_v41 }
 0x430   :  { %v414_v45 = vadd.f32 %v413_v43, %v412_v44 }
 0x432   :  { %v416_v46 = vpack.c.bf16 %v414_v45, %v414_v45 }
 0x434   :  { %418 = vrot.lane.b32.xlu1 %v416_v46, %s2541_s4 }
 0x4a6   :  { %v419_v47 = vpop.permute.xlu1 %418 }
 0x4a7   :  { %1924 = vmatmul.msk.bf16.vlgmr.msra.gmra.mxu1 %vm120_vm0, %v419_v47 }
 0x524   :  { %v432_v48 = vpop.f32.mrf.mxu1 }
 0x525   :  { %v433_v49 = vadd.f32 %v432_v48, %v2729_v25 }
 0x527   :  { %457 = vrot.lane.b32.xlu2 %v433_v49, %s2540_s2  ;;  %v436_v52 = vadd.f32 %v433_v49, %v415_v51  ;;  %v535_v49 = vld [vmem:[#allocation3 + $0x4] sm:$0x1] }
 0x529   :  { %v1925_v53 = vmul.f32 -1.442695, %v436_v52 }
 0x52b   :  { %2237 = vpow2.f32 %v1925_v53 }
 0x52c   :  { %v434_v50 = vpop.f32.mrf.mxu1 }
 0x531   :  { %v2238_v54 = vpop.eup %2237 }
 0x532   :  { %v440_v55 = vadd.f32 1.0, %v2238_v54 }
 0x534   :  { %2239 = vrcp.f32 %v440_v55  ;;  %v452_v61 = vand.u32 2147483648, %v440_v55  ;;  %vm446_vm11 = vweird.f32 %v440_v55  ;;  %v450_v62 = vand.u32 2147483647, %v440_v55 }
 0x536   :  { %v453_v0 = vor.u32 1.1754944e-38, %v452_v61  ;;  %vm451_vm13 = vcmp.eq.f32.partialorder %v450_v62, 8.507059e+37 }
 0x53a   :  { %v2240_v56 = vpop.eup %2239 }
 0x53b   :  { %v442_v57 = vmul.f32 %v2240_v56, %v440_v55  ;;  %vm447_vm10 = vweird.f32 %v2240_v56 }
 0x53c   :  { %vm448_vm12 = vmor %vm446_vm11, %vm447_vm10 }
 0x53d   :  { %v443_v58 = vsub.f32 1.0, %v442_v57 }
 0x53f   :  { %v444_v59 = vmul.f32 %v2240_v56, %v443_v58 }
 0x541   :  { %v445_v60 = vadd.f32 %v2240_v56, %v444_v59 }
 0x543   :  { %v449_v63 = vsel %vm448_vm12, %v2240_v56, %v445_v60 }
 0x544   :  { %v454_v3 = vsel %vm451_vm13, %v453_v0, %v449_v63 }
 0x545   :  { %v467_v9 = vsub.f32 1.0, %v454_v3  ;;  %v473_v11 = vmul.f32 %v454_v3, %v414_v45 }
 0x581   :  { %v458_v2 = vpop.permute.xlu2 %457 }
 0x582   :  { %v460_v4 = vmul.f32 %v458_v2, %v454_v3 }
 0x584   :  { %462 = vrot.lane.b32.xlu0 %v460_v4, %s2540_s2 }
 0x5f6   :  { %v463_v6 = vpop.permute.xlu0 %462 }
 0x5f7   :  { %v465_v7 = vadd.f32 %v463_v6, %v415_v51 }
 0x5f9   :  { %2241 = vtanh.f32 %v465_v7 }
 0x5ff   :  { %v2242_v8 = vpop.eup %2241 }
 0x600   :  { %469 = vrot.lane.b32.xlu1 %v2242_v8, %s2541_s4 }
 0x672   :  { %v470_v10 = vpop.permute.xlu1 %469 }
 0x673   :  { %v472_v12 = vmul.f32 %v470_v10, %v467_v9 }
 0x675   :  { %v474_v13 = vadd.f32 %v473_v11, %v472_v12 }
 0x677   :  { %v476_v14 = vpack.c.bf16 %v474_v13, %v474_v13 }
 0x679   :  { %478 = vrot.lane.b32.xlu2 %v476_v14, %s2541_s4 }
 0x6d3   :  { %v479_v15 = vpop.permute.xlu2 %478 }
 0x6d4   :  { %1926 = vmatmul.msk.bf16.vlgmr.msrb.gmra.mxu2 %vm120_vm0, %v479_v15 }
 0x757   :  { %v492_v16 = vpop.f32.mrf.mxu2 }
 0x758   :  { %v493_v17 = vadd.f32 %v492_v16, %v2729_v25 }
 0x75a   :  { %517 = vrot.lane.b32.xlu0 %v493_v17, %s2540_s2  ;;  %v496_v20 = vadd.f32 %v493_v17, %v475_v19  ;;  %v595_v17 = vld [vmem:[#allocation3 + $0x5] sm:$0x1] }
 0x75c   :  { %v1927_v21 = vmul.f32 -1.442695, %v496_v20 }
 0x75e   :  { %2243 = vpow2.f32 %v1927_v21 }
 0x75f   :  { %v494_v18 = vpop.f32.mrf.mxu2 }
 0x764   :  { %v2244_v23 = vpop.eup %2243 }
 0x765   :  { %v500_v24 = vadd.f32 1.0, %v2244_v23 }
 0x767   :  { %2245 = vrcp.f32 %v500_v24  ;;  %v512_v29 = vand.u32 2147483648, %v500_v24  ;;  %vm506_vm15 = vweird.f32 %v500_v24  ;;  %v510_v30 = vand.u32 2147483647, %v500_v24 }
 0x769   :  { %v513_v32 = vor.u32 1.1754944e-38, %v512_v29  ;;  %vm511_vm2 = vcmp.eq.f32.partialorder %v510_v30, 8.507059e+37 }
 0x76d   :  { %v2246_v1 = vpop.eup %2245 }
 0x76e   :  { %v502_v26 = vmul.f32 %v2246_v1, %v500_v24  ;;  %vm507_vm14 = vweird.f32 %v2246_v1 }
 0x76f   :  { %vm508_vm1 = vmor %vm506_vm15, %vm507_vm14 }
 0x770   :  { %v503_v5 = vsub.f32 1.0, %v502_v26 }
 0x772   :  { %v504_v27 = vmul.f32 %v2246_v1, %v503_v5 }
 0x774   :  { %v505_v28 = vadd.f32 %v2246_v1, %v504_v27 }
 0x776   :  { %v509_v31 = vsel %vm508_vm1, %v2246_v1, %v505_v28 }
 0x777   :  { %v514_v34 = vsel %vm511_vm2, %v513_v32, %v509_v31 }
 0x778   :  { %v527_v39 = vsub.f32 1.0, %v514_v34  ;;  %v533_v41 = vmul.f32 %v514_v34, %v474_v13 }
 0x7cc   :  { %v518_v33 = vpop.permute.xlu0 %517 }
 0x7cd   :  { %v520_v35 = vmul.f32 %v518_v33, %v514_v34 }
 0x7cf   :  { %522 = vrot.lane.b32.xlu1 %v520_v35, %s2540_s2 }
 0x841   :  { %v523_v36 = vpop.permute.xlu1 %522 }
 0x842   :  { %v525_v37 = vadd.f32 %v523_v36, %v475_v19 }
 0x844   :  { %2247 = vtanh.f32 %v525_v37 }
 0x84a   :  { %v2248_v38 = vpop.eup %2247 }
 0x84b   :  { %529 = vrot.lane.b32.xlu2 %v2248_v38, %s2541_s4 }
 0x8a5   :  { %v530_v40 = vpop.permute.xlu2 %529 }
 0x8a6   :  { %v532_v42 = vmul.f32 %v530_v40, %v527_v39 }
 0x8a8   :  { %v534_v43 = vadd.f32 %v533_v41, %v532_v42 }
 0x8aa   :  { %v536_v44 = vpack.c.bf16 %v534_v43, %v534_v43 }
 0x8ac   :  { %538 = vrot.lane.b32.xlu0 %v536_v44, %s2541_s4 }
 0x91e   :  { %v539_v45 = vpop.permute.xlu0 %538 }
 0x91f   :  { %1928 = vmatmul.msk.bf16.vlgmr.msra.gmra.mxu3 %vm120_vm0, %v539_v45 }
 0x9a2   :  { %v552_v46 = vpop.f32.mrf.mxu3 }
 0x9a3   :  { %v553_v47 = vadd.f32 %v552_v46, %v2729_v25 }
 0x9a5   :  { %577 = vrot.lane.b32.xlu1 %v553_v47, %s2540_s2  ;;  %v556_v50 = vadd.f32 %v553_v47, %v535_v49  ;;  %v655_v47 = vld [vmem:[#allocation3 + $0x6] sm:$0x1] }
 0x9a7   :  { %v1929_v51 = vmul.f32 -1.442695, %v556_v50 }
 0x9a9   :  { %2249 = vpow2.f32 %v1929_v51 }
 0x9aa   :  { %v554_v48 = vpop.f32.mrf.mxu3 }
 0x9af   :  { %v2250_v52 = vpop.eup %2249 }
 0x9b0   :  { %v560_v53 = vadd.f32 1.0, %v2250_v52 }
 0x9b2   :  { %2251 = vrcp.f32 %v560_v53  ;;  %v572_v59 = vand.u32 2147483648, %v560_v53  ;;  %vm566_vm4 = vweird.f32 %v560_v53  ;;  %v570_v60 = vand.u32 2147483647, %v560_v53 }
 0x9b4   :  { %v573_v62 = vor.u32 1.1754944e-38, %v572_v59  ;;  %vm571_vm6 = vcmp.eq.f32.partialorder %v570_v60, 8.507059e+37 }
 0x9b8   :  { %v2252_v54 = vpop.eup %2251 }
 0x9b9   :  { %v562_v55 = vmul.f32 %v2252_v54, %v560_v53  ;;  %vm567_vm3 = vweird.f32 %v2252_v54 }
 0x9ba   :  { %vm568_vm5 = vmor %vm566_vm4, %vm567_vm3 }
 0x9bb   :  { %v563_v56 = vsub.f32 1.0, %v562_v55 }
 0x9bd   :  { %v564_v57 = vmul.f32 %v2252_v54, %v563_v56 }
 0x9bf   :  { %v565_v58 = vadd.f32 %v2252_v54, %v564_v57 }
 0x9c1   :  { %v569_v61 = vsel %vm568_vm5, %v2252_v54, %v565_v58 }
 0x9c2   :  { %v574_v0 = vsel %vm571_vm6, %v573_v62, %v569_v61 }
 0x9c3   :  { %v587_v7 = vsub.f32 1.0, %v574_v0  ;;  %v593_v9 = vmul.f32 %v574_v0, %v534_v43 }
 0xa17   :  { %v578_v63 = vpop.permute.xlu1 %577 }
 0xa18   :  { %v580_v2 = vmul.f32 %v578_v63, %v574_v0 }
 0xa1a   :  { %582 = vrot.lane.b32.xlu2 %v580_v2, %s2540_s2 }
 0xa74   :  { %v583_v3 = vpop.permute.xlu2 %582 }
 0xa75   :  { %v585_v4 = vadd.f32 %v583_v3, %v535_v49 }
 0xa77   :  { %2253 = vtanh.f32 %v585_v4 }
 0xa7d   :  { %v2254_v6 = vpop.eup %2253 }
 0xa7e   :  { %589 = vrot.lane.b32.xlu0 %v2254_v6, %s2541_s4 }
 0xaf0   :  { %v590_v8 = vpop.permute.xlu0 %589 }
 0xaf1   :  { %v592_v10 = vmul.f32 %v590_v8, %v587_v7 }
 0xaf3   :  { %v594_v11 = vadd.f32 %v593_v9, %v592_v10 }
 0xaf5   :  { %v596_v12 = vpack.c.bf16 %v594_v11, %v594_v11 }
 0xaf7   :  { %598 = vrot.lane.b32.xlu1 %v596_v12, %s2541_s4 }
 0xb69   :  { %v599_v13 = vpop.permute.xlu1 %598 }
 0xb6a   :  { %1930 = vmatmul.msk.bf16.vlgmr.msrb.gmra.mxu1 %vm120_vm0, %v599_v13 }
 0xbe7   :  { %v612_v14 = vpop.f32.mrf.mxu1 }
 0xbe8   :  { %v613_v15 = vadd.f32 %v612_v14, %v2729_v25 }
 0xbea   :  { %637 = vrot.lane.b32.xlu2 %v613_v15, %s2540_s2  ;;  %v616_v18 = vadd.f32 %v613_v15, %v595_v17  ;;  %v715_v15 = vld [vmem:[#allocation3 + $0x7] sm:$0x1] }
 0xbec   :  { %v1931_v19 = vmul.f32 -1.442695, %v616_v18 }
 0xbee   :  { %2255 = vpow2.f32 %v1931_v19 }
 0xbef   :  { %v614_v16 = vpop.f32.mrf.mxu1 }
 0xbf4   :  { %v2256_v20 = vpop.eup %2255 }
 0xbf5   :  { %v620_v21 = vadd.f32 1.0, %v2256_v20 }
 0xbf7   :  { %2257 = vrcp.f32 %v620_v21  ;;  %v632_v27 = vand.u32 2147483648, %v620_v21  ;;  %vm626_vm8 = vweird.f32 %v620_v21  ;;  %v630_v28 = vand.u32 2147483647, %v620_v21 }
 0xbf9   :  { %v633_v30 = vor.u32 1.1754944e-38, %v632_v27  ;;  %vm631_vm10 = vcmp.eq.f32.partialorder %v630_v28, 8.507059e+37 }
 0xbfd   :  { %v2258_v23 = vpop.eup %2257 }
 0xbfe   :  { %v622_v24 = vmul.f32 %v2258_v23, %v620_v21  ;;  %vm627_vm7 = vweird.f32 %v2258_v23 }
 0xbff   :  { %vm628_vm9 = vmor %vm626_vm8, %vm627_vm7  ;;  %vm891_vm8 = vcmask 1040384  }
 0xc00   :  { %v623_v1 = vsub.f32 1.0, %v622_v24 }
 0xc02   :  { %v624_v26 = vmul.f32 %v2258_v23, %v623_v1 }
 0xc04   :  { %v625_v5 = vadd.f32 %v2258_v23, %v624_v26 }
 0xc06   :  { %v629_v29 = vsel %vm628_vm9, %v2258_v23, %v625_v5 }
 0xc07   :  { %v634_v32 = vsel %vm631_vm10, %v633_v30, %v629_v29 }
 0xc08   :  { %v647_v37 = vsub.f32 1.0, %v634_v32  ;;  %v653_v39 = vmul.f32 %v634_v32, %v594_v11 }
 0xc44   :  { %v638_v31 = vpop.permute.xlu2 %637 }
 0xc45   :  { %v640_v33 = vmul.f32 %v638_v31, %v634_v32 }
 0xc47   :  { %642 = vrot.lane.b32.xlu0 %v640_v33, %s2540_s2 }
 0xcb9   :  { %v643_v34 = vpop.permute.xlu0 %642 }
 0xcba   :  { %v645_v35 = vadd.f32 %v643_v34, %v595_v17  ;;  %v2806_v34 = vld [vmem:[%s3236_s8 + $0x8] sm:$0xff] }
 0xcbb   :  { %813 = vmatpush.bf16.msra.mxu1 %v2806_v34 }
 0xcbc   :  { %2259 = vtanh.f32 %v645_v35  ;;  %v60_v35 = vld [vmem:[%s3234_s6] sm:$0xff] }
 0xcc2   :  { %v2260_v36 = vpop.eup %2259 }
 0xcc3   :  { %649 = vrot.lane.b32.xlu1 %v2260_v36, %s2541_s4  ;;  %v61_v36 = vld [vmem:[%s3234_s6 + $0x8] sm:$0xff] }
 0xd35   :  { %v650_v38 = vpop.permute.xlu1 %649 }
 0xd36   :  { %v652_v40 = vmul.f32 %v650_v38, %v647_v37  ;;  %v76_v37 = vmax.f32 %v60_v35, 0.0  ;;  %v77_v38 = vmax.f32 %v61_v36, 0.0 }
 0xd38   :  { %v654_v41 = vadd.f32 %v653_v39, %v652_v40  ;;  %v2818_v39 = vld [vmem:[%s3236_s8] sm:$0xff]  ;;  %v92_v40 = vpack.c.bf16 %v77_v38, %v76_v37 }
 0xd39   :  { %814 = vmatpush.bf16.msra.mxu1 %v2818_v39 }
 0xd3a   :  { %v656_v42 = vpack.c.bf16 %v654_v41, %v654_v41  ;;  %1889 = vmatmul.msk.bf16.vlgmr.msra.gmra.mxu0 %vm120_vm0, %v92_v40 }
 0xd3c   :  { %658 = vrot.lane.b32.xlu2 %v656_v42, %s2541_s4 }
 0xd96   :  { %v659_v43 = vpop.permute.xlu2 %658 }
 0xd97   :  { %1932 = vmatmul.msk.bf16.vlgmr.msra.gmra.mxu2 %vm120_vm0, %v659_v43 }
 0xe1a   :  { %v672_v44 = vpop.f32.mrf.mxu2 }
 0xe1b   :  { %v673_v45 = vadd.f32 %v672_v44, %v2729_v25 }
 0xe1d   :  { %697 = vrot.lane.b32.xlu0 %v673_v45, %s2540_s2  ;;  %v676_v48 = vadd.f32 %v673_v45, %v655_v47 }
 0xe1f   :  { %v1933_v49 = vmul.f32 -1.442695, %v676_v48 }
 0xe21   :  { %2261 = vpow2.f32 %v1933_v49 }
 0xe22   :  { %v674_v46 = vpop.f32.mrf.mxu2 }
 0xe27   :  { %v2262_v50 = vpop.eup %2261 }
 0xe28   :  { %v680_v51 = vadd.f32 1.0, %v2262_v50 }
 0xe2a   :  { %2263 = vrcp.f32 %v680_v51  ;;  %v692_v57 = vand.u32 2147483648, %v680_v51  ;;  %vm686_vm12 = vweird.f32 %v680_v51  ;;  %v690_v58 = vand.u32 2147483647, %v680_v51 }
 0xe2c   :  { %v693_v60 = vor.u32 1.1754944e-38, %v692_v57  ;;  %vm691_vm14 = vcmp.eq.f32.partialorder %v690_v58, 8.507059e+37 }
 0xe30   :  { %v2264_v52 = vpop.eup %2263 }
 0xe31   :  { %v682_v53 = vmul.f32 %v2264_v52, %v680_v51  ;;  %vm687_vm11 = vweird.f32 %v2264_v52 }
 0xe32   :  { %vm688_vm13 = vmor %vm686_vm12, %vm687_vm11 }
 0xe33   :  { %v683_v54 = vsub.f32 1.0, %v682_v53 }
 0xe35   :  { %v684_v55 = vmul.f32 %v2264_v52, %v683_v54 }
 0xe37   :  { %v685_v56 = vadd.f32 %v2264_v52, %v684_v55 }
 0xe39   :  { %v689_v59 = vsel %vm688_vm13, %v2264_v52, %v685_v56  ;;  %v2829_v52 = vld [vmem:[%s3238_s10] sm:$0x1] }
 0xe3a   :  { %v694_v62 = vsel %vm691_vm14, %v693_v60, %v689_v59 }
 0xe3b   :  { %v707_v4 = vsub.f32 1.0, %v694_v62  ;;  %v713_v7 = vmul.f32 %v694_v62, %v654_v41 }
 0xe8f   :  { %v698_v61 = vpop.permute.xlu0 %697 }
 0xe90   :  { %v700_v63 = vmul.f32 %v698_v61, %v694_v62 }
 0xe92   :  { %702 = vrot.lane.b32.xlu1 %v700_v63, %s2540_s2 }
 0xf04   :  { %v703_v0 = vpop.permute.xlu1 %702 }
 0xf05   :  { %v705_v2 = vadd.f32 %v703_v0, %v655_v47  ;;  %v154_v47 = vpop.f32.mrf.mxu0 }
 0xf06   :  { %v155_v48 = vadd.f32 %v2723_v22, %v154_v47  ;;  %v67_v47 = vld [vmem:[%s3234_s6 + $0x38] sm:$0xff] }
 0xf07   :  { %2265 = vtanh.f32 %v705_v2 }
 0xf08   :  { %194 = vst [vmem:[#allocation4] sm:$0xff] %v155_v48 }
 0xf0d   :  { %v2266_v3 = vpop.eup %2265  ;;  %v156_v50 = vpop.f32.mrf.mxu0 }
 0xf0e   :  { %709 = vrot.lane.b32.xlu2 %v2266_v3, %s2541_s4  ;;  %v157_v51 = vadd.f32 %v2723_v22, %v156_v50 }
 0xf0f   :  { %v787_v56 = vld [vmem:[#allocation4] sm:$0x1] }
 0xf10   :  { %195 = vst [vmem:[#allocation4 + $0x8] sm:$0xff] %v157_v51 }
 0xf68   :  { %v710_v6 = vpop.permute.xlu2 %709 }
 0xf69   :  { %v712_v8 = vmul.f32 %v710_v6, %v707_v4 }
 0xf6b   :  { %v714_v9 = vadd.f32 %v713_v7, %v712_v8 }
 0xf6d   :  { %v716_v10 = vpack.c.bf16 %v714_v9, %v714_v9 }
 0xf6f   :  { %718 = vrot.lane.b32.xlu0 %v716_v10, %s2541_s4 }
 0xfe1   :  { %v719_v11 = vpop.permute.xlu0 %718 }
 0xfe2   :  { %1934 = vmatmul.msk.bf16.vlgmr.msrb.gmra.mxu3 %vm120_vm0, %v719_v11 }
0x1065   :  { %v732_v12 = vpop.f32.mrf.mxu3 }
0x1066   :  { %v733_v13 = vadd.f32 %v732_v12, %v2729_v25 }
0x1068   :  { %757 = vrot.lane.b32.xlu1 %v733_v13, %s2540_s2  ;;  %v736_v16 = vadd.f32 %v733_v13, %v715_v15 }
0x106a   :  { %v1935_v17 = vmul.f32 -1.442695, %v736_v16 }
0x106c   :  { %2267 = vpow2.f32 %v1935_v17 }
0x106d   :  { %v734_v14 = vpop.f32.mrf.mxu3 }
0x106e   :  { %v2838_v14 = vld [vmem:[%s3239_s11 + $0x8] sm:$0xff] }
0x106f   :  { %884 = vmatpush.bf16.msrb.mxu2 %v2838_v14 }
0x1072   :  { %v2268_v18 = vpop.eup %2267 }
0x1073   :  { %v740_v19 = vadd.f32 1.0, %v2268_v18 }
0x1075   :  { %2269 = vrcp.f32 %v740_v19  ;;  %v752_v26 = vand.u32 2147483648, %v740_v19  ;;  %vm746_vm1 = vweird.f32 %v740_v19  ;;  %v750_v5 = vand.u32 2147483647, %v740_v19 }
0x1077   :  { %v753_v27 = vor.u32 1.1754944e-38, %v752_v26  ;;  %vm751_vm3 = vcmp.eq.f32.partialorder %v750_v5, 8.507059e+37 }
0x107b   :  { %v2270_v20 = vpop.eup %2269 }
0x107c   :  { %v742_v21 = vmul.f32 %v2270_v20, %v740_v19  ;;  %vm747_vm15 = vweird.f32 %v2270_v20 }
0x107d   :  { %vm748_vm2 = vmor %vm746_vm1, %vm747_vm15 }
0x107e   :  { %v743_v23 = vsub.f32 1.0, %v742_v21 }
0x1080   :  { %v744_v24 = vmul.f32 %v2270_v20, %v743_v23 }
0x1082   :  { %v745_v1 = vadd.f32 %v2270_v20, %v744_v24  ;;  %v2859_v24 = vld [vmem:[%s3240_s12] sm:$0x1] }
0x1084   :  { %v749_v25 = vsel %vm748_vm2, %v2270_v20, %v745_v1 }
0x1085   :  { %v754_v29 = vsel %vm751_vm3, %v753_v27, %v749_v25  ;;  %v62_v27 = vld [vmem:[%s3234_s6 + $0x10] sm:$0xff] }
0x1086   :  { %v767_v41 = vsub.f32 1.0, %v754_v29  ;;  %v773_v43 = vmul.f32 %v754_v29, %v714_v9 }
0x10da   :  { %v758_v28 = vpop.permute.xlu1 %757 }
0x10db   :  { %v760_v30 = vmul.f32 %v758_v28, %v754_v29  ;;  %v63_v28 = vld [vmem:[%s3234_s6 + $0x18] sm:$0xff]  ;;  %v78_v29 = vmax.f32 %v62_v27, 0.0 }
0x10dd   :  { %762 = vrot.lane.b32.xlu2 %v760_v30, %s2540_s2  ;;  %v79_v30 = vmax.f32 %v63_v28, 0.0 }
0x1137   :  { %v763_v31 = vpop.permute.xlu2 %762 }
0x1138   :  { %v765_v32 = vadd.f32 %v763_v31, %v715_v15  ;;  %v2844_v15 = vld [vmem:[%s3239_s11] sm:$0xff]  ;;  %v93_v31 = vpack.c.bf16 %v79_v30, %v78_v29 }
0x1139   :  { %885 = vmatpush.bf16.msrb.mxu2 %v2844_v15 }
0x113a   :  { %2271 = vtanh.f32 %v765_v32  ;;  %1890 = vmatmul.msk.bf16.gmra.mxu0 %vm120_vm0, %v93_v31  ;;  %v785_v32 = vlaneseq }
0x1140   :  { %v2272_v33 = vpop.eup %2271 }
0x1141   :  { %769 = vrot.lane.b32.xlu0 %v2272_v33, %s2541_s4  ;;  %v2873_v33 = vand.u32 127, %v785_v32 }
0x11b3   :  { %v770_v42 = vpop.permute.xlu0 %769 }
0x11b4   :  { %v772_v44 = vmul.f32 %v770_v42, %v767_v41  ;;  %v64_v41 = vld [vmem:[%s3234_s6 + $0x20] sm:$0xff]  ;;  %v65_v42 = vld [vmem:[%s3234_s6 + $0x28] sm:$0xff] }
0x11b6   :  { %v774_v45 = vadd.f32 %v773_v43, %v772_v44  ;;  %v80_v43 = vmax.f32 %v64_v41, 0.0  ;;  %v81_v44 = vmax.f32 %v65_v42, 0.0 }
0x11b8   :  { %v788_v46 = vpack.c.bf16 %v774_v45, %v774_v45 }
0x11ba   :  { %790 = vrot.lane.b32.xlu1 %v788_v46, %s2541_s4  ;;  %v66_v46 = vld [vmem:[%s3234_s6 + $0x30] sm:$0xff] }
0x11bb   :  { %v82_v48 = vmax.f32 %v66_v46, 0.0 }
0x122c   :  { %v791_v49 = vpop.permute.xlu1 %790 }
0x122d   :  { %1944 = vmatmul.msk.bf16.vlgmr.msra.gmra.mxu1 %vm120_vm0, %v791_v49  ;;  %v83_v49 = vmax.f32 %v67_v47, 0.0 }
0x122f   :  { %v95_v51 = vpack.c.bf16 %v83_v49, %v82_v48 }
0x12aa   :  { %v816_v53 = vpop.f32.mrf.mxu1 }
0x12ab   :  { %v817_v54 = vadd.f32 %v816_v53, %v2829_v52 }
0x12ad   :  { %841 = vrot.lane.b32.xlu2 %v817_v54, %s2540_s2  ;;  %v820_v57 = vadd.f32 %v817_v54, %v787_v56 }
0x12af   :  { %v1945_v58 = vmul.f32 -1.442695, %v820_v57 }
0x12b1   :  { %2273 = vpow2.f32 %v1945_v58  ;;  %v68_v58 = vld [vmem:[%s3234_s6 + $0x40] sm:$0xff] }
0x12b2   :  { %v818_v55 = vpop.f32.mrf.mxu1 }
0x12b7   :  { %v2274_v59 = vpop.eup %2273 }
0x12b8   :  { %v824_v60 = vadd.f32 1.0, %v2274_v59  ;;  %v69_v59 = vld [vmem:[%s3234_s6 + $0x48] sm:$0xff] }
0x12ba   :  { %2275 = vrcp.f32 %v824_v60  ;;  %v836_v3 = vand.u32 2147483648, %v824_v60  ;;  %vm830_vm5 = vweird.f32 %v824_v60  ;;  %v834_v4 = vand.u32 2147483647, %v824_v60 }
0x12bc   :  { %v837_v7 = vor.u32 1.1754944e-38, %v836_v3  ;;  %vm835_vm7 = vcmp.eq.f32.partialorder %v834_v4, 8.507059e+37  ;;  %v2542_v4 = vmov 0.0  }
0x12bd   :  { %59 = vst [vmem:[#allocation8] sm:$0xff] %v2542_v4 }
0x12c0   :  { %v2276_v61 = vpop.eup %2275 }
0x12c1   :  { %v826_v62 = vmul.f32 %v2276_v61, %v824_v60  ;;  %vm831_vm4 = vweird.f32 %v2276_v61  ;;  %v84_v60 = vmax.f32 %v68_v58, 0.0 }
0x12c2   :  { %vm832_vm6 = vmor %vm830_vm5, %vm831_vm4 }
0x12c3   :  { %v827_v63 = vsub.f32 1.0, %v826_v62 }
0x12c5   :  { %v828_v0 = vmul.f32 %v2276_v61, %v827_v63 }
0x12c7   :  { %v829_v2 = vadd.f32 %v2276_v61, %v828_v0 }
0x12c9   :  { %v833_v6 = vsel %vm832_vm6, %v2276_v61, %v829_v2  ;;  %v85_v61 = vmax.f32 %v69_v59, 0.0  ;;  %v159_v2 = vpop.f32.mrf.mxu0 }
0x12ca   :  { %v838_v9 = vsel %vm835_vm7, %v837_v7, %v833_v6  ;;  %v160_v3 = vadd.f32 %v2723_v22, %v159_v2 }
0x12cb   :  { %v851_v16 = vsub.f32 1.0, %v838_v9  ;;  %v857_v18 = vmul.f32 %v838_v9, %v774_v45  ;;  %v94_v45 = vpack.c.bf16 %v81_v44, %v80_v43  ;;  %v96_v0 = vpack.c.bf16 %v85_v61, %v84_v60 }
0x12cc   :  { %196 = vst [vmem:[#allocation4 + $0x10] sm:$0xff] %v160_v3 }
0x12cd   :  { %1891 = vmatmul.msk.bf16.gmra.mxu0 %vm120_vm0, %v94_v45  ;;  %v2921_v45 = vmov 0  }
0x12d1   :  { %v161_v6 = vpop.f32.mrf.mxu0 }
0x12d2   :  { %v162_v7 = vadd.f32 %v2723_v22, %v161_v6 }
0x12d4   :  { %197 = vst [vmem:[#allocation4 + $0x18] sm:$0xff] %v162_v7 }
0x12dd   :  { %1892 = vmatmul.msk.bf16.gmra.mxu0 %vm120_vm0, %v95_v51 }
0x12ed   :  { %1893 = vmatmul.msk.bf16.gmra.mxu0 %vm120_vm0, %v96_v0 }
0x1307   :  { %v842_v8 = vpop.permute.xlu2 %841 }
0x1308   :  { %v844_v10 = vmul.f32 %v842_v8, %v838_v9 }
0x130a   :  { %846 = vrot.lane.b32.xlu0 %v844_v10, %s2540_s2 }
0x134a   :  { %v164_v8 = vpop.f32.mrf.mxu0 }
0x134b   :  { %v165_v9 = vadd.f32 %v2723_v22, %v164_v8 }
0x134d   :  { %198 = vst [vmem:[#allocation4 + $0x20] sm:$0xff] %v165_v9 }
0x137c   :  { %v847_v11 = vpop.permute.xlu0 %846 }
0x137d   :  { %v849_v12 = vadd.f32 %v847_v11, %v787_v56  ;;  %v166_v11 = vpop.f32.mrf.mxu0 }
0x137f   :  { %2277 = vtanh.f32 %v849_v12  ;;  %v167_v12 = vadd.f32 %v2723_v22, %v166_v11 }
0x1381   :  { %199 = vst [vmem:[#allocation4 + $0x28] sm:$0xff] %v167_v12 }
0x1385   :  { %v2278_v13 = vpop.eup %2277 }
0x1386   :  { %853 = vrot.lane.b32.xlu1 %v2278_v13, %s2541_s4 }
0x13f8   :  { %v854_v17 = vpop.permute.xlu1 %853 }
0x13f9   :  { %v856_v19 = vmul.f32 %v854_v17, %v851_v16 }
0x13fb   :  { %v2847_v20 = vadd.f32 %v857_v18, %v856_v19 }
0x13fd   :  { %v859_v21 = vpack.c.bf16 %v2847_v20, %v2847_v20 }
0x13ff   :  { %861 = vrot.lane.b32.xlu2 %v859_v21, %s2541_s4  ;;  %v169_v21 = vpop.f32.mrf.mxu0 }
0x1407   :  { %v171_v30 = vpop.f32.mrf.mxu0 }
0x140f   :  { %v174_v41 = vpop.f32.mrf.mxu0 }
0x1417   :  { %v176_v43 = vpop.f32.mrf.mxu0 }
0x1459   :  { %v2852_v23 = vpop.permute.xlu2 %861 }
0x145a   :  { %1954 = vmatmul.msk.bf16.vlgmr.msrb.gmra.mxu2 %vm120_vm0, %v2852_v23 }
0x14dd   :  { %v887_v1 = vpop.f32.mrf.mxu2 }
0x14de   :  { %v2862_v26 = vadd.f32 %v887_v1, %v2859_v24  ;;  %v2283_v1 = vld [vmem:[%s3237_s9] ss:$0 sm:$0xff] }
0x14df   :  { %v172_v31 = vadd.f32 %v2283_v1, %v171_v30  ;;  %v175_v42 = vadd.f32 %v2283_v1, %v174_v41  ;;  %v177_v44 = vadd.f32 %v2283_v1, %v176_v43 }
0x14e0   :  { %v892_v5 = vsel %vm891_vm8, %v2862_v26, -inf }
0x14e1   :  { %893 = vmax.xlane.f32.xlu0 %v892_v5  ;;  %v170_v5 = vadd.f32 %v2283_v1, %v169_v21  ;;  %201 = vst [vmem:[#allocation4 + $0x38] sm:$0xff] %v172_v31 }
0x14e2   :  { %202 = vst [vmem:[#allocation4 + $0x40] sm:$0xff] %v175_v42 }
0x14e3   :  { %200 = vst [vmem:[#allocation4 + $0x30] sm:$0xff] %v170_v5 }
0x14e4   :  { %203 = vst [vmem:[#allocation4 + $0x48] sm:$0xff] %v177_v44 }
0x14e5   :  { %v889_v25 = vpop.f32.mrf.mxu2 }
0x1554   :  { %v2875_v35 = vpop.xlane.xlu0 %893 }
0x1555   :  { %vm895_vm9 = vcmp.eq.f32.partialorder %v2862_v26, %v2875_v35  ;;  %v922_v50 = vsub.f32 %v2862_v26, %v2875_v35 }
0x1556   :  { %v896_v36 = vsel %vm895_vm9, %v2873_v33, 128 }
0x1557   :  { %v897_v37 = vsel %vm891_vm8, %v896_v36, 2147483647  ;;  %v923_v54 = vmul.f32 1.442695, %v922_v50 }
0x1558   :  { %v899_v38 = vshra.s32 %v897_v37, 16  ;;  %v898_v53 = vand.u32 65535, %v897_v37 }
0x1559   :  { %2279 = vpow2.f32 %v923_v54 }
0x155a   :  { %v901_v40 = vcvt.s32.f32 %v899_v38  ;;  %v900_v56 = vcvt.s32.f32 %v898_v53 }
0x155c   :  { %902 = vmin.xlane.f32.xlu1 %v901_v40 }
0x155f   :  { %v2280_v62 = vpop.eup %2279 }
0x1560   :  { %v925_v63 = vsel %vm891_vm8, %v2280_v62, 0.0 }
0x15cf   :  { %v903_v55 = vpop.xlane.xlu1 %902 }
0x15d0   :  { %vm904_vm10 = vcmp.eq.f32.partialorder %v901_v40, %v903_v55  ;;  %v909_v10 = vcvt.f32.s32 %v903_v55 }
0x15d1   :  { %v905_v57 = vsel %vm904_vm10, %v900_v56, inf }
0x15d2   :  { %906 = vmin.xlane.f32.xlu2 %v905_v57  ;;  %v910_v16 = vshll.u32 %v909_v10, 16 }
0x15da   :  { %926 = vadd.xlane.f32.xlu2 %v925_v63 }
0x1645   :  { %v907_v13 = vpop.xlane.xlu2 %906 }
0x1646   :  { %v908_v17 = vcvt.f32.s32 %v907_v13 }
0x1648   :  { %v911_v18 = vadd.s32 %v910_v16, %v908_v17 }
0x164a   :  { %v912_v19 = vrot.slane %v911_v18, 4 }
0x164c   :  { %vm913_vm11 = vcmp.lt.s32.totalorder %v911_v18, %v912_v19 }
0x164d   :  { %v927_v25 = vpop.xlane.xlu2 %926  ;;  %v914_v27 = vsel %vm913_vm11, %v911_v18, %v912_v19 }
0x164e   :  { %2281 = vlog2.f32 %v927_v25  ;;  %v915_v28 = vrot.slane %v914_v27, 2 }
0x1650   :  { %vm916_vm12 = vcmp.lt.s32.totalorder %v914_v27, %v915_v28 }
0x1651   :  { %v917_v22 = vsel %vm916_vm12, %v914_v27, %v915_v28 }
0x1652   :  { %v918_v29 = vrot.slane %v917_v22, 1 }
0x1654   :  { %v2282_v32 = vpop.eup %2281  ;;  %vm919_vm13 = vcmp.lt.s32.totalorder %v917_v22, %v918_v29 }
0x1655   :  { %v929_v36 = vmul.f32 0.6931472, %v2282_v32  ;;  %v920_v37 = vsel %vm919_vm13, %v917_v22, %v918_v29 }
0x1656   :  { %1997 = vpush %v920_v37 }
0x1657   :  { %v930_v38 = vadd.f32 %v929_v36, %v2875_v35 }
0x1659   :  { %v931_v40 = vsub.f32 %v2862_v26, %v930_v38 }
0x165b   :  { %932 = vst [vmem:[#allocation8] sm:$0x1] %v931_v40 }
0x1687   :  { %s2914_s9 = spop %1997 }
0x1688   :  { %p933_p0 = scmp.eq.s32.totalorder %s2914_s9, 1 }
0x1689   :  { %s2543_s3 = smov (!%p933_p0), 64   ;;  %s939_s8 = scalar_lea.vmem (!%p933_p0), [#allocation4], %s2914_s9 }
0x168a   :  { %938 = sbr.rel (%p933_p0) target bundleno = 6942 (0x1b1e), region = 61  ;;  %s2544_s1 = smov (!%p933_p0), 96  }
0x168f   :  { %947 = vmatpush.bf16.msra.mxu0 %v2806_v34  ;;  %1006 = vmatpush.bf16.msra.mxu1 %v2838_v14  ;;  %v940_v47 = vld [vmem:[%s939_s8] sm:$0x1] }
0x1693   :  { %948 = vmatpush.bf16.msra.mxu0 %v2818_v39  ;;  %1007 = vmatpush.bf16.msra.mxu1 %v2844_v15 }
0x1696   :  { %1956 = vmatmul.msk.bf16.vlgmr.msra.gmra.mxu0 %vm120_vm0, %v2852_v23 }
0x1713   :  { %v950_v26 = vpop.f32.mrf.mxu0 }
0x1714   :  { %v951_v35 = vadd.f32 %v950_v26, %v2829_v52 }
0x1716   :  { %975 = vrot.lane.b32.xlu0 %v951_v35, %s2543_s3  ;;  %v954_v48 = vadd.f32 %v951_v35, %v940_v47 }
0x1718   :  { %v1957_v49 = vmul.f32 -1.442695, %v954_v48 }
0x171a   :  { %2284 = vpow2.f32 %v1957_v49 }
0x171b   :  { %v952_v46 = vpop.f32.mrf.mxu0 }
0x1720   :  { %v2285_v50 = vpop.eup %2284 }
0x1721   :  { %v958_v51 = vadd.f32 1.0, %v2285_v50 }
0x1723   :  { %2286 = vrcp.f32 %v958_v51  ;;  %v970_v23 = vand.u32 2147483648, %v958_v51  ;;  %vm964_vm15 = vweird.f32 %v958_v51  ;;  %v968_v58 = vand.u32 2147483647, %v958_v51 }
0x1725   :  { %v971_v60 = vor.u32 1.1754944e-38, %v970_v23  ;;  %vm969_vm2 = vcmp.eq.f32.partialorder %v968_v58, 8.507059e+37 }
0x1729   :  { %v2287_v53 = vpop.eup %2286 }
0x172a   :  { %v960_v54 = vmul.f32 %v2287_v53, %v958_v51  ;;  %vm965_vm14 = vweird.f32 %v2287_v53 }
0x172b   :  { %vm966_vm1 = vmor %vm964_vm15, %vm965_vm14 }
0x172c   :  { %v961_v55 = vsub.f32 1.0, %v960_v54 }
0x172e   :  { %v962_v56 = vmul.f32 %v2287_v53, %v961_v55 }
0x1730   :  { %v963_v57 = vadd.f32 %v2287_v53, %v962_v56 }
0x1732   :  { %v967_v59 = vsel %vm966_vm1, %v2287_v53, %v963_v57 }
0x1733   :  { %v972_v62 = vsel %vm969_vm2, %v971_v60, %v967_v59 }
0x1734   :  { %v985_v4 = vsub.f32 1.0, %v972_v62  ;;  %v991_v7 = vmul.f32 %v972_v62, %v2847_v20 }
0x1788   :  { %v976_v61 = vpop.permute.xlu0 %975 }
0x1789   :  { %v978_v63 = vmul.f32 %v976_v61, %v972_v62 }
0x178b   :  { %980 = vrot.lane.b32.xlu0 %v978_v63, %s2543_s3 }
0x17fd   :  { %v981_v0 = vpop.permute.xlu0 %980 }
0x17fe   :  { %v983_v2 = vadd.f32 %v981_v0, %v940_v47 }
0x1800   :  { %2288 = vtanh.f32 %v983_v2 }
0x1806   :  { %v2289_v3 = vpop.eup %2288 }
0x1807   :  { %987 = vrot.lane.b32.xlu1 %v2289_v3, %s2544_s1 }
0x1879   :  { %v988_v6 = vpop.permute.xlu1 %987 }
0x187a   :  { %v990_v8 = vmul.f32 %v988_v6, %v985_v4 }
0x187c   :  { %v992_v45 = vadd.f32 %v991_v7, %v990_v8  }
0x187e   :  { %v993_v9 = vpack.c.bf16 %v992_v45, %v992_v45 }
0x1880   :  { %995 = vrot.lane.b32.xlu1 %v993_v9, %s2544_s1 }
0x18f2   :  { %v996_v10 = vpop.permute.xlu1 %995 }
0x18f3   :  { %1958 = vmatmul.msk.bf16.vlgmr.msra.gmra.mxu1 %vm120_vm0, %v996_v10 }
0x1970   :  { %v1009_v11 = vpop.f32.mrf.mxu1 }
0x1971   :  { %v1010_v12 = vadd.f32 %v1009_v11, %v2859_v24 }
0x1973   :  { %v1013_v13 = vsel %vm891_vm8, %v1010_v12, -inf }
0x1974   :  { %1014 = vmax.xlane.f32.xlu2 %v1013_v13 }
0x1978   :  { %v1011_v16 = vpop.f32.mrf.mxu1 }
0x19e7   :  { %v1015_v17 = vpop.xlane.xlu2 %1014 }
0x19e8   :  { %vm1016_vm3 = vcmp.eq.f32.partialorder %v1010_v12, %v1015_v17  ;;  %v1043_v18 = vsub.f32 %v1010_v12, %v1015_v17 }
0x19e9   :  { %v1017_v19 = vsel %vm1016_vm3, %v2873_v33, 128 }
0x19ea   :  { %v1018_v21 = vsel %vm891_vm8, %v1017_v19, 2147483647  ;;  %v1044_v1 = vmul.f32 1.442695, %v1043_v18 }
0x19eb   :  { %v1020_v5 = vshra.s32 %v1018_v21, 16  ;;  %v1019_v22 = vand.u32 65535, %v1018_v21 }
0x19ec   :  { %2290 = vpow2.f32 %v1044_v1 }
0x19ed   :  { %v1022_v25 = vcvt.s32.f32 %v1020_v5  ;;  %v1021_v30 = vcvt.s32.f32 %v1019_v22 }
0x19ef   :  { %1023 = vmin.xlane.f32.xlu2 %v1022_v25 }
0x19f2   :  { %v2291_v27 = vpop.eup %2290 }
0x19f3   :  { %v1046_v28 = vsel %vm891_vm8, %v2291_v27, 0.0 }
0x19f4   :  { %1047 = vadd.xlane.f32.xlu1 %v1046_v28 }
0x1a62   :  { %v1024_v29 = vpop.xlane.xlu2 %1023 }
0x1a63   :  { %vm1025_vm4 = vcmp.eq.f32.partialorder %v1022_v25, %v1024_v29  ;;  %v1030_v41 = vcvt.f32.s32 %v1024_v29 }
0x1a64   :  { %v1026_v31 = vsel %vm1025_vm4, %v1021_v30, inf }
0x1a65   :  { %1027 = vmin.xlane.f32.xlu0 %v1026_v31  ;;  %v1031_v43 = vshll.u32 %v1030_v41, 16 }
0x1a67   :  { %v1048_v32 = vpop.xlane.xlu1 %1047 }
0x1a68   :  { %2292 = vlog2.f32 %v1048_v32 }
0x1a6e   :  { %v2293_v36 = vpop.eup %2292 }
0x1a6f   :  { %v1050_v37 = vmul.f32 0.6931472, %v2293_v36 }
0x1a71   :  { %v1051_v38 = vadd.f32 %v1050_v37, %v1015_v17 }
0x1a73   :  { %v1052_v40 = vsub.f32 %v1010_v12, %v1051_v38 }
0x1a75   :  { %1053 = vst [vmem:[#allocation8 + $0x1] sm:$0x1] %v1052_v40 }
0x1ad8   :  { %v1028_v42 = vpop.xlane.xlu0 %1027 }
0x1ad9   :  { %v1029_v44 = vcvt.f32.s32 %v1028_v42 }
0x1adb   :  { %v1032_v26 = vadd.s32 %v1031_v43, %v1029_v44 }
0x1add   :  { %v1033_v35 = vrot.slane %v1032_v26, 4 }
0x1adf   :  { %vm1034_vm5 = vcmp.lt.s32.totalorder %v1032_v26, %v1033_v35 }
0x1ae0   :  { %v1035_v46 = vsel %vm1034_vm5, %v1032_v26, %v1033_v35 }
0x1ae1   :  { %v1036_v47 = vrot.slane %v1035_v46, 2 }
0x1ae3   :  { %vm1037_vm6 = vcmp.lt.s32.totalorder %v1035_v46, %v1036_v47 }
0x1ae4   :  { %v1038_v48 = vsel %vm1037_vm6, %v1035_v46, %v1036_v47 }
0x1ae5   :  { %v1039_v49 = vrot.slane %v1038_v48, 1 }
0x1ae7   :  { %vm1040_vm7 = vcmp.lt.s32.totalorder %v1038_v48, %v1039_v49 }
0x1ae8   :  { %v1041_v50 = vsel %vm1040_vm7, %v1038_v48, %v1039_v49 }
0x1ae9   :  { %1999 = vpush %v1041_v50 }
0x1b1a   :  { %s2000_s18 = spop %1999  }
0x1b1b   :  { %p1054_p1 = scmp.eq.s32.totalorder %s2000_s18, 1 }
0x1b1d   :  { %s1055_s29 = scalar_select %p1054_p1, 1, 0  }
0x1b1e PF:  { %s2012_s10 = scalar_select %p933_p0, 1, 0  ;;  %v2968_v54 = vmov 0   ;;  %v2476_v45 = vphi %v2921_v45, %v992_v45   ;;  %s2472_s18 = sphi %s2919_s18, %s2000_s18   ;;  %s2468_s29 = sphi %s2917_s29, %s1055_s29  }
0x1b1f   :  { %s2954_s17 = scalar_select %p933_p0, %s2914_s9, %s2472_s18 }
0x1b20   :  { %v2013_v51 = vstv %s2012_s10  ;;  %s3243_s29 = smov (%p933_p0, %s2468_s29), 1  ;;  %s2964_s20 = smov 0  }
0x1b21   :  { %vm2014_vm9 = vcmp.ne.s32.totalorder %v2013_v51, 0  ;;  %p1959_p2 = scmp.ne.s32.totalorder %s3243_s29, 0  ;;  %s2966_s21 = smov 0  }
0x1b22   :  { %v2961_v53 = vsel %vm2014_vm9, %v2847_v20, %v2476_v45  ;;  %s2545_s11 = smov (!%p1959_p2), 96   ;;  %s2546_s2 = smov (!%p1959_p2), 64  }
0x1b23   :  { %1068 = sbr.rel (%p1959_p2) target bundleno = 8205 (0x200d), region = 69  ;;  %s1069_s19 = scalar_lea.vmem (!%p1959_p2), [#allocation4], %s2954_s17 }
0x1b28   :  { %v1071_v55 = vpack.c.bf16 %v2961_v53, %v2961_v53  ;;  %1084 = vmatpush.bf16.msra.mxu0 %v2806_v34  ;;  %1143 = vmatpush.bf16.msra.mxu1 %v2838_v14  ;;  %v1070_v23 = vld [vmem:[%s1069_s19] sm:$0x1] }
0x1b2a   :  { %1073 = vrot.lane.b32.xlu0 %v1071_v55, %s2545_s11 }
0x1b2c   :  { %1085 = vmatpush.bf16.msra.mxu0 %v2818_v39  ;;  %1144 = vmatpush.bf16.msra.mxu1 %v2844_v15 }
0x1b9c   :  { %v1074_v20 = vpop.permute.xlu0 %1073 }
0x1b9d   :  { %1960 = vmatmul.msk.bf16.vlgmr.msra.gmra.mxu0 %vm120_vm0, %v1074_v20 }
0x1c1a   :  { %v1087_v45 = vpop.f32.mrf.mxu0 }
0x1c1b   :  { %v1088_v56 = vadd.f32 %v1087_v45, %v2829_v52 }
0x1c1d   :  { %1112 = vrot.lane.b32.xlu0 %v1088_v56, %s2546_s2  ;;  %v1091_v58 = vadd.f32 %v1088_v56, %v1070_v23 }
0x1c1f   :  { %v1961_v59 = vmul.f32 -1.442695, %v1091_v58 }
0x1c21   :  { %2294 = vpow2.f32 %v1961_v59 }
0x1c22   :  { %v1089_v57 = vpop.f32.mrf.mxu0 }
0x1c27   :  { %v2295_v60 = vpop.eup %2294 }
0x1c28   :  { %v1095_v61 = vadd.f32 1.0, %v2295_v60 }
0x1c2a   :  { %2296 = vrcp.f32 %v1095_v61  ;;  %v1107_v4 = vand.u32 2147483648, %v1095_v61  ;;  %vm1101_vm11 = vweird.f32 %v1095_v61  ;;  %v1105_v6 = vand.u32 2147483647, %v1095_v61 }
0x1c2c   :  { %v1108_v8 = vor.u32 1.1754944e-38, %v1107_v4  ;;  %vm1106_vm13 = vcmp.eq.f32.partialorder %v1105_v6, 8.507059e+37 }
0x1c30   :  { %v2297_v62 = vpop.eup %2296 }
0x1c31   :  { %v1097_v63 = vmul.f32 %v2297_v62, %v1095_v61  ;;  %vm1102_vm10 = vweird.f32 %v2297_v62 }
0x1c32   :  { %vm1103_vm12 = vmor %vm1101_vm11, %vm1102_vm10 }
0x1c33   :  { %v1098_v0 = vsub.f32 1.0, %v1097_v63 }
0x1c35   :  { %v1099_v2 = vmul.f32 %v2297_v62, %v1098_v0 }
0x1c37   :  { %v1100_v3 = vadd.f32 %v2297_v62, %v1099_v2 }
0x1c39   :  { %v1104_v7 = vsel %vm1103_vm12, %v2297_v62, %v1100_v3 }
0x1c3a   :  { %v1109_v10 = vsel %vm1106_vm13, %v1108_v8, %v1104_v7 }
0x1c3b   :  { %v1122_v17 = vsub.f32 1.0, %v1109_v10  ;;  %v1128_v19 = vmul.f32 %v2961_v53, %v1109_v10 }
0x1c8f   :  { %v1113_v9 = vpop.permute.xlu0 %1112 }
0x1c90   :  { %v1115_v11 = vmul.f32 %v1113_v9, %v1109_v10 }
0x1c92   :  { %1117 = vrot.lane.b32.xlu1 %v1115_v11, %s2546_s2 }
0x1d04   :  { %v1118_v12 = vpop.permute.xlu1 %1117 }
0x1d05   :  { %v1120_v13 = vadd.f32 %v1118_v12, %v1070_v23 }
0x1d07   :  { %2298 = vtanh.f32 %v1120_v13 }
0x1d0d   :  { %v2299_v16 = vpop.eup %2298 }
0x1d0e   :  { %1124 = vrot.lane.b32.xlu1 %v2299_v16, %s2545_s11 }
0x1d80   :  { %v1125_v18 = vpop.permute.xlu1 %1124 }
0x1d81   :  { %v1127_v21 = vmul.f32 %v1125_v18, %v1122_v17 }
0x1d83   :  { %v1129_v54 = vadd.f32 %v1128_v19, %v1127_v21  }
0x1d85   :  { %v1130_v1 = vpack.c.bf16 %v1129_v54, %v1129_v54 }
0x1d87   :  { %1132 = vrot.lane.b32.xlu2 %v1130_v1, %s2545_s11 }
0x1de1   :  { %v1133_v5 = vpop.permute.xlu2 %1132 }
0x1de2   :  { %1962 = vmatmul.msk.bf16.vlgmr.msra.gmra.mxu1 %vm120_vm0, %v1133_v5 }
0x1e5f   :  { %v1146_v25 = vpop.f32.mrf.mxu1 }
0x1e60   :  { %v1147_v27 = vadd.f32 %v1146_v25, %v2859_v24 }
0x1e62   :  { %v1150_v28 = vsel %vm891_vm8, %v1147_v27, -inf }
0x1e63   :  { %1151 = vmax.xlane.f32.xlu2 %v1150_v28 }
0x1e67   :  { %v1148_v22 = vpop.f32.mrf.mxu1 }
0x1ed6   :  { %v1152_v29 = vpop.xlane.xlu2 %1151 }
0x1ed7   :  { %vm1153_vm14 = vcmp.eq.f32.partialorder %v1147_v27, %v1152_v29  ;;  %v1180_v30 = vsub.f32 %v1147_v27, %v1152_v29 }
0x1ed8   :  { %v1154_v31 = vsel %vm1153_vm14, %v2873_v33, 128 }
0x1ed9   :  { %v1155_v32 = vsel %vm891_vm8, %v1154_v31, 2147483647  ;;  %v1181_v36 = vmul.f32 1.442695, %v1180_v30 }
0x1eda   :  { %v1157_v37 = vshra.s32 %v1155_v32, 16  ;;  %v1156_v42 = vand.u32 65535, %v1155_v32 }
0x1edb   :  { %2300 = vpow2.f32 %v1181_v36 }
0x1edc   :  { %v1159_v38 = vcvt.s32.f32 %v1157_v37  ;;  %v1158_v44 = vcvt.s32.f32 %v1156_v42 }
0x1ede   :  { %1160 = vmin.xlane.f32.xlu0 %v1159_v38 }
0x1ee1   :  { %v2301_v40 = vpop.eup %2300 }
0x1ee2   :  { %v1183_v41 = vsel %vm891_vm8, %v2301_v40, 0.0 }
0x1ee3   :  { %1184 = vadd.xlane.f32.xlu2 %v1183_v41 }
0x1f51   :  { %v1161_v43 = vpop.xlane.xlu0 %1160 }
0x1f52   :  { %vm1162_vm15 = vcmp.eq.f32.partialorder %v1159_v38, %v1161_v43  ;;  %v1167_v50 = vcvt.f32.s32 %v1161_v43 }
0x1f53   :  { %v1163_v26 = vsel %vm1162_vm15, %v1158_v44, inf }
0x1f54   :  { %1164 = vmin.xlane.f32.xlu1 %v1163_v26  ;;  %v1168_v55 = vshll.u32 %v1167_v50, 16 }
0x1f56   :  { %v1185_v35 = vpop.xlane.xlu2 %1184 }
0x1f57   :  { %2302 = vlog2.f32 %v1185_v35 }
0x1f5d   :  { %v2303_v46 = vpop.eup %2302 }
0x1f5e   :  { %v1187_v47 = vmul.f32 0.6931472, %v2303_v46 }
0x1f60   :  { %v1188_v48 = vadd.f32 %v1187_v47, %v1152_v29 }
0x1f62   :  { %v1189_v49 = vsub.f32 %v1147_v27, %v1188_v48 }
0x1f64   :  { %1190 = vst [vmem:[#allocation8 + $0x2] sm:$0x1] %v1189_v49 }
0x1fc7   :  { %v1165_v51 = vpop.xlane.xlu1 %1164 }
0x1fc8   :  { %v1166_v20 = vcvt.f32.s32 %v1165_v51 }
0x1fca   :  { %v1169_v45 = vadd.s32 %v1168_v55, %v1166_v20 }
0x1fcc   :  { %v1170_v56 = vrot.slane %v1169_v45, 4 }
0x1fce   :  { %vm1171_vm1 = vcmp.lt.s32.totalorder %v1169_v45, %v1170_v56 }
0x1fcf   :  { %v1172_v57 = vsel %vm1171_vm1, %v1169_v45, %v1170_v56 }
0x1fd0   :  { %v1173_v23 = vrot.slane %v1172_v57, 2 }
0x1fd2   :  { %vm1174_vm2 = vcmp.lt.s32.totalorder %v1172_v57, %v1173_v23 }
0x1fd3   :  { %v1175_v58 = vsel %vm1174_vm2, %v1172_v57, %v1173_v23 }
0x1fd4   :  { %v1176_v59 = vrot.slane %v1175_v58, 1 }
0x1fd6   :  { %vm1177_vm3 = vcmp.lt.s32.totalorder %v1175_v58, %v1176_v59 }
0x1fd7   :  { %v1178_v60 = vsel %vm1177_vm3, %v1175_v58, %v1176_v59 }
0x1fd8   :  { %2001 = vpush %v1178_v60 }
0x2009   :  { %s2002_s21 = spop %2001  }
0x200a   :  { %p1191_p3 = scmp.eq.s32.totalorder %s2002_s21, 1 }
0x200c   :  { %s1192_s20 = scalar_select %p1191_p3, 1, 0  }
0x200d PF:  { %s2019_s22 = scalar_select %p1959_p2, 1, 0  ;;  %v3019_v63 = vmov 0   ;;  %v2488_v54 = vphi %v2968_v54, %v1129_v54   ;;  %s2484_s21 = sphi %s2966_s21, %s2002_s21   ;;  %s2480_s20 = sphi %s2964_s20, %s1192_s20  }
0x200e   :  { %s3245_s17 = smov (!%p1959_p2, %s2954_s17), %s2484_s21  ;;  %s3247_s20 = smov (%p1959_p2, %s2480_s20), 1 }
0x200f   :  { %v2020_v61 = vstv %s2019_s22  ;;  %p1963_p4 = scmp.ne.s32.totalorder %s3247_s20, 0  ;;  %s3015_s4 = smov 0  }
0x2010   :  { %vm2021_vm4 = vcmp.ne.s32.totalorder %v2020_v61, 0  ;;  %s3017_s5 = smov 0   ;;  %s2547_s12 = smov (!%p1963_p4), 96  }
0x2011   :  { %v3012_v62 = vsel %vm2021_vm4, %v2961_v53, %v2488_v54  ;;  %1205 = sbr.rel (%p1963_p4) target bundleno = 9467 (0x24fb), region = 77  ;;  %s2548_s23 = smov (!%p1963_p4), 64  }
0x2012   :  { %s1206_s24 = scalar_lea.vmem (!%p1963_p4), [#allocation4], %s3245_s17 }
0x2016   :  { %v1208_v0 = vpack.c.bf16 %v3012_v62, %v3012_v62  ;;  %1221 = vmatpush.bf16.msra.mxu0 %v2806_v34  ;;  %1280 = vmatpush.bf16.msra.mxu1 %v2838_v14  ;;  %v1207_v4 = vld [vmem:[%s1206_s24] sm:$0x1] }
0x2018   :  { %1210 = vrot.lane.b32.xlu0 %v1208_v0, %s2547_s12 }
0x201a   :  { %1222 = vmatpush.bf16.msra.mxu0 %v2818_v39  ;;  %1281 = vmatpush.bf16.msra.mxu1 %v2844_v15 }
0x208a   :  { %v1211_v53 = vpop.permute.xlu0 %1210 }
0x208b   :  { %1964 = vmatmul.msk.bf16.vlgmr.msra.gmra.mxu0 %vm120_vm0, %v1211_v53 }
0x2108   :  { %v1224_v54 = vpop.f32.mrf.mxu0 }
0x2109   :  { %v1225_v2 = vadd.f32 %v1224_v54, %v2829_v52 }
0x210b   :  { %1249 = vrot.lane.b32.xlu0 %v1225_v2, %s2548_s23  ;;  %v1228_v6 = vadd.f32 %v1225_v2, %v1207_v4 }
0x210d   :  { %v1965_v7 = vmul.f32 -1.442695, %v1228_v6 }
0x210f   :  { %2304 = vpow2.f32 %v1965_v7 }
0x2110   :  { %v1226_v3 = vpop.f32.mrf.mxu0 }
0x2115   :  { %v2305_v8 = vpop.eup %2304 }
0x2116   :  { %v1232_v9 = vadd.f32 1.0, %v2305_v8 }
0x2118   :  { %2306 = vrcp.f32 %v1232_v9  ;;  %v1244_v17 = vand.u32 2147483648, %v1232_v9  ;;  %vm1238_vm6 = vweird.f32 %v1232_v9  ;;  %v1242_v18 = vand.u32 2147483647, %v1232_v9 }
0x211a   :  { %v1245_v21 = vor.u32 1.1754944e-38, %v1244_v17  ;;  %vm1243_vm9 = vcmp.eq.f32.partialorder %v1242_v18, 8.507059e+37 }
0x211e   :  { %v2307_v10 = vpop.eup %2306 }
0x211f   :  { %v1234_v11 = vmul.f32 %v2307_v10, %v1232_v9  ;;  %vm1239_vm5 = vweird.f32 %v2307_v10 }
0x2120   :  { %vm1240_vm7 = vmor %vm1238_vm6, %vm1239_vm5 }
0x2121   :  { %v1235_v12 = vsub.f32 1.0, %v1234_v11 }
0x2123   :  { %v1236_v13 = vmul.f32 %v2307_v10, %v1235_v12 }
0x2125   :  { %v1237_v16 = vadd.f32 %v2307_v10, %v1236_v13 }
0x2127   :  { %v1241_v19 = vsel %vm1240_vm7, %v2307_v10, %v1237_v16 }
0x2128   :  { %v1246_v5 = vsel %vm1243_vm9, %v1245_v21, %v1241_v19 }
0x2129   :  { %v1259_v29 = vsub.f32 1.0, %v1246_v5  ;;  %v1265_v31 = vmul.f32 %v3012_v62, %v1246_v5 }
0x217d   :  { %v1250_v1 = vpop.permute.xlu0 %1249 }
0x217e   :  { %v1252_v25 = vmul.f32 %v1250_v1, %v1246_v5 }
0x2180   :  { %1254 = vrot.lane.b32.xlu1 %v1252_v25, %s2548_s23 }
0x21f2   :  { %v1255_v27 = vpop.permute.xlu1 %1254 }
0x21f3   :  { %v1257_v28 = vadd.f32 %v1255_v27, %v1207_v4 }
0x21f5   :  { %2308 = vtanh.f32 %v1257_v28 }
0x21fb   :  { %v2309_v22 = vpop.eup %2308 }
0x21fc   :  { %1261 = vrot.lane.b32.xlu1 %v2309_v22, %s2547_s12 }
0x226e   :  { %v1262_v30 = vpop.permute.xlu1 %1261 }
0x226f   :  { %v1264_v32 = vmul.f32 %v1262_v30, %v1259_v29 }
0x2271   :  { %v1266_v63 = vadd.f32 %v1265_v31, %v1264_v32  }
0x2273   :  { %v1267_v36 = vpack.c.bf16 %v1266_v63, %v1266_v63 }
0x2275   :  { %1269 = vrot.lane.b32.xlu2 %v1267_v36, %s2547_s12 }
0x22cf   :  { %v1270_v37 = vpop.permute.xlu2 %1269 }
0x22d0   :  { %1966 = vmatmul.msk.bf16.vlgmr.msra.gmra.mxu1 %vm120_vm0, %v1270_v37 }
0x234d   :  { %v1283_v38 = vpop.f32.mrf.mxu1 }
0x234e   :  { %v1284_v40 = vadd.f32 %v1283_v38, %v2859_v24 }
0x2350   :  { %v1287_v41 = vsel %vm891_vm8, %v1284_v40, -inf }
0x2351   :  { %1288 = vmax.xlane.f32.xlu2 %v1287_v41 }
0x2355   :  { %v1285_v42 = vpop.f32.mrf.mxu1 }
0x23c4   :  { %v1289_v43 = vpop.xlane.xlu2 %1288 }
0x23c5   :  { %vm1290_vm10 = vcmp.eq.f32.partialorder %v1284_v40, %v1289_v43  ;;  %v1317_v44 = vsub.f32 %v1284_v40, %v1289_v43 }
0x23c6   :  { %v1291_v26 = vsel %vm1290_vm10, %v2873_v33, 128 }
0x23c7   :  { %v1292_v35 = vsel %vm891_vm8, %v1291_v26, 2147483647  ;;  %v1318_v46 = vmul.f32 1.442695, %v1317_v44 }
0x23c8   :  { %v1294_v47 = vshra.s32 %v1292_v35, 16  ;;  %v1293_v51 = vand.u32 65535, %v1292_v35 }
0x23c9   :  { %2310 = vpow2.f32 %v1318_v46 }
0x23ca   :  { %v1296_v48 = vcvt.s32.f32 %v1294_v47  ;;  %v1295_v20 = vcvt.s32.f32 %v1293_v51 }
0x23cc   :  { %1297 = vmin.xlane.f32.xlu0 %v1296_v48 }
0x23cf   :  { %v2311_v49 = vpop.eup %2310 }
0x23d0   :  { %v1320_v50 = vsel %vm891_vm8, %v2311_v49, 0.0 }
0x23d1   :  { %1321 = vadd.xlane.f32.xlu2 %v1320_v50 }
0x243f   :  { %v1298_v55 = vpop.xlane.xlu0 %1297 }
0x2440   :  { %vm1299_vm11 = vcmp.eq.f32.partialorder %v1296_v48, %v1298_v55  ;;  %v1304_v60 = vcvt.f32.s32 %v1298_v55 }
0x2441   :  { %v1300_v45 = vsel %vm1299_vm11, %v1295_v20, inf }
0x2442   :  { %1301 = vmin.xlane.f32.xlu1 %v1300_v45  ;;  %v1305_v0 = vshll.u32 %v1304_v60, 16 }
0x2444   :  { %v1322_v56 = vpop.xlane.xlu2 %1321 }
0x2445   :  { %2312 = vlog2.f32 %v1322_v56 }
0x244b   :  { %v2313_v57 = vpop.eup %2312 }
0x244c   :  { %v1324_v23 = vmul.f32 0.6931472, %v2313_v57 }
0x244e   :  { %v1325_v58 = vadd.f32 %v1324_v23, %v1289_v43 }
0x2450   :  { %v1326_v59 = vsub.f32 %v1284_v40, %v1325_v58 }
0x2452   :  { %1327 = vst [vmem:[#allocation8 + $0x3] sm:$0x1] %v1326_v59 }
0x24b5   :  { %v1302_v61 = vpop.xlane.xlu1 %1301 }
0x24b6   :  { %v1303_v53 = vcvt.f32.s32 %v1302_v61 }
0x24b8   :  { %v1306_v54 = vadd.s32 %v1305_v0, %v1303_v53 }
0x24ba   :  { %v1307_v2 = vrot.slane %v1306_v54, 4 }
0x24bc   :  { %vm1308_vm12 = vcmp.lt.s32.totalorder %v1306_v54, %v1307_v2 }
0x24bd   :  { %v1309_v3 = vsel %vm1308_vm12, %v1306_v54, %v1307_v2 }
0x24be   :  { %v1310_v4 = vrot.slane %v1309_v3, 2 }
0x24c0   :  { %vm1311_vm13 = vcmp.lt.s32.totalorder %v1309_v3, %v1310_v4 }
0x24c1   :  { %v1312_v6 = vsel %vm1311_vm13, %v1309_v3, %v1310_v4 }
0x24c2   :  { %v1313_v7 = vrot.slane %v1312_v6, 1 }
0x24c4   :  { %vm1314_vm14 = vcmp.lt.s32.totalorder %v1312_v6, %v1313_v7 }
0x24c5   :  { %v1315_v8 = vsel %vm1314_vm14, %v1312_v6, %v1313_v7 }
0x24c6   :  { %2003 = vpush %v1315_v8 }
0x24f7   :  { %s2004_s5 = spop %2003  }
0x24f8   :  { %p1328_p5 = scmp.eq.s32.totalorder %s2004_s5, 1 }
0x24fa   :  { %s1329_s4 = scalar_select %p1328_p5, 1, 0  }
0x24fb PF:  { %s2026_s25 = scalar_select %p1963_p4, 1, 0  ;;  %v3070_v11 = vmov 0   ;;  %v2500_v63 = vphi %v3019_v63, %v1266_v63   ;;  %s2496_s5 = sphi %s3017_s5, %s2004_s5   ;;  %s2492_s4 = sphi %s3015_s4, %s1329_s4  }
0x24fc   :  { %s3249_s17 = smov (!%p1963_p4, %s3245_s17), %s2496_s5  ;;  %s3251_s4 = smov (%p1963_p4, %s2492_s4), 1 }
0x24fd   :  { %v2027_v9 = vstv %s2026_s25  ;;  %p1967_p6 = scmp.ne.s32.totalorder %s3251_s4, 0  ;;  %s3066_s26 = smov 0  }
0x24fe   :  { %vm2028_vm15 = vcmp.ne.s32.totalorder %v2027_v9, 0  ;;  %s3068_s7 = smov 0   ;;  %s2549_s30 = smov (!%p1967_p6), 96  }
0x24ff   :  { %v3063_v10 = vsel %vm2028_vm15, %v3012_v62, %v2500_v63  ;;  %1342 = sbr.rel (%p1967_p6) target bundleno = 10729 (0x29e9), region = 85  ;;  %s2550_s27 = smov (!%p1967_p6), 64  }
0x2500   :  { %s1343_s14 = scalar_lea.vmem (!%p1967_p6), [#allocation4], %s3249_s17 }
0x2504   :  { %v1345_v12 = vpack.c.bf16 %v3063_v10, %v3063_v10  ;;  %1358 = vmatpush.bf16.msra.mxu0 %v2806_v34  ;;  %1417 = vmatpush.bf16.msra.mxu1 %v2838_v14  ;;  %v1344_v17 = vld [vmem:[%s1343_s14] sm:$0x1] }
0x2506   :  { %1347 = vrot.lane.b32.xlu0 %v1345_v12, %s2549_s30 }
0x2508   :  { %1359 = vmatpush.bf16.msra.mxu0 %v2818_v39  ;;  %1418 = vmatpush.bf16.msra.mxu1 %v2844_v15 }
0x2578   :  { %v1348_v62 = vpop.permute.xlu0 %1347 }
0x2579   :  { %1968 = vmatmul.msk.bf16.vlgmr.msra.gmra.mxu0 %vm120_vm0, %v1348_v62 }
0x25f6   :  { %v1361_v63 = vpop.f32.mrf.mxu0 }
0x25f7   :  { %v1362_v13 = vadd.f32 %v1361_v63, %v2829_v52 }
0x25f9   :  { %1386 = vrot.lane.b32.xlu0 %v1362_v13, %s2550_s27  ;;  %v1365_v18 = vadd.f32 %v1362_v13, %v1344_v17 }
0x25fb   :  { %v1969_v19 = vmul.f32 -1.442695, %v1365_v18 }
0x25fd   :  { %2314 = vpow2.f32 %v1969_v19 }
0x25fe   :  { %v1363_v16 = vpop.f32.mrf.mxu0 }
0x2603   :  { %v2315_v21 = vpop.eup %2314 }
0x2604   :  { %v1369_v1 = vadd.f32 1.0, %v2315_v21 }
0x2606   :  { %2316 = vrcp.f32 %v1369_v1  ;;  %v1381_v29 = vand.u32 2147483648, %v1369_v1  ;;  %vm1375_vm2 = vweird.f32 %v1369_v1  ;;  %v1379_v30 = vand.u32 2147483647, %v1369_v1 }
0x2608   :  { %v1382_v32 = vor.u32 1.1754944e-38, %v1381_v29  ;;  %vm1380_vm4 = vcmp.eq.f32.partialorder %v1379_v30, 8.507059e+37 }
0x260c   :  { %v2317_v5 = vpop.eup %2316 }
0x260d   :  { %v1371_v25 = vmul.f32 %v2317_v5, %v1369_v1  ;;  %vm1376_vm1 = vweird.f32 %v2317_v5 }
0x260e   :  { %vm1377_vm3 = vmor %vm1375_vm2, %vm1376_vm1 }
0x260f   :  { %v1372_v27 = vsub.f32 1.0, %v1371_v25 }
0x2611   :  { %v1373_v28 = vmul.f32 %v2317_v5, %v1372_v27 }
0x2613   :  { %v1374_v22 = vadd.f32 %v2317_v5, %v1373_v28 }
0x2615   :  { %v1378_v31 = vsel %vm1377_vm3, %v2317_v5, %v1374_v22 }
0x2616   :  { %v1383_v37 = vsel %vm1380_vm4, %v1382_v32, %v1378_v31 }
0x2617   :  { %v1396_v43 = vsub.f32 1.0, %v1383_v37  ;;  %v1402_v26 = vmul.f32 %v3063_v10, %v1383_v37 }
0x266b   :  { %v1387_v36 = vpop.permute.xlu0 %1386 }
0x266c   :  { %v1389_v38 = vmul.f32 %v1387_v36, %v1383_v37 }
0x266e   :  { %1391 = vrot.lane.b32.xlu1 %v1389_v38, %s2550_s27 }
0x26e0   :  { %v1392_v40 = vpop.permute.xlu1 %1391 }
0x26e1   :  { %v1394_v41 = vadd.f32 %v1392_v40, %v1344_v17 }
0x26e3   :  { %2318 = vtanh.f32 %v1394_v41 }
0x26e9   :  { %v2319_v42 = vpop.eup %2318 }
0x26ea   :  { %1398 = vrot.lane.b32.xlu1 %v2319_v42, %s2549_s30 }
0x275c   :  { %v1399_v44 = vpop.permute.xlu1 %1398 }
0x275d   :  { %v1401_v35 = vmul.f32 %v1399_v44, %v1396_v43 }
0x275f   :  { %v1403_v11 = vadd.f32 %v1402_v26, %v1401_v35  }
0x2761   :  { %v1404_v46 = vpack.c.bf16 %v1403_v11, %v1403_v11 }
0x2763   :  { %1406 = vrot.lane.b32.xlu2 %v1404_v46, %s2549_s30 }
0x27bd   :  { %v1407_v47 = vpop.permute.xlu2 %1406 }
0x27be   :  { %1970 = vmatmul.msk.bf16.vlgmr.msra.gmra.mxu1 %vm120_vm0, %v1407_v47 }
0x283b   :  { %v1420_v48 = vpop.f32.mrf.mxu1 }
0x283c   :  { %v1421_v49 = vadd.f32 %v1420_v48, %v2859_v24 }
0x283e   :  { %v1424_v50 = vsel %vm891_vm8, %v1421_v49, -inf }
0x283f   :  { %1425 = vmax.xlane.f32.xlu2 %v1424_v50 }
0x2843   :  { %v1422_v51 = vpop.f32.mrf.mxu1 }
0x28b2   :  { %v1426_v55 = vpop.xlane.xlu2 %1425 }
0x28b3   :  { %vm1427_vm5 = vcmp.eq.f32.partialorder %v1421_v49, %v1426_v55  ;;  %v1454_v20 = vsub.f32 %v1421_v49, %v1426_v55 }
0x28b4   :  { %v1428_v45 = vsel %vm1427_vm5, %v2873_v33, 128 }
0x28b5   :  { %v1429_v56 = vsel %vm891_vm8, %v1428_v45, 2147483647  ;;  %v1455_v57 = vmul.f32 1.442695, %v1454_v20 }
0x28b6   :  { %v1431_v23 = vshra.s32 %v1429_v56, 16  ;;  %v1430_v61 = vand.u32 65535, %v1429_v56 }
0x28b7   :  { %2320 = vpow2.f32 %v1455_v57 }
0x28b8   :  { %v1433_v58 = vcvt.s32.f32 %v1431_v23  ;;  %v1432_v53 = vcvt.s32.f32 %v1430_v61 }
0x28ba   :  { %1434 = vmin.xlane.f32.xlu0 %v1433_v58 }
0x28bd   :  { %v2321_v59 = vpop.eup %2320 }
0x28be   :  { %v1457_v60 = vsel %vm891_vm8, %v2321_v59, 0.0 }
0x28bf   :  { %1458 = vadd.xlane.f32.xlu2 %v1457_v60 }
0x292d   :  { %v1435_v0 = vpop.xlane.xlu0 %1434 }
0x292e   :  { %vm1436_vm6 = vcmp.eq.f32.partialorder %v1433_v58, %v1435_v0  ;;  %v1441_v8 = vcvt.f32.s32 %v1435_v0 }
0x292f   :  { %v1437_v54 = vsel %vm1436_vm6, %v1432_v53, inf }
0x2930   :  { %1438 = vmin.xlane.f32.xlu1 %v1437_v54  ;;  %v1442_v12 = vshll.u32 %v1441_v8, 16 }
0x2932   :  { %v1459_v2 = vpop.xlane.xlu2 %1458 }
0x2933   :  { %2322 = vlog2.f32 %v1459_v2 }
0x2939   :  { %v2323_v3 = vpop.eup %2322 }
0x293a   :  { %v1461_v4 = vmul.f32 0.6931472, %v2323_v3 }
0x293c   :  { %v1462_v6 = vadd.f32 %v1461_v4, %v1426_v55 }
0x293e   :  { %v1463_v7 = vsub.f32 %v1421_v49, %v1462_v6 }
0x2940   :  { %1464 = vst [vmem:[#allocation8 + $0x4] sm:$0x1] %v1463_v7 }
0x29a3   :  { %v1439_v9 = vpop.xlane.xlu1 %1438 }
0x29a4   :  { %v1440_v62 = vcvt.f32.s32 %v1439_v9 }
0x29a6   :  { %v1443_v63 = vadd.s32 %v1442_v12, %v1440_v62 }
0x29a8   :  { %v1444_v13 = vrot.slane %v1443_v63, 4 }
0x29aa   :  { %vm1445_vm7 = vcmp.lt.s32.totalorder %v1443_v63, %v1444_v13 }
0x29ab   :  { %v1446_v16 = vsel %vm1445_vm7, %v1443_v63, %v1444_v13 }
0x29ac   :  { %v1447_v17 = vrot.slane %v1446_v16, 2 }
0x29ae   :  { %vm1448_vm9 = vcmp.lt.s32.totalorder %v1446_v16, %v1447_v17 }
0x29af   :  { %v1449_v18 = vsel %vm1448_vm9, %v1446_v16, %v1447_v17 }
0x29b0   :  { %v1450_v19 = vrot.slane %v1449_v18, 1 }
0x29b2   :  { %vm1451_vm10 = vcmp.lt.s32.totalorder %v1449_v18, %v1450_v19 }
0x29b3   :  { %v1452_v21 = vsel %vm1451_vm10, %v1449_v18, %v1450_v19 }
0x29b4   :  { %2005 = vpush %v1452_v21 }
0x29e5   :  { %s2006_s7 = spop %2005  }
0x29e6   :  { %p1465_p7 = scmp.eq.s32.totalorder %s2006_s7, 1 }
0x29e8   :  { %s1466_s26 = scalar_select %p1465_p7, 1, 0  }
0x29e9 PF:  { %s2033_s15 = scalar_select %p1967_p6, 1, 0  ;;  %v3121_v25 = vmov 0   ;;  %v2512_v11 = vphi %v3070_v11, %v1403_v11   ;;  %s2508_s7 = sphi %s3068_s7, %s2006_s7   ;;  %s2504_s26 = sphi %s3066_s26, %s1466_s26  }
0x29ea   :  { %s3253_s17 = smov (!%p1967_p6, %s3249_s17), %s2508_s7  ;;  %s3255_s26 = smov (%p1967_p6, %s2504_s26), 1 }
0x29eb   :  { %v2034_v1 = vstv %s2033_s15  ;;  %p1971_p8 = scmp.ne.s32.totalorder %s3255_s26, 0  ;;  %s3117_s28 = smov 0  }
0x29ec   :  { %vm2035_vm11 = vcmp.ne.s32.totalorder %v2034_v1, 0  ;;  %s3119_s16 = smov 0   ;;  %s2551_s6 = smov (!%p1971_p8), 96  }
0x29ed   :  { %v3114_v5 = vsel %vm2035_vm11, %v3063_v10, %v2512_v11  ;;  %1479 = sbr.rel (%p1971_p8) target bundleno = 11991 (0x2ed7), region = 93  ;;  %s2552_s0 = smov (!%p1971_p8), 64  }
0x29ee   :  { %s1480_s9 = scalar_lea.vmem (!%p1971_p8), [#allocation4], %s3253_s17 }
0x29f2   :  { %v1482_v27 = vpack.c.bf16 %v3114_v5, %v3114_v5  ;;  %1495 = vmatpush.bf16.msra.mxu0 %v2806_v34  ;;  %1554 = vmatpush.bf16.msra.mxu1 %v2838_v14  ;;  %v1481_v29 = vld [vmem:[%s1480_s9] sm:$0x1] }
0x29f4   :  { %1484 = vrot.lane.b32.xlu0 %v1482_v27, %s2551_s6 }
0x29f6   :  { %1496 = vmatpush.bf16.msra.mxu0 %v2818_v39  ;;  %1555 = vmatpush.bf16.msra.mxu1 %v2844_v15 }
0x2a66   :  { %v1485_v10 = vpop.permute.xlu0 %1484 }
0x2a67   :  { %1972 = vmatmul.msk.bf16.vlgmr.msra.gmra.mxu0 %vm120_vm0, %v1485_v10 }
0x2ae4   :  { %v1498_v11 = vpop.f32.mrf.mxu0 }
0x2ae5   :  { %v1499_v28 = vadd.f32 %v1498_v11, %v2829_v52 }
0x2ae7   :  { %1523 = vrot.lane.b32.xlu0 %v1499_v28, %s2552_s0  ;;  %v1502_v30 = vadd.f32 %v1499_v28, %v1481_v29 }
0x2ae9   :  { %v1973_v31 = vmul.f32 -1.442695, %v1502_v30 }
0x2aeb   :  { %2324 = vpow2.f32 %v1973_v31 }
0x2aec   :  { %v1500_v22 = vpop.f32.mrf.mxu0 }
0x2af1   :  { %v2325_v32 = vpop.eup %2324 }
0x2af2   :  { %v1506_v36 = vadd.f32 1.0, %v2325_v32 }
0x2af4   :  { %2326 = vrcp.f32 %v1506_v36  ;;  %v1518_v43 = vand.u32 2147483648, %v1506_v36  ;;  %vm1512_vm13 = vweird.f32 %v1506_v36  ;;  %v1516_v44 = vand.u32 2147483647, %v1506_v36 }
0x2af6   :  { %v1519_v35 = vor.u32 1.1754944e-38, %v1518_v43  ;;  %vm1517_vm15 = vcmp.eq.f32.partialorder %v1516_v44, 8.507059e+37 }
0x2afa   :  { %v2327_v37 = vpop.eup %2326 }
0x2afb   :  { %v1508_v38 = vmul.f32 %v2327_v37, %v1506_v36  ;;  %vm1513_vm12 = vweird.f32 %v2327_v37 }
0x2afc   :  { %vm1514_vm14 = vmor %vm1512_vm13, %vm1513_vm12 }
0x2afd   :  { %v1509_v40 = vsub.f32 1.0, %v1508_v38 }
0x2aff   :  { %v1510_v41 = vmul.f32 %v2327_v37, %v1509_v40 }
0x2b01   :  { %v1511_v42 = vadd.f32 %v2327_v37, %v1510_v41 }
0x2b03   :  { %v1515_v26 = vsel %vm1514_vm14, %v2327_v37, %v1511_v42 }
0x2b04   :  { %v1520_v47 = vsel %vm1517_vm15, %v1519_v35, %v1515_v26 }
0x2b05   :  { %v1533_v55 = vsub.f32 1.0, %v1520_v47  ;;  %v1539_v45 = vmul.f32 %v3114_v5, %v1520_v47 }
0x2b59   :  { %v1524_v46 = vpop.permute.xlu0 %1523 }
0x2b5a   :  { %v1526_v48 = vmul.f32 %v1524_v46, %v1520_v47 }
0x2b5c   :  { %1528 = vrot.lane.b32.xlu1 %v1526_v48, %s2552_s0 }
0x2bce   :  { %v1529_v49 = vpop.permute.xlu1 %1528 }
0x2bcf   :  { %v1531_v50 = vadd.f32 %v1529_v49, %v1481_v29 }
0x2bd1   :  { %2328 = vtanh.f32 %v1531_v50 }
0x2bd7   :  { %v2329_v51 = vpop.eup %2328 }
0x2bd8   :  { %1535 = vrot.lane.b32.xlu1 %v2329_v51, %s2551_s6 }
0x2c4a   :  { %v1536_v20 = vpop.permute.xlu1 %1535 }
0x2c4b   :  { %v1538_v56 = vmul.f32 %v1536_v20, %v1533_v55 }
0x2c4d   :  { %v1540_v25 = vadd.f32 %v1539_v45, %v1538_v56  }
0x2c4f   :  { %v1541_v57 = vpack.c.bf16 %v1540_v25, %v1540_v25 }
0x2c51   :  { %1543 = vrot.lane.b32.xlu2 %v1541_v57, %s2551_s6 }
0x2cab   :  { %v1544_v23 = vpop.permute.xlu2 %1543 }
0x2cac   :  { %1974 = vmatmul.msk.bf16.vlgmr.msra.gmra.mxu1 %vm120_vm0, %v1544_v23 }
0x2d29   :  { %v1557_v58 = vpop.f32.mrf.mxu1 }
0x2d2a   :  { %v1558_v59 = vadd.f32 %v1557_v58, %v2859_v24 }
0x2d2c   :  { %v1561_v60 = vsel %vm891_vm8, %v1558_v59, -inf }
0x2d2d   :  { %1562 = vmax.xlane.f32.xlu2 %v1561_v60 }
0x2d31   :  { %v1559_v61 = vpop.f32.mrf.mxu1 }
0x2da0   :  { %v1563_v0 = vpop.xlane.xlu2 %1562 }
0x2da1   :  { %vm1564_vm1 = vcmp.eq.f32.partialorder %v1558_v59, %v1563_v0  ;;  %v1591_v53 = vsub.f32 %v1558_v59, %v1563_v0 }
0x2da2   :  { %v1565_v54 = vsel %vm1564_vm1, %v2873_v33, 128 }
0x2da3   :  { %v1566_v2 = vsel %vm891_vm8, %v1565_v54, 2147483647  ;;  %v1592_v3 = vmul.f32 1.442695, %v1591_v53 }
0x2da4   :  { %v1568_v4 = vshra.s32 %v1566_v2, 16  ;;  %v1567_v9 = vand.u32 65535, %v1566_v2 }
0x2da5   :  { %2330 = vpow2.f32 %v1592_v3 }
0x2da6   :  { %v1570_v6 = vcvt.s32.f32 %v1568_v4  ;;  %v1569_v62 = vcvt.s32.f32 %v1567_v9 }
0x2da8   :  { %1571 = vmin.xlane.f32.xlu0 %v1570_v6 }
0x2dab   :  { %v2331_v7 = vpop.eup %2330 }
0x2dac   :  { %v1594_v8 = vsel %vm891_vm8, %v2331_v7, 0.0 }
0x2dad   :  { %1595 = vadd.xlane.f32.xlu2 %v1594_v8 }
0x2e1b   :  { %v1572_v12 = vpop.xlane.xlu0 %1571 }
0x2e1c   :  { %vm1573_vm2 = vcmp.eq.f32.partialorder %v1570_v6, %v1572_v12  ;;  %v1578_v21 = vcvt.f32.s32 %v1572_v12 }
0x2e1d   :  { %v1574_v63 = vsel %vm1573_vm2, %v1569_v62, inf }
0x2e1e   :  { %1575 = vmin.xlane.f32.xlu1 %v1574_v63  ;;  %v1579_v27 = vshll.u32 %v1578_v21, 16 }
0x2e20   :  { %v1596_v13 = vpop.xlane.xlu2 %1595 }
0x2e21   :  { %2332 = vlog2.f32 %v1596_v13 }
0x2e27   :  { %v2333_v16 = vpop.eup %2332 }
0x2e28   :  { %v1598_v17 = vmul.f32 0.6931472, %v2333_v16 }
0x2e2a   :  { %v1599_v18 = vadd.f32 %v1598_v17, %v1563_v0 }
0x2e2c   :  { %v1600_v19 = vsub.f32 %v1558_v59, %v1599_v18 }
0x2e2e   :  { %1601 = vst [vmem:[#allocation8 + $0x5] sm:$0x1] %v1600_v19 }
0x2e91   :  { %v1576_v1 = vpop.xlane.xlu1 %1575 }
0x2e92   :  { %v1577_v10 = vcvt.f32.s32 %v1576_v1 }
0x2e94   :  { %v1580_v11 = vadd.s32 %v1579_v27, %v1577_v10 }
0x2e96   :  { %v1581_v28 = vrot.slane %v1580_v11, 4 }
0x2e98   :  { %vm1582_vm3 = vcmp.lt.s32.totalorder %v1580_v11, %v1581_v28 }
0x2e99   :  { %v1583_v22 = vsel %vm1582_vm3, %v1580_v11, %v1581_v28 }
0x2e9a   :  { %v1584_v29 = vrot.slane %v1583_v22, 2 }
0x2e9c   :  { %vm1585_vm4 = vcmp.lt.s32.totalorder %v1583_v22, %v1584_v29 }
0x2e9d   :  { %v1586_v30 = vsel %vm1585_vm4, %v1583_v22, %v1584_v29 }
0x2e9e   :  { %v1587_v31 = vrot.slane %v1586_v30, 1 }
0x2ea0   :  { %vm1588_vm5 = vcmp.lt.s32.totalorder %v1586_v30, %v1587_v31 }
0x2ea1   :  { %v1589_v32 = vsel %vm1588_vm5, %v1586_v30, %v1587_v31 }
0x2ea2   :  { %2007 = vpush %v1589_v32 }
0x2ed3   :  { %s2008_s16 = spop %2007  }
0x2ed4   :  { %p1602_p9 = scmp.eq.s32.totalorder %s2008_s16, 1 }
0x2ed6   :  { %s1603_s28 = scalar_select %p1602_p9, 1, 0  }
0x2ed7 PF:  { %s2040_s29 = scalar_select %p1971_p8, 1, 0  ;;  %v3172_v38 = vmov 0   ;;  %v2524_v25 = vphi %v3121_v25, %v1540_v25   ;;  %s2520_s16 = sphi %s3119_s16, %s2008_s16   ;;  %s2516_s28 = sphi %s3117_s28, %s1603_s28  }
0x2ed8   :  { %s3257_s17 = smov (!%p1971_p8, %s3253_s17), %s2520_s16  ;;  %s3259_s28 = smov (%p1971_p8, %s2516_s28), 1 }
0x2ed9   :  { %v2041_v36 = vstv %s2040_s29  ;;  %p1975_p10 = scmp.ne.s32.totalorder %s3259_s28, 0  ;;  %s3168_s18 = smov 0  }
0x2eda   :  { %vm2042_vm6 = vcmp.ne.s32.totalorder %v2041_v36, 0  ;;  %s3170_s3 = smov 0   ;;  %s2553_s8 = smov (!%p1975_p10), 96  }
0x2edb   :  { %v3165_v37 = vsel %vm2042_vm6, %v3114_v5, %v2524_v25  ;;  %1616 = sbr.rel (%p1975_p10) target bundleno = 13253 (0x33c5), region = 101  ;;  %s2554_s1 = smov (!%p1975_p10), 64  }
0x2edc   :  { %s1617_s10 = scalar_lea.vmem (!%p1975_p10), [#allocation4], %s3257_s17 }
0x2ee0   :  { %v1619_v40 = vpack.c.bf16 %v3165_v37, %v3165_v37  ;;  %1632 = vmatpush.bf16.msra.mxu0 %v2806_v34  ;;  %1691 = vmatpush.bf16.msra.mxu1 %v2838_v14  ;;  %v1618_v43 = vld [vmem:[%s1617_s10] sm:$0x1] }
0x2ee2   :  { %1621 = vrot.lane.b32.xlu0 %v1619_v40, %s2553_s8 }
0x2ee4   :  { %1633 = vmatpush.bf16.msra.mxu0 %v2818_v39  ;;  %1692 = vmatpush.bf16.msra.mxu1 %v2844_v15 }
0x2f54   :  { %v1622_v5 = vpop.permute.xlu0 %1621 }
0x2f55   :  { %1976 = vmatmul.msk.bf16.vlgmr.msra.gmra.mxu0 %vm120_vm0, %v1622_v5 }
0x2fd2   :  { %v1635_v25 = vpop.f32.mrf.mxu0 }
0x2fd3   :  { %v1636_v41 = vadd.f32 %v1635_v25, %v2829_v52 }
0x2fd5   :  { %1660 = vrot.lane.b32.xlu0 %v1636_v41, %s2554_s1  ;;  %v1639_v44 = vadd.f32 %v1636_v41, %v1618_v43 }
0x2fd7   :  { %v1977_v26 = vmul.f32 -1.442695, %v1639_v44 }
0x2fd9   :  { %2334 = vpow2.f32 %v1977_v26 }
0x2fda   :  { %v1637_v42 = vpop.f32.mrf.mxu0 }
0x2fdf   :  { %v2335_v35 = vpop.eup %2334 }
0x2fe0   :  { %v1643_v46 = vadd.f32 1.0, %v2335_v35 }
0x2fe2   :  { %2336 = vrcp.f32 %v1643_v46  ;;  %v1655_v55 = vand.u32 2147483648, %v1643_v46  ;;  %vm1649_vm9 = vweird.f32 %v1643_v46  ;;  %v1653_v20 = vand.u32 2147483647, %v1643_v46 }
0x2fe4   :  { %v1656_v56 = vor.u32 1.1754944e-38, %v1655_v55  ;;  %vm1654_vm11 = vcmp.eq.f32.partialorder %v1653_v20, 8.507059e+37 }
0x2fe8   :  { %v2337_v47 = vpop.eup %2336 }
0x2fe9   :  { %v1645_v48 = vmul.f32 %v2337_v47, %v1643_v46  ;;  %vm1650_vm7 = vweird.f32 %v2337_v47 }
0x2fea   :  { %vm1651_vm10 = vmor %vm1649_vm9, %vm1650_vm7 }
0x2feb   :  { %v1646_v49 = vsub.f32 1.0, %v1645_v48 }
0x2fed   :  { %v1647_v50 = vmul.f32 %v2337_v47, %v1646_v49 }
0x2fef   :  { %v1648_v51 = vadd.f32 %v2337_v47, %v1647_v50 }
0x2ff1   :  { %v1652_v45 = vsel %vm1651_vm10, %v2337_v47, %v1648_v51 }
0x2ff2   :  { %v1657_v23 = vsel %vm1654_vm11, %v1656_v56, %v1652_v45 }
0x2ff3   :  { %v1670_v0 = vsub.f32 1.0, %v1657_v23  ;;  %v1676_v54 = vmul.f32 %v3165_v37, %v1657_v23 }
0x3047   :  { %v1661_v57 = vpop.permute.xlu0 %1660 }
0x3048   :  { %v1663_v58 = vmul.f32 %v1661_v57, %v1657_v23 }
0x304a   :  { %1665 = vrot.lane.b32.xlu1 %v1663_v58, %s2554_s1 }
0x30bc   :  { %v1666_v59 = vpop.permute.xlu1 %1665 }
0x30bd   :  { %v1668_v60 = vadd.f32 %v1666_v59, %v1618_v43 }
0x30bf   :  { %2338 = vtanh.f32 %v1668_v60 }
0x30c5   :  { %v2339_v61 = vpop.eup %2338 }
0x30c6   :  { %1672 = vrot.lane.b32.xlu1 %v2339_v61, %s2553_s8 }
0x3138   :  { %v1673_v53 = vpop.permute.xlu1 %1672 }
0x3139   :  { %v1675_v2 = vmul.f32 %v1673_v53, %v1670_v0 }
0x313b   :  { %v1677_v38 = vadd.f32 %v1676_v54, %v1675_v2  }
0x313d   :  { %v1678_v3 = vpack.c.bf16 %v1677_v38, %v1677_v38 }
0x313f   :  { %1680 = vrot.lane.b32.xlu2 %v1678_v3, %s2553_s8 }
0x3199   :  { %v1681_v4 = vpop.permute.xlu2 %1680 }
0x319a   :  { %1978 = vmatmul.msk.bf16.vlgmr.msra.gmra.mxu1 %vm120_vm0, %v1681_v4 }
0x3217   :  { %v1694_v6 = vpop.f32.mrf.mxu1 }
0x3218   :  { %v1695_v7 = vadd.f32 %v1694_v6, %v2859_v24 }
0x321a   :  { %v1698_v8 = vsel %vm891_vm8, %v1695_v7, -inf }
0x321b   :  { %1699 = vmax.xlane.f32.xlu2 %v1698_v8 }
0x321f   :  { %v1696_v9 = vpop.f32.mrf.mxu1 }
0x328e   :  { %v1700_v12 = vpop.xlane.xlu2 %1699 }
0x328f   :  { %vm1701_vm12 = vcmp.eq.f32.partialorder %v1695_v7, %v1700_v12  ;;  %v1728_v62 = vsub.f32 %v1695_v7, %v1700_v12 }
0x3290   :  { %v1702_v63 = vsel %vm1701_vm12, %v2873_v33, 128 }
0x3291   :  { %v1703_v13 = vsel %vm891_vm8, %v1702_v63, 2147483647  ;;  %v1729_v16 = vmul.f32 1.442695, %v1728_v62 }
0x3292   :  { %v1705_v17 = vshra.s32 %v1703_v13, 16  ;;  %v1704_v1 = vand.u32 65535, %v1703_v13 }
0x3293   :  { %2340 = vpow2.f32 %v1729_v16 }
0x3294   :  { %v1707_v18 = vcvt.s32.f32 %v1705_v17  ;;  %v1706_v10 = vcvt.s32.f32 %v1704_v1 }
0x3296   :  { %1708 = vmin.xlane.f32.xlu0 %v1707_v18 }
0x3299   :  { %v2341_v19 = vpop.eup %2340 }
0x329a   :  { %v1731_v21 = vsel %vm891_vm8, %v2341_v19, 0.0 }
0x329b   :  { %1732 = vadd.xlane.f32.xlu2 %v1731_v21 }
0x3309   :  { %v1709_v27 = vpop.xlane.xlu0 %1708 }
0x330a   :  { %vm1710_vm13 = vcmp.eq.f32.partialorder %v1707_v18, %v1709_v27  ;;  %v1715_v31 = vcvt.f32.s32 %v1709_v27 }
0x330b   :  { %v1711_v11 = vsel %vm1710_vm13, %v1706_v10, inf }
0x330c   :  { %1712 = vmin.xlane.f32.xlu1 %v1711_v11  ;;  %v1716_v36 = vshll.u32 %v1715_v31, 16 }
0x330e   :  { %v1733_v28 = vpop.xlane.xlu2 %1732 }
0x330f   :  { %2342 = vlog2.f32 %v1733_v28 }
0x3315   :  { %v2343_v33 = vpop.eup %2342 }
0x3316   :  { %v1735_v22 = vmul.f32 0.6931472, %v2343_v33 }
0x3318   :  { %v1736_v29 = vadd.f32 %v1735_v22, %v1700_v12 }
0x331a   :  { %v1737_v30 = vsub.f32 %v1695_v7, %v1736_v29 }
0x331c   :  { %1738 = vst [vmem:[#allocation8 + $0x6] sm:$0x1] %v1737_v30 }
0x337f   :  { %v1713_v32 = vpop.xlane.xlu1 %1712 }
0x3380   :  { %v1714_v40 = vcvt.f32.s32 %v1713_v32 }
0x3382   :  { %v1717_v5 = vadd.s32 %v1716_v36, %v1714_v40 }
0x3384   :  { %v1718_v25 = vrot.slane %v1717_v5, 4 }
0x3386   :  { %vm1719_vm14 = vcmp.lt.s32.totalorder %v1717_v5, %v1718_v25 }
0x3387   :  { %v1720_v41 = vsel %vm1719_vm14, %v1717_v5, %v1718_v25 }
0x3388   :  { %v1721_v42 = vrot.slane %v1720_v41, 2 }
0x338a   :  { %vm1722_vm15 = vcmp.lt.s32.totalorder %v1720_v41, %v1721_v42 }
0x338b   :  { %v1723_v43 = vsel %vm1722_vm15, %v1720_v41, %v1721_v42 }
0x338c   :  { %v1724_v44 = vrot.slane %v1723_v43, 1 }
0x338e   :  { %vm1725_vm1 = vcmp.lt.s32.totalorder %v1723_v43, %v1724_v44 }
0x338f   :  { %v1726_v26 = vsel %vm1725_vm1, %v1723_v43, %v1724_v44 }
0x3390   :  { %2009 = vpush %v1726_v26 }
0x33c1   :  { %s2010_s3 = spop %2009  }
0x33c2   :  { %p1739_p11 = scmp.eq.s32.totalorder %s2010_s3, 1 }
0x33c4   :  { %s1740_s18 = scalar_select %p1739_p11, 1, 0  }
0x33c5 PF:  { %s2047_s20 = scalar_select %p1975_p10, 1, 0  ;;  %v2536_v38 = vphi %v3172_v38, %v1677_v38   ;;  %s2532_s3 = sphi %s3170_s3, %s2010_s3   ;;  %s2528_s18 = sphi %s3168_s18, %s1740_s18  }
0x33c6   :  { %s3261_s17 = smov (!%p1975_p10, %s3257_s17), %s2532_s3  ;;  %s3263_s18 = smov (%p1975_p10, %s2528_s18), 1 }
0x33c7   :  { %v2048_v35 = vstv %s2047_s20  ;;  %p1979_p12 = scmp.ne.s32.totalorder %s3263_s18, 0 }
0x33c8   :  { %vm2049_vm2 = vcmp.ne.s32.totalorder %v2048_v35, 0  ;;  %s2555_s21 = smov (!%p1979_p12), 96   ;;  %s2556_s11 = smov (!%p1979_p12), 64  }
0x33c9   :  { %v2050_v46 = vsel %vm2049_vm2, %v3165_v37, %v2536_v38  ;;  %1753 = sbr.rel (%p1979_p12) target bundleno = 14347 (0x380b), region = 109  ;;  %s1754_s2 = scalar_lea.vmem (!%p1979_p12), [#allocation4], %s3261_s17 }
0x33ce   :  { %v1756_v47 = vpack.c.bf16 %v2050_v46, %v2050_v46  ;;  %1769 = vmatpush.bf16.msra.mxu0 %v2806_v34  ;;  %1828 = vmatpush.bf16.msra.mxu1 %v2838_v14  ;;  %v1755_v34 = vld [vmem:[%s1754_s2] sm:$0x1] }
0x33d0   :  { %1758 = vrot.lane.b32.xlu0 %v1756_v47, %s2555_s21 }
0x33d2   :  { %1770 = vmatpush.bf16.msra.mxu0 %v2818_v39  ;;  %1829 = vmatpush.bf16.msra.mxu1 %v2844_v15 }
0x3442   :  { %v1759_v48 = vpop.permute.xlu0 %1758 }
0x3443   :  { %1980 = vmatmul.msk.bf16.vlgmr.msra.gmra.mxu0 %vm120_vm0, %v1759_v48 }
0x34c0   :  { %v1772_v49 = vpop.f32.mrf.mxu0 }
0x34c1   :  { %v1773_v37 = vadd.f32 %v1772_v49, %v2829_v52 }
0x34c3   :  { %1797 = vrot.lane.b32.xlu0 %v1773_v37, %s2556_s11  ;;  %v1776_v50 = vadd.f32 %v1773_v37, %v1755_v34 }
0x34c5   :  { %v1981_v14 = vmul.f32 -1.442695, %v1776_v50 }
0x34c7   :  { %2344 = vpow2.f32 %v1981_v14 }
0x34c8   :  { %v1774_v38 = vpop.f32.mrf.mxu0 }
0x34cd   :  { %v2345_v51 = vpop.eup %2344 }
0x34ce   :  { %v1780_v55 = vadd.f32 1.0, %v2345_v51 }
0x34d0   :  { %2346 = vrcp.f32 %v1780_v55  ;;  %v1792_v57 = vand.u32 2147483648, %v1780_v55  ;;  %vm1786_vm4 = vweird.f32 %v1780_v55  ;;  %v1790_v52 = vand.u32 2147483647, %v1780_v55 }
0x34d2   :  { %v1793_v58 = vor.u32 1.1754944e-38, %v1792_v57  ;;  %vm1791_vm6 = vcmp.eq.f32.partialorder %v1790_v52, 8.507059e+37 }
0x34d6   :  { %v2347_v39 = vpop.eup %2346 }
0x34d7   :  { %v1782_v20 = vmul.f32 %v2347_v39, %v1780_v55  ;;  %vm1787_vm3 = vweird.f32 %v2347_v39 }
0x34d8   :  { %vm1788_vm5 = vmor %vm1786_vm4, %vm1787_vm3 }
0x34d9   :  { %v1783_v15 = vsub.f32 1.0, %v1782_v20 }
0x34db   :  { %v1784_v45 = vmul.f32 %v2347_v39, %v1783_v15 }
0x34dd   :  { %v1785_v56 = vadd.f32 %v2347_v39, %v1784_v45 }
0x34df   :  { %v1789_v23 = vsel %vm1788_vm5, %v2347_v39, %v1785_v56 }
0x34e0   :  { %v1794_v60 = vsel %vm1791_vm6, %v1793_v58, %v1789_v23 }
0x34e1   :  { %v1807_v2 = vsub.f32 1.0, %v1794_v60  ;;  %v1813_v6 = vmul.f32 %v2050_v46, %v1794_v60 }
0x3535   :  { %v1798_v59 = vpop.permute.xlu0 %1797 }
0x3536   :  { %v1800_v61 = vmul.f32 %v1798_v59, %v1794_v60 }
0x3538   :  { %1802 = vrot.lane.b32.xlu1 %v1800_v61, %s2556_s11 }
0x35aa   :  { %v1803_v0 = vpop.permute.xlu1 %1802 }
0x35ab   :  { %v1805_v53 = vadd.f32 %v1803_v0, %v1755_v34 }
0x35ad   :  { %2348 = vtanh.f32 %v1805_v53 }
0x35b3   :  { %v2349_v54 = vpop.eup %2348 }
0x35b4   :  { %1809 = vrot.lane.b32.xlu1 %v2349_v54, %s2555_s21 }
0x3626   :  { %v1810_v3 = vpop.permute.xlu1 %1809 }
0x3627   :  { %v1812_v4 = vmul.f32 %v1810_v3, %v1807_v2 }
0x3629   :  { %v1814_v7 = vadd.f32 %v1813_v6, %v1812_v4 }
0x362b   :  { %v1815_v8 = vpack.c.bf16 %v1814_v7, %v1814_v7 }
0x362d   :  { %1817 = vrot.lane.b32.xlu2 %v1815_v8, %s2555_s21 }
0x3687   :  { %v1818_v9 = vpop.permute.xlu2 %1817 }
0x3688   :  { %1982 = vmatmul.msk.bf16.vlgmr.msra.gmra.mxu1 %vm120_vm0, %v1818_v9 }
0x3705   :  { %v1831_v12 = vpop.f32.mrf.mxu1 }
0x3706   :  { %v1832_v62 = vadd.f32 %v1831_v12, %v2859_v24 }
0x3708   :  { %v1835_v63 = vsel %vm891_vm8, %v1832_v62, -inf }
0x3709   :  { %1836 = vmax.xlane.f32.xlu2 %v1835_v63 }
0x370d   :  { %v1833_v13 = vpop.f32.mrf.mxu1 }
0x377c   :  { %v1837_v16 = vpop.xlane.xlu2 %1836 }
0x377d   :  { %v1838_v17 = vsub.f32 %v1832_v62, %v1837_v16 }
0x377f   :  { %v1839_v18 = vmul.f32 1.442695, %v1838_v17 }
0x3781   :  { %2350 = vpow2.f32 %v1839_v18 }
0x3787   :  { %v2351_v19 = vpop.eup %2350 }
0x3788   :  { %v1841_v21 = vsel %vm891_vm8, %v2351_v19, 0.0 }
0x3789   :  { %1842 = vadd.xlane.f32.xlu0 %v1841_v21 }
0x37fc   :  { %v1843_v1 = vpop.xlane.xlu0 %1842 }
0x37fd   :  { %2352 = vlog2.f32 %v1843_v1 }
0x3803   :  { %v2353_v27 = vpop.eup %2352 }
0x3804   :  { %v1845_v10 = vmul.f32 0.6931472, %v2353_v27 }
0x3806   :  { %v1846_v11 = vadd.f32 %v1845_v10, %v1837_v16 }
0x3808   :  { %v1847_v28 = vsub.f32 %v1832_v62, %v1846_v11 }
0x380a   :  { %1848 = vst [vmem:[#allocation8 + $0x7] sm:$0x1] %v1847_v28 }
0x380b PF:  { %s1856_s22 = sshll.u32 %s3241_s13, 4  ;;  %s2557_s4 = smov [#allocation8]   ;;  %s1857_s22 = int_to_ptr.hbm [resolvable:$true] %s1856_s22 }
0x380c   :  { %s1854_s5 = sshll.u32 %s2557_s4, 4  ;;  %s1855_s5 = int_to_ptr.vmem [resolvable:$true] %s1854_s5 }
0x380d   :  { %1859 = dma.vmem_to_hbm [thread:$0]  %s1855_s5, 128, %s1857_s22, [#allocation6]  }
0x380e   :  { %2464 = dma.done.wait [#allocation6], 128  }
0x380f   :  { %2465 = vsyncadd [#allocation6], 4294967168 }
0x3810   :  { %1864 = vsyncpa [#allocation6], 1 }
0x3811   :  { %1865 = vsyncpa [#allocation7], 1 }

</bundles_post_ra>
